<compile_context>
chip_gen: v7x
topology: tpu7x:2x2x1
jax: 0.10.0
libtpu: 0.0.40
codegen_flags: <defaults>
</compile_context>

<pallas_src>
import functools

import jax
import jax.numpy as jnp
from jax.experimental import pallas as pl
from jax.experimental.pallas import tpu as pltpu

LANE = 128
SUBLANE = 8

IN_DIM = 784    # fc1 fan-in  (multiple of 8 -> no pad needed)
H1_DIM = 800    # fc1 fan-out (padded to 896)
H2_DIM = 1600   # fc2 fan-out (padded to 1664)
OUT_DIM = 10    # fc3 fan-out (left unpadded)


def _pad_axis(a, axis, multiple):
    size = a.shape[axis]
    pad = (-size) % multiple
    if pad == 0:
        return a
    widths = [(0, 0)] * a.ndim
    widths[axis] = (0, pad)
    return jnp.pad(a, widths)


def mlp_kernel(x_ref, w1_ref, b1_ref, w2_ref, b2_ref, w3_ref, b3_ref, o_ref):
    # fc1 + ReLU  (bf16 inputs, f32 accumulation on the MXU)
    h1 = jnp.dot(x_ref[...], w1_ref[...], preferred_element_type=jnp.float32)
    h1 = jnp.maximum(h1 + b1_ref[...], 0.0).astype(jnp.bfloat16)
    # fc2 + ReLU
    h2 = jnp.dot(h1, w2_ref[...], preferred_element_type=jnp.float32)
    h2 = jnp.maximum(h2 + b2_ref[...], 0.0).astype(jnp.bfloat16)
    # fc3 (no activation) -> unpadded 10-wide output (tiny masked store)
    out = jnp.dot(h2, w3_ref[...], preferred_element_type=jnp.float32) + b3_ref[...]
    o_ref[...] = out.astype(o_ref.dtype)


def prepare_params(params):
    """One-time prep: pad hidden dims to 128-lane multiples, cast W to bf16.

    Shapes after prep (weights stored [in, out], biases [1, out]):
      w1: [784, 896]   b1: [1, 896]
      w2: [896, 1664]  b2: [1, 1664]
      w3: [1664, 10]   b3: [1, 10]
    Zero padding preserves the forward pass exactly.
    """
    w1, b1, w2, b2, w3, b3 = params
    w1p = _pad_axis(w1, 1, LANE).astype(jnp.bfloat16)                      # [784, 896]
    b1p = _pad_axis(b1, 1, LANE).astype(jnp.float32)                       # [1, 896]
    w2p = _pad_axis(_pad_axis(w2, 0, LANE), 1, LANE).astype(jnp.bfloat16)  # [896, 1664]
    b2p = _pad_axis(b2, 1, LANE).astype(jnp.float32)                       # [1, 1664]
    w3p = _pad_axis(w3, 0, LANE).astype(jnp.bfloat16)                      # [1664, 10]
    b3p = b3.astype(jnp.float32)                                           # [1, 10]
    return (w1p, b1p, w2p, b2p, w3p, b3p)


@functools.partial(jax.jit, static_argnames=("batch_tile",))
def fully_connected_net(x, padded_params, *, batch_tile=256):
    """x: [B, 784] float. Returns [B, 10] f32: relu(relu(xW1+b1)W2+b2)W3+b3."""
    w1, b1, w2, b2, w3, b3 = padded_params
    B = x.shape[0]
    assert x.shape[1] == IN_DIM

    xp = x.astype(jnp.bfloat16)  # no feature padding needed (784 is full dim)

    # Batch tile: multiple of the 8-sublane granule, capped at batch_tile.
    tb = min(batch_tile, max(SUBLANE, B))
    tb = ((tb + SUBLANE - 1) // SUBLANE) * SUBLANE
    Bp = ((B + tb - 1) // tb) * tb
    if Bp != B:
        xp = jnp.pad(xp, ((0, Bp - B), (0, 0)))

    # Constant index_map -> fetched once, VMEM-resident across grid steps.
    # Buffered(1): do not reserve a pointless second buffer for resident data.
    resident = lambda a: pl.BlockSpec(
        a.shape, lambda i: (0,) * a.ndim, pipeline_mode=pl.Buffered(1))

    flops = 2 * Bp * (IN_DIM * H1_DIM + H1_DIM * H2_DIM + H2_DIM * OUT_DIM)
    weight_bytes = sum(int(a.size) * a.dtype.itemsize
                       for a in (w1, b1, w2, b2, w3, b3))
    bytes_accessed = weight_bytes + int(xp.size) * 2 + Bp * OUT_DIM * 4

    out = pl.pallas_call(
        mlp_kernel,
        out_shape=jax.ShapeDtypeStruct((Bp, OUT_DIM), jnp.float32),
        grid=(Bp // tb,),
        in_specs=[
            pl.BlockSpec((tb, IN_DIM), lambda i: (i, 0)),  # x: batch-tiled, double-buffered
            resident(w1), resident(b1),
            resident(w2), resident(b2),
            resident(w3), resident(b3),
        ],
        out_specs=pl.BlockSpec((tb, OUT_DIM), lambda i: (i, 0)),
        compiler_params=pltpu.CompilerParams(
            # "arbitrary": batch-megacore-splitting would duplicate the weight
            # DMA (the actual bound) across v7x's two TensorCores.
            dimension_semantics=("arbitrary",),
            vmem_limit_bytes=24 << 20,
        ),
        cost_estimate=pl.CostEstimate(
            flops=flops, transcendentals=0, bytes_accessed=bytes_accessed),
    )(xp, w1, b1, w2, b2, w3, b3)

    return out[:B]


def init_linear(key, fan_in, fan_out, dtype=jnp.float32):
    # Mimic PyTorch nn.Linear default init: U(-1/sqrt(fan_in), 1/sqrt(fan_in)).
    kw, kb = jax.random.split(key)
    bound = 1.0 / (fan_in ** 0.5)
    # Stored as [in, out] (transposed vs. torch) so the kernel does x @ W.
    w = jax.random.uniform(kw, (fan_in, fan_out), dtype, -bound, bound)
    b = jax.random.uniform(kb, (1, fan_out), dtype, -bound, bound)
    return w, b


if __name__ == "__main__":
    key = jax.random.PRNGKey(0)
    k_x, k1, k2, k3 = jax.random.split(key, 4)

    B = 8  # small batch
    x = jax.random.normal(k_x, (B, IN_DIM), jnp.float32)

    w1, b1 = init_linear(k1, IN_DIM, H1_DIM)
    w2, b2 = init_linear(k2, H1_DIM, H2_DIM)
    w3, b3 = init_linear(k3, H2_DIM, OUT_DIM)
    params = (w1, b1, w2, b2, w3, b3)

    padded_params = prepare_params(params)  # one-time pad + bf16 cast

    out = fully_connected_net(x, padded_params)
    out = jax.block_until_ready(out)

    # Pure-JAX reference mirroring the kernel's bf16-in / f32-accumulate math.
    r = lambda a: a.astype(jnp.bfloat16).astype(jnp.float32)
    h1 = jnp.maximum(r(x) @ r(w1) + b1, 0.0)
    h2 = jnp.maximum(r(h1) @ r(w2) + b2, 0.0)
    ref = r(h2) @ r(w3) + b3

    assert out.shape == (B, OUT_DIM), out.shape
    assert jnp.allclose(out, ref, atol=2e-2, rtol=2e-2), (
        float(jnp.max(jnp.abs(out - ref))))

    print("KERNEL_OK")
</pallas_src>

<mosaic_0001>
module attributes {stable_mosaic.version = 11 : i64} {
  func.func @mlp_kernel(%arg0: i32, %arg1: memref<8x784xbf16, #tpu.memory_space<vmem>>, %arg2: memref<784x896xbf16, #tpu.memory_space<vmem>>, %arg3: memref<1x896xf32, #tpu.memory_space<vmem>>, %arg4: memref<896x1664xbf16, #tpu.memory_space<vmem>>, %arg5: memref<1x1664xf32, #tpu.memory_space<vmem>>, %arg6: memref<1664x10xbf16, #tpu.memory_space<vmem>>, %arg7: memref<1x10xf32, #tpu.memory_space<vmem>>, %arg8: memref<8x10xf32, #tpu.memory_space<vmem>>) attributes {dimension_semantics = [#tpu.dimension_semantics<arbitrary>], iteration_bounds = array<i64: 1>, scalar_prefetch = 0 : i64, scratch_operands = 0 : i64, tpu.core_type = #tpu.core_type<tc>, window_params = [{transform_indices = @transform_0, window_bounds = array<i64: 8, 784>}, {pipeline_mode = #tpu.pipeline_mode<synchronous>, transform_indices = @transform_1, window_bounds = array<i64: 784, 896>}, {pipeline_mode = #tpu.pipeline_mode<synchronous>, transform_indices = @transform_2, window_bounds = array<i64: 1, 896>}, {pipeline_mode = #tpu.pipeline_mode<synchronous>, transform_indices = @transform_3, window_bounds = array<i64: 896, 1664>}, {pipeline_mode = #tpu.pipeline_mode<synchronous>, transform_indices = @transform_4, window_bounds = array<i64: 1, 1664>}, {pipeline_mode = #tpu.pipeline_mode<synchronous>, transform_indices = @transform_5, window_bounds = array<i64: 1664, 10>}, {pipeline_mode = #tpu.pipeline_mode<synchronous>, transform_indices = @transform_6, window_bounds = array<i64: 1, 10>}, {transform_indices = @transform_7, window_bounds = array<i64: 8, 10>}]} {
    %c0 = arith.constant 0 : index
    %c0_0 = arith.constant 0 : index
    %0 = vector.load %arg1[%c0, %c0_0] : memref<8x784xbf16, #tpu.memory_space<vmem>>, vector<8x784xbf16>
    %c0_1 = arith.constant 0 : index
    %c0_2 = arith.constant 0 : index
    %1 = vector.load %arg2[%c0_1, %c0_2] : memref<784x896xbf16, #tpu.memory_space<vmem>>, vector<784x896xbf16>
    %cst = arith.constant dense<0.000000e+00> : vector<8x896xf32>
    %2 = tpu.matmul %0, %1, %cst {dimension_numbers = #tpu.dot_dimension_numbers<[1], [0], [0], [1], [0, 0, 1, 1], [], []>} : vector<8x784xbf16>, vector<784x896xbf16>, vector<8x896xf32> -> vector<8x896xf32>
    %c0_3 = arith.constant 0 : index
    %c0_4 = arith.constant 0 : index
    %3 = vector.load %arg3[%c0_3, %c0_4] : memref<1x896xf32, #tpu.memory_space<vmem>>, vector<1x896xf32>
    %4 = vector.broadcast %3 : vector<1x896xf32> to vector<8x896xf32>
    %5 = arith.addf %2, %4 : vector<8x896xf32>
    %cst_5 = arith.constant 0.000000e+00 : f32
    %6 = vector.broadcast %cst_5 : f32 to vector<8x896xf32>
    %7 = arith.maximumf %5, %6 : vector<8x896xf32>
    %8 = arith.truncf %7 : vector<8x896xf32> to vector<8x896xbf16>
    %c0_6 = arith.constant 0 : index
    %c0_7 = arith.constant 0 : index
    %9 = vector.load %arg4[%c0_6, %c0_7] : memref<896x1664xbf16, #tpu.memory_space<vmem>>, vector<896x1664xbf16>
    %cst_8 = arith.constant dense<0.000000e+00> : vector<8x1664xf32>
    %10 = tpu.matmul %8, %9, %cst_8 {dimension_numbers = #tpu.dot_dimension_numbers<[1], [0], [0], [1], [0, 0, 1, 1], [], []>} : vector<8x896xbf16>, vector<896x1664xbf16>, vector<8x1664xf32> -> vector<8x1664xf32>
    %c0_9 = arith.constant 0 : index
    %c0_10 = arith.constant 0 : index
    %11 = vector.load %arg5[%c0_9, %c0_10] : memref<1x1664xf32, #tpu.memory_space<vmem>>, vector<1x1664xf32>
    %12 = vector.broadcast %11 : vector<1x1664xf32> to vector<8x1664xf32>
    %13 = arith.addf %10, %12 : vector<8x1664xf32>
    %cst_11 = arith.constant 0.000000e+00 : f32
    %14 = vector.broadcast %cst_11 : f32 to vector<8x1664xf32>
    %15 = arith.maximumf %13, %14 : vector<8x1664xf32>
    %16 = arith.truncf %15 : vector<8x1664xf32> to vector<8x1664xbf16>
    %c0_12 = arith.constant 0 : index
    %c0_13 = arith.constant 0 : index
    %17 = vector.load %arg6[%c0_12, %c0_13] : memref<1664x10xbf16, #tpu.memory_space<vmem>>, vector<1664x10xbf16>
    %cst_14 = arith.constant dense<0.000000e+00> : vector<8x10xf32>
    %18 = tpu.matmul %16, %17, %cst_14 {dimension_numbers = #tpu.dot_dimension_numbers<[1], [0], [0], [1], [0, 0, 1, 1], [], []>} : vector<8x1664xbf16>, vector<1664x10xbf16>, vector<8x10xf32> -> vector<8x10xf32>
    %c0_15 = arith.constant 0 : index
    %c0_16 = arith.constant 0 : index
    %19 = vector.load %arg7[%c0_15, %c0_16] : memref<1x10xf32, #tpu.memory_space<vmem>>, vector<1x10xf32>
    %20 = vector.broadcast %19 : vector<1x10xf32> to vector<8x10xf32>
    %21 = arith.addf %18, %20 : vector<8x10xf32>
    %c0_17 = arith.constant 0 : index
    %c0_18 = arith.constant 0 : index
    %22 = vector.load %arg8[%c0_17, %c0_18] : memref<8x10xf32, #tpu.memory_space<vmem>>, vector<8x10xf32>
    tpu.vector_store %arg8[%c0_17, %c0_18], %21 {strides = array<i32>} : memref<8x10xf32, #tpu.memory_space<vmem>>, vector<8x10xf32>,
    return
  }
  func.func @transform_0(%arg0: i32) -> (i32, i32) {
    %c0_i32 = arith.constant 0 : i32
    %c0_i32_0 = arith.constant 0 : i32
    return %arg0, %c0_i32 : i32, i32
  }
  func.func @transform_1(%arg0: i32) -> (i32, i32) {
    %c0_i32 = arith.constant 0 : i32
    %c0_i32_0 = arith.constant 0 : i32
    %c0_i32_1 = arith.constant 0 : i32
    return %c0_i32, %c0_i32_0 : i32, i32
  }
  func.func @transform_2(%arg0: i32) -> (i32, i32) {
    %c0_i32 = arith.constant 0 : i32
    %c0_i32_0 = arith.constant 0 : i32
    %c0_i32_1 = arith.constant 0 : i32
    return %c0_i32, %c0_i32_0 : i32, i32
  }
  func.func @transform_3(%arg0: i32) -> (i32, i32) {
    %c0_i32 = arith.constant 0 : i32
    %c0_i32_0 = arith.constant 0 : i32
    %c0_i32_1 = arith.constant 0 : i32
    return %c0_i32, %c0_i32_0 : i32, i32
  }
  func.func @transform_4(%arg0: i32) -> (i32, i32) {
    %c0_i32 = arith.constant 0 : i32
    %c0_i32_0 = arith.constant 0 : i32
    %c0_i32_1 = arith.constant 0 : i32
    return %c0_i32, %c0_i32_0 : i32, i32
  }
  func.func @transform_5(%arg0: i32) -> (i32, i32) {
    %c0_i32 = arith.constant 0 : i32
    %c0_i32_0 = arith.constant 0 : i32
    %c0_i32_1 = arith.constant 0 : i32
    return %c0_i32, %c0_i32_0 : i32, i32
  }
  func.func @transform_6(%arg0: i32) -> (i32, i32) {
    %c0_i32 = arith.constant 0 : i32
    %c0_i32_0 = arith.constant 0 : i32
    %c0_i32_1 = arith.constant 0 : i32
    return %c0_i32, %c0_i32_0 : i32, i32
  }
  func.func @transform_7(%arg0: i32) -> (i32, i32) {
    %c0_i32 = arith.constant 0 : i32
    %c0_i32_0 = arith.constant 0 : i32
    return %arg0, %c0_i32 : i32, i32
  }
}

</mosaic_0001>

<bundles_post_ra>
// kernel: fully_connected_net.1
= control target key start
LH: loop header
LB: loop body
LE: loop exit
PB: predicated region body
PF: predicated region fallthrough
CT: control target
= control target key end

     0   :  { %12 = vsyncpa [#allocation3], 0  ;;  %s14001_s0 = inlined_call_operand.vmem [shape: bf16[8,784], index: 0, kind: input, shape index: {}]   ;;  %s14002_s1 = inlined_call_operand.hbm [shape: bf16[784,896], index: 1, kind: input, shape index: {}]   ;;  %s14003_s2 = inlined_call_operand.hbm [shape: f32[1,896], index: 2, kind: input, shape index: {}]   ;;  %s14004_s3 = inlined_call_operand.hbm [shape: bf16[896,1664], index: 3, kind: input, shape index: {}]   ;;  %s14005_s4 = inlined_call_operand.hbm [shape: f32[1,1664], index: 4, kind: input, shape index: {}]   ;;  %s14006_s5 = inlined_call_operand.vmem [shape: bf16[1664,10], index: 5, kind: input, shape index: {}]   ;;  %s14007_s6 = inlined_call_operand.hbm [shape: f32[1,10], index: 6, kind: input, shape index: {}]   ;;  %s14008_s7 = inlined_call_operand.hbm [shape: f32[8,10], index: 7, kind: output, shape index: {}]  }
   0x1   :  { %13 = vsyncpa [#allocation6], 0 }
   0x2   :  { %14 = vsyncpa [#allocation9], 0 }
   0x3   :  { %15 = vsyncpa [#allocation4], 0  ;;  %s13301_s24 = smov [#allocation5]   ;;  %s13302_s26 = smov [#allocation8]  }
   0x4   :  { %s36_s25 = sshll.u32 %s13301_s24, 4  ;;  %s58_s27 = sshll.u32 %s13302_s26, 4  ;;  %s37_s25 = int_to_ptr.vmem [resolvable:$true] %s36_s25  ;;  %s59_s27 = int_to_ptr.vmem [resolvable:$true] %s58_s27 }
   0x5   :  { %s13161_s30 = scalar_lea.hbm %s14003_s2, 112 }
   0x6   :  { %p13162_p0 = scmp.ne.s32.totalorder %s14003_s2, %s13161_s30  ;;  %p13165_p1 = scmp.lt.u32.totalorder %s13161_s30, %s14003_s2 }
   0x8   :  { %p13167_p2 = pnand %p13165_p1, %p13162_p0 }
   0xa   :  { %13170 = shalt.err (!%p13167_p2)
}
   0xb   :  { %s13171_s12 = scalar_lea.vmem %s37_s25, 112  ;;  %s13175_s13 = scalar_lea.vmem %s37_s25, 128 }
   0xc   :  { %p13172_p3 = scmp.ne.s32.totalorder %s37_s25, %s13171_s12  ;;  %p13176_p4 = scmp.lt.s32.totalorder %s37_s25, %s37_s25 }
   0xd   :  { %p13177_p5 = scmp.lt.s32.totalorder %s13175_s13, %s13171_s12 }
   0xf   :  { %p13178_p6 = por %p13177_p5, %p13176_p4 }
  0x11   :  { %p13179_p7 = pnand %p13178_p6, %p13172_p3 }
  0x13   :  { %13182 = shalt.err (!%p13179_p7)
}
  0x14   :  { %39 = dma.hbm_to_vmem [thread:$0]  %s14003_s2, 112, %s37_s25, [#allocation6]  }
  0x15   :  { %s13183_s18 = scalar_lea.hbm %s14005_s4, 208 }
  0x16   :  { %p13184_p8 = scmp.ne.s32.totalorder %s14005_s4, %s13183_s18  ;;  %p13187_p9 = scmp.lt.u32.totalorder %s13183_s18, %s14005_s4 }
  0x18   :  { %p13189_p10 = pnand %p13187_p9, %p13184_p8 }
  0x1a   :  { %13192 = shalt.err (!%p13189_p10)
}
  0x1b   :  { %s13193_s23 = scalar_lea.vmem %s59_s27, 208  ;;  %s13197_s24 = scalar_lea.vmem %s59_s27, 224 }
  0x1c   :  { %p13194_p11 = scmp.ne.s32.totalorder %s59_s27, %s13193_s23  ;;  %p13198_p12 = scmp.lt.s32.totalorder %s59_s27, %s59_s27 }
  0x1d   :  { %p13199_p13 = scmp.lt.s32.totalorder %s13197_s24, %s13193_s23 }
  0x1f   :  { %p13200_p0 = por %p13199_p13, %p13198_p12 }
  0x21   :  { %p13201_p1 = pnand %p13200_p0, %p13194_p11 }
  0x23   :  { %13204 = shalt.err (!%p13201_p1)
}
  0x24   :  { %61 = dma.hbm_to_vmem [thread:$0]  %s14005_s4, 208, %s59_s27, [#allocation9]  }
  0x25   :  { %s13303_s26 = smov [#allocation2]   ;;  %s13205_s8 = scalar_lea.hbm %s14002_s1, 43904 }
  0x26   :  { %s23_s28 = sshll.u32 %s13303_s26, 4  ;;  %p13206_p2 = scmp.ne.s32.totalorder %s14002_s1, %s13205_s8  ;;  %s24_s28 = int_to_ptr.vmem [resolvable:$true] %s23_s28 }
  0x27   :  { %p13209_p3 = scmp.lt.u32.totalorder %s13205_s8, %s14002_s1 }
  0x29   :  { %p13211_p4 = pnand %p13209_p3, %p13206_p2 }
  0x2b   :  { %13214 = shalt.err (!%p13211_p4)
}
  0x2c   :  { %s13215_s13 = scalar_lea.vmem %s24_s28, 43904  ;;  %p13220_p6 = scmp.lt.s32.totalorder %s24_s28, %s24_s28 }
  0x2d   :  { %p13216_p5 = scmp.ne.s32.totalorder %s24_s28, %s13215_s13  ;;  %p13221_p7 = scmp.lt.s32.totalorder %s13215_s13, %s13215_s13 }
  0x2f   :  { %p13222_p8 = por %p13221_p7, %p13220_p6 }
  0x31   :  { %p13223_p9 = pnand %p13222_p8, %p13216_p5 }
  0x33   :  { %13226 = shalt.err (!%p13223_p9)
}
  0x34   :  { %s13304_s4 = smov 448   ;;  %s13305_s27 = smov 28  }
  0x35   :  { %29 = dma.hbm_to_vmem [thread:$0]  %s14002_s1, 43904, %s24_s28, [#allocation3], %s13304_s4, %s13304_s4, %s13305_s27  }
  0x36   :  { %s13306_s16 = smov [#allocation7]   ;;  %s13227_s20 = scalar_lea.hbm %s14004_s3, 93184 }
  0x37   :  { %s45_s17 = sshll.u32 %s13306_s16, 4  ;;  %p13228_p10 = scmp.ne.s32.totalorder %s14004_s3, %s13227_s20  ;;  %s46_s17 = int_to_ptr.vmem [resolvable:$true] %s45_s17 }
  0x38   :  { %p13231_p11 = scmp.lt.u32.totalorder %s13227_s20, %s14004_s3 }
  0x3a   :  { %p13233_p12 = pnand %p13231_p11, %p13228_p10 }
  0x3c   :  { %13236 = shalt.err (!%p13233_p12)
}
  0x3d   :  { %s13237_s2 = scalar_lea.vmem %s46_s17, 93184  ;;  %p13242_p0 = scmp.lt.s32.totalorder %s46_s17, %s46_s17 }
  0x3e   :  { %p13238_p13 = scmp.ne.s32.totalorder %s46_s17, %s13237_s2  ;;  %p13243_p1 = scmp.lt.s32.totalorder %s13237_s2, %s13237_s2 }
  0x40   :  { %p13244_p2 = por %p13243_p1, %p13242_p0 }
  0x42   :  { %p13245_p3 = pnand %p13244_p2, %p13238_p13 }
  0x44   :  { %13248 = shalt.err (!%p13245_p3)
}
  0x45   :  { %s13307_s1 = smov 832   ;;  %s13308_s25 = smov 52  }
  0x46   :  { %51 = dma.hbm_to_vmem [thread:$0]  %s14004_s3, 93184, %s46_s17, [#allocation6], %s13307_s1, %s13307_s1, %s13308_s25  }
  0x47   :  { %s13309_s29 = smov [#allocation10]   ;;  %s13249_s10 = scalar_lea.hbm %s14007_s6, 16 }
  0x48   :  { %s70_s30 = sshll.u32 %s13309_s29, 4  ;;  %p13250_p4 = scmp.ne.s32.totalorder %s14007_s6, %s13249_s10  ;;  %s71_s30 = int_to_ptr.vmem [resolvable:$true] %s70_s30 }
  0x49   :  { %p13253_p5 = scmp.lt.u32.totalorder %s13249_s10, %s14007_s6 }
  0x4b   :  { %p13255_p6 = pnand %p13253_p5, %p13250_p4 }
  0x4d   :  { %13258 = shalt.err (!%p13255_p6)
}
  0x4e   :  { %s13259_s27 = scalar_lea.vmem %s71_s30, 16  ;;  %s13263_s3 = scalar_lea.vmem %s71_s30, 32 }
  0x4f   :  { %p13260_p7 = scmp.ne.s32.totalorder %s71_s30, %s13259_s27  ;;  %p13264_p8 = scmp.lt.s32.totalorder %s71_s30, %s71_s30 }
  0x50   :  { %p13265_p9 = scmp.lt.s32.totalorder %s13263_s3, %s13259_s27 }
  0x52   :  { %p13266_p10 = por %p13265_p9, %p13264_p8 }
  0x54   :  { %p13267_p11 = pnand %p13266_p10, %p13260_p7 }
  0x56   :  { %13270 = shalt.err (!%p13267_p11)
}
  0x57   :  { %73 = dma.hbm_to_vmem [thread:$0]  %s14007_s6, 16, %s71_s30, [#allocation9]  }
  0x58   :  { %13293 = dma.done.wait [#allocation3], 43904  }
  0x59   :  { %13294 = vsyncadd [#allocation3], 4294923392 }
  0x5a   :  { %13295 = dma.done.wait [#allocation6], 93296  }
  0x5b   :  { %13296 = vsyncadd [#allocation6], 4294874000 }
  0x5c   :  { %13297 = dma.done.wait [#allocation9], 224  }
  0x5d   :  { %13298 = vsyncadd [#allocation9], 4294967072  ;;  %v11494_v0 = vld [vmem:[#allocation2 + $0x4] ss:$28 sps:$4 sm:$0xff]   ;;  %v11496_v1 = vld [vmem:[#allocation2 + $0xc] ss:$28 sps:$4 sm:$0xff]  }
  0x5e   :  { %2315 = vmatprep.subr.bf16.mxu0 %v11494_v0  ;;  %v11498_v2 = vld [vmem:[#allocation2] ss:$28 sps:$4 sm:$0xff]   ;;  %v11499_v3 = vld [vmem:[#allocation2 + $0x8] ss:$28 sps:$4 sm:$0xff]   ;;  %2479 = vmatprep.subr.bf16.mxu1 %v11496_v1  ;;  %v11504_v6 = vld [vmem:[#allocation2 + $0x38] ss:$28 sps:$4 sm:$0xff]  }
  0x5f   :  { %v11500_v4 = vld [vmem:[#allocation2 + $0x3c] ss:$28 sps:$4 sm:$0xff]   ;;  %2316 = vmatpush1.bf16.msra.mxu0 %v11498_v2  ;;  %2480 = vmatpush1.bf16.msra.mxu1 %v11499_v3  ;;  %v11502_v5 = vld [vmem:[#allocation2 + $0x44] ss:$28 sps:$4 sm:$0xff]   ;;  %v11506_v8 = vld [vmem:[#allocation2 + $0x74] ss:$28 sps:$4 sm:$0xff]  }
  0x60   :  { %2317 = vmatprep.subr.bf16.mxu0 %v11500_v4  ;;  %v11505_v7 = vld [vmem:[#allocation2 + $0x40] ss:$28 sps:$4 sm:$0xff]   ;;  %2481 = vmatprep.subr.bf16.mxu1 %v11502_v5  ;;  %v11510_v10 = vld [vmem:[#allocation2 + $0x70] ss:$28 sps:$4 sm:$0xff]   ;;  %v11511_v11 = vld [vmem:[#allocation2 + $0x78] ss:$28 sps:$4 sm:$0xff]  }
  0x61   :  { %v11508_v9 = vld [vmem:[#allocation2 + $0x7c] ss:$28 sps:$4 sm:$0xff]   ;;  %v11512_v12 = vld [vmem:[#allocation2 + $0xac] ss:$28 sps:$4 sm:$0xff]   ;;  %v11514_v13 = vld [vmem:[#allocation2 + $0xb4] ss:$28 sps:$4 sm:$0xff]  }
  0x62   :  { %v11516_v14 = vld [vmem:[#allocation2 + $0xa8] ss:$28 sps:$4 sm:$0xff]   ;;  %v11517_v15 = vld [vmem:[#allocation2 + $0xb0] ss:$28 sps:$4 sm:$0xff]   ;;  %v11522_v18 = vld [vmem:[#allocation2 + $0xe0] ss:$28 sps:$4 sm:$0xff]  }
  0x63   :  { %2318 = vmatpush1.bf16.msra.mxu0 %v11504_v6  ;;  %2482 = vmatpush1.bf16.msra.mxu1 %v11505_v7  ;;  %v11518_v16 = vld [vmem:[#allocation2 + $0xe4] ss:$28 sps:$4 sm:$0xff]   ;;  %v11520_v17 = vld [vmem:[#allocation2 + $0xec] ss:$28 sps:$4 sm:$0xff]   ;;  %v11524_v20 = vld [vmem:[#allocation2 + $0x11c] ss:$28 sps:$4 sm:$0xff]  }
  0x64   :  { %2319 = vmatprep.subr.bf16.mxu0 %v11506_v8  ;;  %2483 = vmatprep.subr.bf16.mxu1 %v11508_v9  ;;  %v11523_v19 = vld [vmem:[#allocation2 + $0xe8] ss:$28 sps:$4 sm:$0xff]   ;;  %v11528_v22 = vld [vmem:[#allocation2 + $0x118] ss:$28 sps:$4 sm:$0xff]   ;;  %v11529_v23 = vld [vmem:[#allocation2 + $0x120] ss:$28 sps:$4 sm:$0xff]  }
  0x65   :  { %v11526_v21 = vld [vmem:[#allocation2 + $0x124] ss:$28 sps:$4 sm:$0xff]   ;;  %v11530_v24 = vld [vmem:[#allocation2 + $0x154] ss:$28 sps:$4 sm:$0xff]   ;;  %v11532_v25 = vld [vmem:[#allocation2 + $0x15c] ss:$28 sps:$4 sm:$0xff]  }
  0x66   :  { %v11534_v26 = vld [vmem:[#allocation2 + $0x150] ss:$28 sps:$4 sm:$0xff]   ;;  %v11535_v27 = vld [vmem:[#allocation2 + $0x158] ss:$28 sps:$4 sm:$0xff]   ;;  %v11540_v30 = vld [vmem:[#allocation2 + $0x188] ss:$28 sps:$4 sm:$0xff]  }
  0x67   :  { %2320 = vmatpush1.bf16.msra.mxu0 %v11510_v10  ;;  %2484 = vmatpush1.bf16.msra.mxu1 %v11511_v11  ;;  %v11536_v28 = vld [vmem:[#allocation2 + $0x18c] ss:$28 sps:$4 sm:$0xff]   ;;  %v11538_v29 = vld [vmem:[#allocation2 + $0x194] ss:$28 sps:$4 sm:$0xff]   ;;  %v11542_v32 = vld [vmem:[#allocation2 + $0x1c4] ss:$28 sps:$4 sm:$0xff]  }
  0x68   :  { %2321 = vmatprep.subr.bf16.mxu0 %v11512_v12  ;;  %2485 = vmatprep.subr.bf16.mxu1 %v11514_v13  ;;  %v11541_v31 = vld [vmem:[#allocation2 + $0x190] ss:$28 sps:$4 sm:$0xff]   ;;  %v11546_v34 = vld [vmem:[#allocation2 + $0x1c0] ss:$28 sps:$4 sm:$0xff]   ;;  %v11547_v35 = vld [vmem:[#allocation2 + $0x1c8] ss:$28 sps:$4 sm:$0xff]  }
  0x69   :  { %v11544_v33 = vld [vmem:[#allocation2 + $0x1cc] ss:$28 sps:$4 sm:$0xff]   ;;  %v11548_v36 = vld [vmem:[#allocation2 + $0x1fc] ss:$28 sps:$4 sm:$0xff]   ;;  %v11550_v37 = vld [vmem:[#allocation2 + $0x204] ss:$28 sps:$4 sm:$0xff]  }
  0x6a   :  { %v11552_v38 = vld [vmem:[#allocation2 + $0x1f8] ss:$28 sps:$4 sm:$0xff]   ;;  %v11553_v39 = vld [vmem:[#allocation2 + $0x200] ss:$28 sps:$4 sm:$0xff]   ;;  %v11558_v42 = vld [vmem:[#allocation2 + $0x230] ss:$28 sps:$4 sm:$0xff]  }
  0x6b   :  { %2322 = vmatpush1.bf16.msra.mxu0 %v11516_v14  ;;  %2486 = vmatpush1.bf16.msra.mxu1 %v11517_v15  ;;  %v11554_v40 = vld [vmem:[#allocation2 + $0x234] ss:$28 sps:$4 sm:$0xff]   ;;  %v11556_v41 = vld [vmem:[#allocation2 + $0x23c] ss:$28 sps:$4 sm:$0xff]   ;;  %v11560_v44 = vld [vmem:[#allocation2 + $0x26c] ss:$28 sps:$4 sm:$0xff]  }
  0x6c   :  { %2323 = vmatprep.subr.bf16.mxu0 %v11518_v16  ;;  %2487 = vmatprep.subr.bf16.mxu1 %v11520_v17  ;;  %v11559_v43 = vld [vmem:[#allocation2 + $0x238] ss:$28 sps:$4 sm:$0xff]   ;;  %v90_v46 = vld [vmem:[%s14001_s0] sm:$0xff]  ;;  %v11565_v49 = vld [vmem:[#allocation2 + $0x270] ss:$28 sps:$4 sm:$0xff]   ;;  %vm2311_vm0 = vcmask 130048  }
  0x6d   :  { %v11562_v45 = vld [vmem:[#allocation2 + $0x274] ss:$28 sps:$4 sm:$0xff]   ;;  %v11564_v47 = vld [vmem:[#allocation2 + $0x268] ss:$28 sps:$4 sm:$0xff]   ;;  %v13417_v48 = vcombine.high %v90_v46, %v90_v46  ;;  %v11570_v52 = vld [vmem:[#allocation2 + $0x2a0] ss:$28 sps:$4 sm:$0xff]   ;;  %v13421_v5 = vcombine.low %v90_v46, %v90_v46 }
  0x6e   :  { %v11566_v50 = vld [vmem:[#allocation2 + $0x2a4] ss:$28 sps:$4 sm:$0xff]   ;;  %v11568_v51 = vld [vmem:[#allocation2 + $0x2ac] ss:$28 sps:$4 sm:$0xff]   ;;  %v11572_v54 = vld [vmem:[#allocation2 + $0x2dc] ss:$28 sps:$4 sm:$0xff]  }
  0x6f   :  { %2324 = vmatpush1.bf16.msra.mxu0 %v11522_v18  ;;  %2488 = vmatpush1.bf16.msra.mxu1 %v11523_v19  ;;  %v11571_v53 = vld [vmem:[#allocation2 + $0x2a8] ss:$28 sps:$4 sm:$0xff]   ;;  %v11576_v56 = vld [vmem:[#allocation2 + $0x2d8] ss:$28 sps:$4 sm:$0xff]   ;;  %v11577_v57 = vld [vmem:[#allocation2 + $0x2e0] ss:$28 sps:$4 sm:$0xff]  }
  0x70   :  { %2325 = vmatprep.subr.bf16.mxu0 %v11524_v20  ;;  %2489 = vmatprep.subr.bf16.mxu1 %v11526_v21  ;;  %v11574_v55 = vld [vmem:[#allocation2 + $0x2e4] ss:$28 sps:$4 sm:$0xff]   ;;  %v11578_v58 = vld [vmem:[#allocation2 + $0x314] ss:$28 sps:$4 sm:$0xff]   ;;  %v11580_v59 = vld [vmem:[#allocation2 + $0x31c] ss:$28 sps:$4 sm:$0xff]  }
  0x71   :  { %2347 = vmatprep.mubr.bf16.mxu0 %v13417_v48  ;;  %2511 = vmatprep.mubr.bf16.mxu1 %v13417_v48  ;;  %v11582_v60 = vld [vmem:[#allocation2 + $0x310] ss:$28 sps:$4 sm:$0xff]   ;;  %v11583_v61 = vld [vmem:[#allocation2 + $0x318] ss:$28 sps:$4 sm:$0xff]   ;;  %v11588_v0 = vld [vmem:[#allocation2 + $0x348] ss:$28 sps:$4 sm:$0xff]  }
  0x72   :  { %v11584_v62 = vld [vmem:[#allocation2 + $0x34c] ss:$28 sps:$4 sm:$0xff]   ;;  %v11586_v63 = vld [vmem:[#allocation2 + $0x354] ss:$28 sps:$4 sm:$0xff]   ;;  %v11593_v2 = vld [vmem:[#allocation2 + $0x384] ss:$28 sps:$4 sm:$0xff]  }
  0x73   :  { %2326 = vmatpush1.bf16.msra.mxu0 %v11528_v22  ;;  %2490 = vmatpush1.bf16.msra.mxu1 %v11529_v23  ;;  %v11589_v1 = vld [vmem:[#allocation2 + $0x350] ss:$28 sps:$4 sm:$0xff]   ;;  %v11591_v4 = vld [vmem:[#allocation2 + $0x380] ss:$28 sps:$4 sm:$0xff]   ;;  %v11594_v6 = vld [vmem:[#allocation2 + $0x388] ss:$28 sps:$4 sm:$0xff]  }
  0x74   :  { %2327 = vmatprep.subr.bf16.mxu0 %v11530_v24  ;;  %2491 = vmatprep.subr.bf16.mxu1 %v11532_v25  ;;  %v11596_v3 = vld [vmem:[#allocation2 + $0x38c] ss:$28 sps:$4 sm:$0xff]   ;;  %v11600_v7 = vld [vmem:[#allocation2 + $0x3bc] ss:$28 sps:$4 sm:$0xff]   ;;  %v11603_v8 = vld [vmem:[#allocation2 + $0x3c4] ss:$28 sps:$4 sm:$0xff]  }
  0x75   :  { %v11598_v9 = vld [vmem:[#allocation2 + $0x3b8] ss:$28 sps:$4 sm:$0xff]   ;;  %v11601_v10 = vld [vmem:[#allocation2 + $0x3c0] ss:$28 sps:$4 sm:$0xff]   ;;  %v11604_v13 = vld [vmem:[#allocation2 + $0x3f0] ss:$28 sps:$4 sm:$0xff]  }
  0x76   :  { %v11606_v11 = vld [vmem:[#allocation2 + $0x3f4] ss:$28 sps:$4 sm:$0xff]   ;;  %v11609_v12 = vld [vmem:[#allocation2 + $0x3fc] ss:$28 sps:$4 sm:$0xff]   ;;  %v11612_v15 = vld [vmem:[#allocation2 + $0x42c] ss:$28 sps:$4 sm:$0xff]  }
  0x77   :  { %2328 = vmatpush1.bf16.msra.mxu0 %v11534_v26  ;;  %2492 = vmatpush1.bf16.msra.mxu1 %v11535_v27  ;;  %v11607_v14 = vld [vmem:[#allocation2 + $0x3f8] ss:$28 sps:$4 sm:$0xff]   ;;  %v11610_v17 = vld [vmem:[#allocation2 + $0x428] ss:$28 sps:$4 sm:$0xff]   ;;  %v11613_v18 = vld [vmem:[#allocation2 + $0x430] ss:$28 sps:$4 sm:$0xff]  }
  0x78   :  { %2329 = vmatprep.subr.bf16.mxu0 %v11536_v28  ;;  %2493 = vmatprep.subr.bf16.mxu1 %v11538_v29  ;;  %v11615_v16 = vld [vmem:[#allocation2 + $0x434] ss:$28 sps:$4 sm:$0xff]   ;;  %v11618_v19 = vld [vmem:[#allocation2 + $0x464] ss:$28 sps:$4 sm:$0xff]   ;;  %v11621_v20 = vld [vmem:[#allocation2 + $0x46c] ss:$28 sps:$4 sm:$0xff]  }
  0x79   :  { %v11616_v21 = vld [vmem:[#allocation2 + $0x460] ss:$28 sps:$4 sm:$0xff]   ;;  %v11619_v22 = vld [vmem:[#allocation2 + $0x468] ss:$28 sps:$4 sm:$0xff]   ;;  %v11622_v25 = vld [vmem:[#allocation2 + $0x498] ss:$28 sps:$4 sm:$0xff]  }
  0x7a   :  { %v11624_v23 = vld [vmem:[#allocation2 + $0x49c] ss:$28 sps:$4 sm:$0xff]   ;;  %v11627_v24 = vld [vmem:[#allocation2 + $0x4a4] ss:$28 sps:$4 sm:$0xff]   ;;  %v11630_v27 = vld [vmem:[#allocation2 + $0x4d4] ss:$28 sps:$4 sm:$0xff]  }
  0x7b   :  { %2330 = vmatpush1.bf16.msra.mxu0 %v11540_v30  ;;  %2494 = vmatpush1.bf16.msra.mxu1 %v11541_v31  ;;  %v11625_v26 = vld [vmem:[#allocation2 + $0x4a0] ss:$28 sps:$4 sm:$0xff]   ;;  %v13428_v29 = vld [vmem:[%s14001_s0 + $0x8] sm:$0xff]  ;;  %vm13312_vm1 = vmmov 0   ;;  %vm9819_vm2 = vcmask 80896  }
  0x7c   :  { %2331 = vmatprep.subr.bf16.mxu0 %v11542_v32  ;;  %2495 = vmatprep.subr.bf16.mxu1 %v11544_v33  ;;  %v11633_v28 = vld [vmem:[#allocation2 + $0x4dc] ss:$28 sps:$4 sm:$0xff]   ;;  %v13432_v30 = vcombine.high %v13428_v29, %v13428_v29  ;;  %v11628_v31 = vld [vmem:[#allocation2 + $0x4d0] ss:$28 sps:$4 sm:$0xff]  }
  0x7d   :  { %v11631_v32 = vld [vmem:[#allocation2 + $0x4d8] ss:$28 sps:$4 sm:$0xff]   ;;  %v11636_v33 = vld [vmem:[#allocation2 + $0x50c] ss:$28 sps:$4 sm:$0xff]  }
  0x7e   :  { %v11657_v46 = vld [vmem:[#allocation2 + $0x5bc] ss:$28 sps:$4 sm:$0xff]  }
  0x7f   :  { %2332 = vmatpush1.bf16.msra.mxu0 %v11546_v34  ;;  %2496 = vmatpush1.bf16.msra.mxu1 %v11547_v35  ;;  %v11639_v34 = vld [vmem:[#allocation2 + $0x514] ss:$28 sps:$4 sm:$0xff]   ;;  %v11634_v35 = vld [vmem:[#allocation2 + $0x508] ss:$28 sps:$4 sm:$0xff]  }
  0x80   :  { %2333 = vmatprep.subr.bf16.mxu0 %v11548_v36  ;;  %2497 = vmatprep.subr.bf16.mxu1 %v11550_v37  ;;  %v11637_v36 = vld [vmem:[#allocation2 + $0x510] ss:$28 sps:$4 sm:$0xff]   ;;  %v11642_v37 = vld [vmem:[#allocation2 + $0x544] ss:$28 sps:$4 sm:$0xff]  }
  0x83   :  { %2334 = vmatpush1.bf16.msra.mxu0 %v11552_v38  ;;  %2498 = vmatpush1.bf16.msra.mxu1 %v11553_v39  ;;  %v11645_v38 = vld [vmem:[#allocation2 + $0x54c] ss:$28 sps:$4 sm:$0xff]   ;;  %v11640_v39 = vld [vmem:[#allocation2 + $0x540] ss:$28 sps:$4 sm:$0xff]  }
  0x84   :  { %2335 = vmatprep.subr.bf16.mxu0 %v11554_v40  ;;  %2499 = vmatprep.subr.bf16.mxu1 %v11556_v41  ;;  %v11643_v40 = vld [vmem:[#allocation2 + $0x548] ss:$28 sps:$4 sm:$0xff]   ;;  %v11648_v41 = vld [vmem:[#allocation2 + $0x57c] ss:$28 sps:$4 sm:$0xff]  }
  0x87   :  { %2336 = vmatpush1.bf16.msra.mxu0 %v11558_v42  ;;  %2500 = vmatpush1.bf16.msra.mxu1 %v11559_v43  ;;  %v11651_v42 = vld [vmem:[#allocation2 + $0x584] ss:$28 sps:$4 sm:$0xff]   ;;  %v11646_v43 = vld [vmem:[#allocation2 + $0x578] ss:$28 sps:$4 sm:$0xff]  }
  0x88   :  { %2337 = vmatprep.subr.bf16.mxu0 %v11560_v44  ;;  %2501 = vmatprep.subr.bf16.mxu1 %v11562_v45  ;;  %v11649_v44 = vld [vmem:[#allocation2 + $0x580] ss:$28 sps:$4 sm:$0xff]   ;;  %v11654_v45 = vld [vmem:[#allocation2 + $0x5b4] ss:$28 sps:$4 sm:$0xff]  }
  0x8b   :  { %2338 = vmatpush1.bf16.msra.mxu0 %v11564_v47  ;;  %2502 = vmatpush1.bf16.msra.mxu1 %v11565_v49  ;;  %v11652_v47 = vld [vmem:[#allocation2 + $0x5b0] ss:$28 sps:$4 sm:$0xff]   ;;  %v11655_v49 = vld [vmem:[#allocation2 + $0x5b8] ss:$28 sps:$4 sm:$0xff]  }
  0x8c   :  { %2339 = vmatprep.subr.bf16.mxu0 %v11566_v50  ;;  %2503 = vmatprep.subr.bf16.mxu1 %v11568_v51  ;;  %v11660_v50 = vld [vmem:[#allocation2 + $0x5ec] ss:$28 sps:$4 sm:$0xff]   ;;  %v11663_v51 = vld [vmem:[#allocation2 + $0x5f4] ss:$28 sps:$4 sm:$0xff]  }
  0x8f   :  { %2340 = vmatpush1.bf16.msra.mxu0 %v11570_v52  ;;  %2504 = vmatpush1.bf16.msra.mxu1 %v11571_v53  ;;  %v11658_v52 = vld [vmem:[#allocation2 + $0x5e8] ss:$28 sps:$4 sm:$0xff]   ;;  %v11661_v53 = vld [vmem:[#allocation2 + $0x5f0] ss:$28 sps:$4 sm:$0xff]  }
  0x90   :  { %2341 = vmatprep.subr.bf16.mxu0 %v11572_v54  ;;  %2505 = vmatprep.subr.bf16.mxu1 %v11574_v55  ;;  %v11666_v54 = vld [vmem:[#allocation2 + $0x624] ss:$28 sps:$4 sm:$0xff]   ;;  %v11669_v55 = vld [vmem:[#allocation2 + $0x62c] ss:$28 sps:$4 sm:$0xff]  }
  0x93   :  { %2342 = vmatpush1.bf16.msra.mxu0 %v11576_v56  ;;  %2506 = vmatpush1.bf16.msra.mxu1 %v11577_v57  ;;  %v11664_v56 = vld [vmem:[#allocation2 + $0x620] ss:$28 sps:$4 sm:$0xff]   ;;  %v11667_v57 = vld [vmem:[#allocation2 + $0x628] ss:$28 sps:$4 sm:$0xff]  }
  0x94   :  { %2343 = vmatprep.subr.bf16.mxu0 %v11578_v58  ;;  %2507 = vmatprep.subr.bf16.mxu1 %v11580_v59  ;;  %v11672_v58 = vld [vmem:[#allocation2 + $0x65c] ss:$28 sps:$4 sm:$0xff]   ;;  %v11675_v59 = vld [vmem:[#allocation2 + $0x664] ss:$28 sps:$4 sm:$0xff]  }
  0x97   :  { %2344 = vmatpush1.bf16.msra.mxu0 %v11582_v60  ;;  %2508 = vmatpush1.bf16.msra.mxu1 %v11583_v61  ;;  %v11670_v60 = vld [vmem:[#allocation2 + $0x658] ss:$28 sps:$4 sm:$0xff]   ;;  %v11673_v61 = vld [vmem:[#allocation2 + $0x660] ss:$28 sps:$4 sm:$0xff]  }
  0x98   :  { %2345 = vmatprep.subr.bf16.mxu0 %v11584_v62  ;;  %2509 = vmatprep.subr.bf16.mxu1 %v11586_v63  ;;  %v11678_v62 = vld [vmem:[#allocation2 + $0x694] ss:$28 sps:$4 sm:$0xff]   ;;  %v11681_v63 = vld [vmem:[#allocation2 + $0x69c] ss:$28 sps:$4 sm:$0xff]  }
  0x9b   :  { %2346 = vmatpush1.bf16.msra.mxu0 %v11588_v0  ;;  %2510 = vmatpush1.bf16.msra.mxu1 %v11589_v1  ;;  %v11676_v0 = vld [vmem:[#allocation2 + $0x690] ss:$28 sps:$4 sm:$0xff]   ;;  %v11679_v1 = vld [vmem:[#allocation2 + $0x698] ss:$28 sps:$4 sm:$0xff]  }
  0x9c   :  { %2356 = vmatprep.subr.bf16.mxu0 %v11593_v2  ;;  %2520 = vmatprep.subr.bf16.mxu1 %v11596_v3  ;;  %v11684_v2 = vld [vmem:[#allocation2 + $0x6cc] ss:$28 sps:$4 sm:$0xff]   ;;  %v11687_v3 = vld [vmem:[#allocation2 + $0x6d4] ss:$28 sps:$4 sm:$0xff]  }
  0x9e   :  { %2348 = vmatmul.mubr.bf16.vlgmr.msra.gmra.mrb[0].mxu0 %v13421_v5  ;;  %2512 = vmatmul.mubr.bf16.vlgmr.msra.gmra.mrb[0].mxu1 %v13421_v5 }
  0x9f   :  { %2357 = vmatpush1.bf16.msra.mxu0 %v11591_v4  ;;  %2521 = vmatpush1.bf16.msra.mxu1 %v11594_v6  ;;  %v11682_v4 = vld [vmem:[#allocation2 + $0x6c8] ss:$28 sps:$4 sm:$0xff]   ;;  %v11685_v6 = vld [vmem:[#allocation2 + $0x6d0] ss:$28 sps:$4 sm:$0xff]  }
  0xa0   :  { %2358 = vmatprep.subr.bf16.mxu0 %v11600_v7  ;;  %2522 = vmatprep.subr.bf16.mxu1 %v11603_v8  ;;  %v11691_v7 = vld [vmem:[#allocation2 + $0x704] ss:$28 sps:$4 sm:$0xff]   ;;  %v11694_v8 = vld [vmem:[#allocation2 + $0x70c] ss:$28 sps:$4 sm:$0xff]  }
  0xa1   :  { %2388 = vmatprep.mubr.bf16.mxu0 %v13432_v30  ;;  %2552 = vmatprep.mubr.bf16.mxu1 %v13432_v30 }
  0xa3   :  { %2359 = vmatpush1.bf16.msra.mxu0 %v11598_v9  ;;  %2523 = vmatpush1.bf16.msra.mxu1 %v11601_v10  ;;  %v11689_v9 = vld [vmem:[#allocation2 + $0x700] ss:$28 sps:$4 sm:$0xff]   ;;  %v13438_v10 = vcombine.low %v13428_v29, %v13428_v29  ;;  %v11717_v29 = vld [vmem:[#allocation2 + $0x7e8] ss:$28 sps:$4 sm:$0xff]  }
  0xa4   :  { %2360 = vmatprep.subr.bf16.mxu0 %v11606_v11  ;;  %2524 = vmatprep.subr.bf16.mxu1 %v11609_v12  ;;  %v11692_v11 = vld [vmem:[#allocation2 + $0x708] ss:$28 sps:$4 sm:$0xff]   ;;  %v11698_v12 = vld [vmem:[#allocation2 + $0x73c] ss:$28 sps:$4 sm:$0xff]  }
  0xa7   :  { %2361 = vmatpush1.bf16.msra.mxu0 %v11604_v13  ;;  %2525 = vmatpush1.bf16.msra.mxu1 %v11607_v14  ;;  %v13443_v13 = vld [vmem:[%s14001_s0 + $0x10] sm:$0xff]  ;;  %v11701_v14 = vld [vmem:[#allocation2 + $0x744] ss:$28 sps:$4 sm:$0xff]  }
  0xa8   :  { %2362 = vmatprep.subr.bf16.mxu0 %v11612_v15  ;;  %2526 = vmatprep.subr.bf16.mxu1 %v11615_v16  ;;  %v13447_v15 = vcombine.high %v13443_v13, %v13443_v13  ;;  %v11696_v16 = vld [vmem:[#allocation2 + $0x738] ss:$28 sps:$4 sm:$0xff]  }
  0xab   :  { %2363 = vmatpush1.bf16.msra.mxu0 %v11610_v17  ;;  %2527 = vmatpush1.bf16.msra.mxu1 %v11613_v18  ;;  %v11699_v17 = vld [vmem:[#allocation2 + $0x740] ss:$28 sps:$4 sm:$0xff]   ;;  %v11704_v18 = vld [vmem:[#allocation2 + $0x774] ss:$28 sps:$4 sm:$0xff]  }
  0xac   :  { %2364 = vmatprep.subr.bf16.mxu0 %v11618_v19  ;;  %2528 = vmatprep.subr.bf16.mxu1 %v11621_v20  ;;  %v11707_v19 = vld [vmem:[#allocation2 + $0x77c] ss:$28 sps:$4 sm:$0xff]   ;;  %v11702_v20 = vld [vmem:[#allocation2 + $0x770] ss:$28 sps:$4 sm:$0xff]  }
  0xaf   :  { %2365 = vmatpush1.bf16.msra.mxu0 %v11616_v21  ;;  %2529 = vmatpush1.bf16.msra.mxu1 %v11619_v22  ;;  %v11705_v21 = vld [vmem:[#allocation2 + $0x778] ss:$28 sps:$4 sm:$0xff]   ;;  %v11710_v22 = vld [vmem:[#allocation2 + $0x7ac] ss:$28 sps:$4 sm:$0xff]  }
  0xb0   :  { %2366 = vmatprep.subr.bf16.mxu0 %v11624_v23  ;;  %2530 = vmatprep.subr.bf16.mxu1 %v11627_v24  ;;  %v11713_v23 = vld [vmem:[#allocation2 + $0x7b4] ss:$28 sps:$4 sm:$0xff]   ;;  %v11708_v24 = vld [vmem:[#allocation2 + $0x7a8] ss:$28 sps:$4 sm:$0xff]  }
  0xb3   :  { %2367 = vmatpush1.bf16.msra.mxu0 %v11622_v25  ;;  %2531 = vmatpush1.bf16.msra.mxu1 %v11625_v26  ;;  %v11711_v25 = vld [vmem:[#allocation2 + $0x7b0] ss:$28 sps:$4 sm:$0xff]   ;;  %v11716_v26 = vld [vmem:[#allocation2 + $0x7e4] ss:$28 sps:$4 sm:$0xff]  }
  0xb4   :  { %2368 = vmatprep.subr.bf16.mxu0 %v11630_v27  ;;  %2532 = vmatprep.subr.bf16.mxu1 %v11633_v28  ;;  %v11719_v27 = vld [vmem:[#allocation2 + $0x7ec] ss:$28 sps:$4 sm:$0xff]   ;;  %v11714_v28 = vld [vmem:[#allocation2 + $0x7e0] ss:$28 sps:$4 sm:$0xff]  }
  0xb7   :  { %2369 = vmatpush1.bf16.msra.mxu0 %v11628_v31  ;;  %2533 = vmatpush1.bf16.msra.mxu1 %v11631_v32  ;;  %v11722_v31 = vld [vmem:[#allocation2 + $0x81c] ss:$28 sps:$4 sm:$0xff]   ;;  %v11725_v32 = vld [vmem:[#allocation2 + $0x824] ss:$28 sps:$4 sm:$0xff]  }
  0xb8   :  { %2370 = vmatprep.subr.bf16.mxu0 %v11636_v33  ;;  %2534 = vmatprep.subr.bf16.mxu1 %v11639_v34  ;;  %v11720_v33 = vld [vmem:[#allocation2 + $0x818] ss:$28 sps:$4 sm:$0xff]   ;;  %v11723_v34 = vld [vmem:[#allocation2 + $0x820] ss:$28 sps:$4 sm:$0xff]  }
  0xbb   :  { %2371 = vmatpush1.bf16.msra.mxu0 %v11634_v35  ;;  %2535 = vmatpush1.bf16.msra.mxu1 %v11637_v36  ;;  %v11728_v35 = vld [vmem:[#allocation2 + $0x854] ss:$28 sps:$4 sm:$0xff]   ;;  %v11731_v36 = vld [vmem:[#allocation2 + $0x85c] ss:$28 sps:$4 sm:$0xff]  }
  0xbc   :  { %2372 = vmatprep.subr.bf16.mxu0 %v11642_v37  ;;  %2536 = vmatprep.subr.bf16.mxu1 %v11645_v38  ;;  %v11726_v37 = vld [vmem:[#allocation2 + $0x850] ss:$28 sps:$4 sm:$0xff]   ;;  %v11729_v38 = vld [vmem:[#allocation2 + $0x858] ss:$28 sps:$4 sm:$0xff]  }
  0xbf   :  { %2373 = vmatpush1.bf16.msra.mxu0 %v11640_v39  ;;  %2537 = vmatpush1.bf16.msra.mxu1 %v11643_v40  ;;  %v11734_v39 = vld [vmem:[#allocation2 + $0x88c] ss:$28 sps:$4 sm:$0xff]   ;;  %v11737_v40 = vld [vmem:[#allocation2 + $0x894] ss:$28 sps:$4 sm:$0xff]  }
  0xc0   :  { %2374 = vmatprep.subr.bf16.mxu0 %v11648_v41  ;;  %2538 = vmatprep.subr.bf16.mxu1 %v11651_v42  ;;  %v11732_v41 = vld [vmem:[#allocation2 + $0x888] ss:$28 sps:$4 sm:$0xff]   ;;  %v11735_v42 = vld [vmem:[#allocation2 + $0x890] ss:$28 sps:$4 sm:$0xff]  }
  0xc3   :  { %2375 = vmatpush1.bf16.msra.mxu0 %v11646_v43  ;;  %2539 = vmatpush1.bf16.msra.mxu1 %v11649_v44  ;;  %v11740_v43 = vld [vmem:[#allocation2 + $0x8c4] ss:$28 sps:$4 sm:$0xff]   ;;  %v11743_v44 = vld [vmem:[#allocation2 + $0x8cc] ss:$28 sps:$4 sm:$0xff]  }
  0xc4   :  { %2376 = vmatprep.subr.bf16.mxu0 %v11654_v45  ;;  %2540 = vmatprep.subr.bf16.mxu1 %v11657_v46  ;;  %v11738_v45 = vld [vmem:[#allocation2 + $0x8c0] ss:$28 sps:$4 sm:$0xff]   ;;  %v11741_v46 = vld [vmem:[#allocation2 + $0x8c8] ss:$28 sps:$4 sm:$0xff]  }
  0xc7   :  { %2377 = vmatpush1.bf16.msra.mxu0 %v11652_v47  ;;  %2541 = vmatpush1.bf16.msra.mxu1 %v11655_v49  ;;  %v11746_v47 = vld [vmem:[#allocation2 + $0x8fc] ss:$28 sps:$4 sm:$0xff]   ;;  %v11749_v49 = vld [vmem:[#allocation2 + $0x904] ss:$28 sps:$4 sm:$0xff]  }
  0xc8   :  { %2378 = vmatprep.subr.bf16.mxu0 %v11660_v50  ;;  %2542 = vmatprep.subr.bf16.mxu1 %v11663_v51  ;;  %v11744_v50 = vld [vmem:[#allocation2 + $0x8f8] ss:$28 sps:$4 sm:$0xff]   ;;  %v11747_v51 = vld [vmem:[#allocation2 + $0x900] ss:$28 sps:$4 sm:$0xff]  }
  0xcb   :  { %2379 = vmatpush1.bf16.msra.mxu0 %v11658_v52  ;;  %2543 = vmatpush1.bf16.msra.mxu1 %v11661_v53  ;;  %v11752_v52 = vld [vmem:[#allocation2 + $0x934] ss:$28 sps:$4 sm:$0xff]   ;;  %v11755_v53 = vld [vmem:[#allocation2 + $0x93c] ss:$28 sps:$4 sm:$0xff]  }
  0xcc   :  { %2380 = vmatprep.subr.bf16.mxu0 %v11666_v54  ;;  %2544 = vmatprep.subr.bf16.mxu1 %v11669_v55  ;;  %v11750_v54 = vld [vmem:[#allocation2 + $0x930] ss:$28 sps:$4 sm:$0xff]   ;;  %v11753_v55 = vld [vmem:[#allocation2 + $0x938] ss:$28 sps:$4 sm:$0xff]  }
  0xcf   :  { %2381 = vmatpush1.bf16.msra.mxu0 %v11664_v56  ;;  %2545 = vmatpush1.bf16.msra.mxu1 %v11667_v57  ;;  %v11758_v56 = vld [vmem:[#allocation2 + $0x96c] ss:$28 sps:$4 sm:$0xff]   ;;  %v11761_v57 = vld [vmem:[#allocation2 + $0x974] ss:$28 sps:$4 sm:$0xff]  }
  0xd0   :  { %2382 = vmatprep.subr.bf16.mxu0 %v11672_v58  ;;  %2546 = vmatprep.subr.bf16.mxu1 %v11675_v59  ;;  %v11756_v58 = vld [vmem:[#allocation2 + $0x968] ss:$28 sps:$4 sm:$0xff]   ;;  %v11759_v59 = vld [vmem:[#allocation2 + $0x970] ss:$28 sps:$4 sm:$0xff]  }
  0xd3   :  { %2383 = vmatpush1.bf16.msra.mxu0 %v11670_v60  ;;  %2547 = vmatpush1.bf16.msra.mxu1 %v11673_v61  ;;  %v11764_v60 = vld [vmem:[#allocation2 + $0x9a4] ss:$28 sps:$4 sm:$0xff]   ;;  %v11767_v61 = vld [vmem:[#allocation2 + $0x9ac] ss:$28 sps:$4 sm:$0xff]  }
  0xd4   :  { %2384 = vmatprep.subr.bf16.mxu0 %v11678_v62  ;;  %2548 = vmatprep.subr.bf16.mxu1 %v11681_v63  ;;  %v11762_v62 = vld [vmem:[#allocation2 + $0x9a0] ss:$28 sps:$4 sm:$0xff]   ;;  %v11765_v63 = vld [vmem:[#allocation2 + $0x9a8] ss:$28 sps:$4 sm:$0xff]  }
  0xd7   :  { %2385 = vmatpush1.bf16.msra.mxu0 %v11676_v0  ;;  %2549 = vmatpush1.bf16.msra.mxu1 %v11679_v1  ;;  %v11770_v0 = vld [vmem:[#allocation2 + $0x9dc] ss:$28 sps:$4 sm:$0xff]   ;;  %v11773_v1 = vld [vmem:[#allocation2 + $0x9e4] ss:$28 sps:$4 sm:$0xff]  }
  0xd8   :  { %2386 = vmatprep.subr.bf16.mxu0 %v11684_v2  ;;  %2550 = vmatprep.subr.bf16.mxu1 %v11687_v3  ;;  %v11768_v2 = vld [vmem:[#allocation2 + $0x9d8] ss:$28 sps:$4 sm:$0xff]   ;;  %v11771_v3 = vld [vmem:[#allocation2 + $0x9e0] ss:$28 sps:$4 sm:$0xff]  }
  0xdb   :  { %2387 = vmatpush1.bf16.msra.mxu0 %v11682_v4  ;;  %2551 = vmatpush1.bf16.msra.mxu1 %v11685_v6  ;;  %v11776_v4 = vld [vmem:[#allocation2 + $0xa14] ss:$28 sps:$4 sm:$0xff]   ;;  %v11779_v6 = vld [vmem:[#allocation2 + $0xa1c] ss:$28 sps:$4 sm:$0xff]  }
  0xdc   :  { %2397 = vmatprep.subr.bf16.mxu0 %v11691_v7  ;;  %2561 = vmatprep.subr.bf16.mxu1 %v11694_v8  ;;  %v11774_v7 = vld [vmem:[#allocation2 + $0xa10] ss:$28 sps:$4 sm:$0xff]   ;;  %v11777_v8 = vld [vmem:[#allocation2 + $0xa18] ss:$28 sps:$4 sm:$0xff]  }
  0xde   :  { %2389 = vmatmul.mubr.bf16.vlgmr.msra.gmra.mrb[0].mxu0 %v13438_v10  ;;  %2553 = vmatmul.mubr.bf16.vlgmr.msra.gmra.mrb[0].mxu1 %v13438_v10 }
  0xdf   :  { %2398 = vmatpush1.bf16.msra.mxu0 %v11689_v9  ;;  %2562 = vmatpush1.bf16.msra.mxu1 %v11692_v11  ;;  %v11782_v9 = vld [vmem:[#allocation2 + $0xa4c] ss:$28 sps:$4 sm:$0xff]   ;;  %v11785_v11 = vld [vmem:[#allocation2 + $0xa54] ss:$28 sps:$4 sm:$0xff]  }
  0xe0   :  { %2399 = vmatprep.subr.bf16.mxu0 %v11698_v12  ;;  %2563 = vmatprep.subr.bf16.mxu1 %v11701_v14  ;;  %v11780_v12 = vld [vmem:[#allocation2 + $0xa48] ss:$28 sps:$4 sm:$0xff]   ;;  %v11783_v14 = vld [vmem:[#allocation2 + $0xa50] ss:$28 sps:$4 sm:$0xff]  }
  0xe1   :  { %2429 = vmatprep.mubr.bf16.mxu0 %v13447_v15  ;;  %2593 = vmatprep.mubr.bf16.mxu1 %v13447_v15 }
  0xe3   :  { %2400 = vmatpush1.bf16.msra.mxu0 %v11696_v16  ;;  %2564 = vmatpush1.bf16.msra.mxu1 %v11699_v17  ;;  %v11790_v16 = vld [vmem:[#allocation2 + $0xa84] ss:$28 sps:$4 sm:$0xff]   ;;  %v11793_v17 = vld [vmem:[#allocation2 + $0xa8c] ss:$28 sps:$4 sm:$0xff]  }
  0xe4   :  { %2401 = vmatprep.subr.bf16.mxu0 %v11704_v18  ;;  %2565 = vmatprep.subr.bf16.mxu1 %v11707_v19  ;;  %v13455_v18 = vcombine.low %v13443_v13, %v13443_v13  ;;  %v11788_v19 = vld [vmem:[#allocation2 + $0xa80] ss:$28 sps:$4 sm:$0xff]   ;;  %v11794_v13 = vld [vmem:[#allocation2 + $0x10] ss:$28 sps:$4 sm:$0xff]  }
  0xe7   :  { %2402 = vmatpush1.bf16.msra.mxu0 %v11702_v20  ;;  %2566 = vmatpush1.bf16.msra.mxu1 %v11705_v21  ;;  %v11791_v20 = vld [vmem:[#allocation2 + $0xa88] ss:$28 sps:$4 sm:$0xff]   ;;  %v11796_v21 = vld [vmem:[#allocation2 + $0x14] ss:$28 sps:$4 sm:$0xff]  }
  0xe8   :  { %2403 = vmatprep.subr.bf16.mxu0 %v11710_v22  ;;  %2567 = vmatprep.subr.bf16.mxu1 %v11713_v23  ;;  %v11837_v22 = vld [vmem:[#allocation2 + $0x1d8] ss:$28 sps:$4 sm:$0xff]   ;;  %v13310_v23 = vmov 0  }
  0xeb   :  { %2404 = vmatpush1.bf16.msra.mxu0 %v11708_v24  ;;  %2568 = vmatpush1.bf16.msra.mxu1 %v11711_v25  ;;  %v13464_v24 = vld [vmem:[%s14001_s0 + $0x18] ss:$0 sps:$4 sm:$0xff]   ;;  %v11800_v25 = vld [vmem:[#allocation2 + $0x4c] ss:$28 sps:$4 sm:$0xff]  }
  0xec   :  { %2405 = vmatprep.subr.bf16.mxu0 %v11716_v26  ;;  %2569 = vmatprep.subr.bf16.mxu1 %v11719_v27  ;;  %v11838_v26 = vld [vmem:[#allocation2 + $0x18] ss:$28 sps:$4 sm:$0xff]   ;;  %v11842_v27 = vld [vmem:[#allocation2 + $0x210] ss:$28 sps:$4 sm:$0xff]  }
  0xef   :  { %2406 = vmatpush1.bf16.msra.mxu0 %v11714_v28  ;;  %2570 = vmatpush1.bf16.msra.mxu1 %v11717_v29  ;;  %v11798_v28 = vld [vmem:[#allocation2 + $0x48] ss:$28 sps:$4 sm:$0xff]  }
  0xf0   :  { %2407 = vmatprep.subr.bf16.mxu0 %v11722_v31  ;;  %2571 = vmatprep.subr.bf16.mxu1 %v11725_v32  ;;  %v11803_v29 = vld [vmem:[#allocation2 + $0x84] ss:$28 sps:$4 sm:$0xff]   ;;  %v11843_v31 = vld [vmem:[#allocation2 + $0x50] ss:$28 sps:$4 sm:$0xff]  }
  0xf1   :  { %v11847_v32 = vld [vmem:[#allocation2 + $0x248] ss:$28 sps:$4 sm:$0xff]  }
  0xf3   :  { %2408 = vmatpush1.bf16.msra.mxu0 %v11720_v33  ;;  %2572 = vmatpush1.bf16.msra.mxu1 %v11723_v34  ;;  %v11801_v33 = vld [vmem:[#allocation2 + $0x80] ss:$28 sps:$4 sm:$0xff]  }
  0xf4   :  { %2409 = vmatprep.subr.bf16.mxu0 %v11728_v35  ;;  %2573 = vmatprep.subr.bf16.mxu1 %v11731_v36  ;;  %v11806_v34 = vld [vmem:[#allocation2 + $0xbc] ss:$28 sps:$4 sm:$0xff]   ;;  %v11848_v35 = vld [vmem:[#allocation2 + $0x88] ss:$28 sps:$4 sm:$0xff]  }
  0xf5   :  { %v11852_v36 = vld [vmem:[#allocation2 + $0x280] ss:$28 sps:$4 sm:$0xff]  }
  0xf7   :  { %2410 = vmatpush1.bf16.msra.mxu0 %v11726_v37  ;;  %2574 = vmatpush1.bf16.msra.mxu1 %v11729_v38  ;;  %v11804_v37 = vld [vmem:[#allocation2 + $0xb8] ss:$28 sps:$4 sm:$0xff]   ;;  %v11853_v38 = vld [vmem:[#allocation2 + $0xc0] ss:$28 sps:$4 sm:$0xff]  }
  0xf8   :  { %2411 = vmatprep.subr.bf16.mxu0 %v11734_v39  ;;  %2575 = vmatprep.subr.bf16.mxu1 %v11737_v40  ;;  %v11809_v39 = vld [vmem:[#allocation2 + $0xf4] ss:$28 sps:$4 sm:$0xff]  }
  0xf9   :  { %v11857_v40 = vld [vmem:[#allocation2 + $0x2b8] ss:$28 sps:$4 sm:$0xff]  }
  0xfb   :  { %2412 = vmatpush1.bf16.msra.mxu0 %v11732_v41  ;;  %2576 = vmatpush1.bf16.msra.mxu1 %v11735_v42  ;;  %v11807_v41 = vld [vmem:[#allocation2 + $0xf0] ss:$28 sps:$4 sm:$0xff]  }
  0xfc   :  { %2413 = vmatprep.subr.bf16.mxu0 %v11740_v43  ;;  %2577 = vmatprep.subr.bf16.mxu1 %v11743_v44  ;;  %v11812_v42 = vld [vmem:[#allocation2 + $0x12c] ss:$28 sps:$4 sm:$0xff]  }
  0xfd   :  { %v11862_v43 = vld [vmem:[#allocation2 + $0x2f0] ss:$28 sps:$4 sm:$0xff]   ;;  %v11810_v44 = vld [vmem:[#allocation2 + $0x128] ss:$28 sps:$4 sm:$0xff]  }
  0xff   :  { %2414 = vmatpush1.bf16.msra.mxu0 %v11738_v45  ;;  %2578 = vmatpush1.bf16.msra.mxu1 %v11741_v46  ;;  %v11815_v45 = vld [vmem:[#allocation2 + $0x164] ss:$28 sps:$4 sm:$0xff]   ;;  %v11863_v46 = vld [vmem:[#allocation2 + $0x130] ss:$28 sps:$4 sm:$0xff]  }
 0x100   :  { %2415 = vmatprep.subr.bf16.mxu0 %v11746_v47  ;;  %2579 = vmatprep.subr.bf16.mxu1 %v11749_v49  ;;  %v11867_v47 = vld [vmem:[#allocation2 + $0x328] ss:$28 sps:$4 sm:$0xff]   ;;  %v11813_v49 = vld [vmem:[#allocation2 + $0x160] ss:$28 sps:$4 sm:$0xff]  }
 0x103   :  { %2416 = vmatpush1.bf16.msra.mxu0 %v11744_v50  ;;  %2580 = vmatpush1.bf16.msra.mxu1 %v11747_v51  ;;  %v11818_v50 = vld [vmem:[#allocation2 + $0x19c] ss:$28 sps:$4 sm:$0xff]   ;;  %v11868_v51 = vld [vmem:[#allocation2 + $0x168] ss:$28 sps:$4 sm:$0xff]  }
 0x104   :  { %2417 = vmatprep.subr.bf16.mxu0 %v11752_v52  ;;  %2581 = vmatprep.subr.bf16.mxu1 %v11755_v53  ;;  %v11872_v52 = vld [vmem:[#allocation2 + $0x360] ss:$28 sps:$4 sm:$0xff]   ;;  %v11816_v53 = vld [vmem:[#allocation2 + $0x198] ss:$28 sps:$4 sm:$0xff]  }
 0x107   :  { %2418 = vmatpush1.bf16.msra.mxu0 %v11750_v54  ;;  %2582 = vmatpush1.bf16.msra.mxu1 %v11753_v55  ;;  %v11821_v54 = vld [vmem:[#allocation2 + $0x1d4] ss:$28 sps:$4 sm:$0xff]   ;;  %v11873_v55 = vld [vmem:[#allocation2 + $0x1a0] ss:$28 sps:$4 sm:$0xff]  }
 0x108   :  { %2419 = vmatprep.subr.bf16.mxu0 %v11758_v56  ;;  %2583 = vmatprep.subr.bf16.mxu1 %v11761_v57  ;;  %v11877_v56 = vld [vmem:[#allocation2 + $0x558] ss:$28 sps:$4 sm:$0xff]   ;;  %v11819_v57 = vld [vmem:[#allocation2 + $0x1d0] ss:$28 sps:$4 sm:$0xff]  }
 0x10b   :  { %2420 = vmatpush1.bf16.msra.mxu0 %v11756_v58  ;;  %2584 = vmatpush1.bf16.msra.mxu1 %v11759_v59  ;;  %v11824_v58 = vld [vmem:[#allocation2 + $0x20c] ss:$28 sps:$4 sm:$0xff]   ;;  %v11878_v59 = vld [vmem:[#allocation2 + $0x398] ss:$28 sps:$4 sm:$0xff]  }
 0x10c   :  { %2421 = vmatprep.subr.bf16.mxu0 %v11764_v60  ;;  %2585 = vmatprep.subr.bf16.mxu1 %v11767_v61  ;;  %v11882_v60 = vld [vmem:[#allocation2 + $0x590] ss:$28 sps:$4 sm:$0xff]   ;;  %v11822_v61 = vld [vmem:[#allocation2 + $0x208] ss:$28 sps:$4 sm:$0xff]  }
 0x10f   :  { %2422 = vmatpush1.bf16.msra.mxu0 %v11762_v62  ;;  %2586 = vmatpush1.bf16.msra.mxu1 %v11765_v63  ;;  %v11883_v62 = vld [vmem:[#allocation2 + $0x3d0] ss:$28 sps:$4 sm:$0xff]   ;;  %v11827_v63 = vld [vmem:[#allocation2 + $0x244] ss:$28 sps:$4 sm:$0xff]  }
 0x110   :  { %2423 = vmatprep.subr.bf16.mxu0 %v11770_v0  ;;  %2587 = vmatprep.subr.bf16.mxu1 %v11773_v1  ;;  %v11887_v0 = vld [vmem:[#allocation2 + $0x5c8] ss:$28 sps:$4 sm:$0xff]   ;;  %v11825_v1 = vld [vmem:[#allocation2 + $0x240] ss:$28 sps:$4 sm:$0xff]  }
 0x113   :  { %2424 = vmatpush1.bf16.msra.mxu0 %v11768_v2  ;;  %2588 = vmatpush1.bf16.msra.mxu1 %v11771_v3  ;;  %v11888_v2 = vld [vmem:[#allocation2 + $0x408] ss:$28 sps:$4 sm:$0xff]   ;;  %v11830_v3 = vld [vmem:[#allocation2 + $0x27c] ss:$28 sps:$4 sm:$0xff]  }
 0x114   :  { %2425 = vmatprep.subr.bf16.mxu0 %v11776_v4  ;;  %2589 = vmatprep.subr.bf16.mxu1 %v11779_v6  ;;  %v11892_v4 = vld [vmem:[#allocation2 + $0x600] ss:$28 sps:$4 sm:$0xff]   ;;  %v11828_v6 = vld [vmem:[#allocation2 + $0x278] ss:$28 sps:$4 sm:$0xff]  }
 0x117   :  { %2426 = vmatpush1.bf16.msra.mxu0 %v11774_v7  ;;  %2590 = vmatpush1.bf16.msra.mxu1 %v11777_v8  ;;  %v11893_v7 = vld [vmem:[#allocation2 + $0x440] ss:$28 sps:$4 sm:$0xff]   ;;  %v11833_v8 = vld [vmem:[#allocation2 + $0x2b4] ss:$28 sps:$4 sm:$0xff]  }
 0x118   :  { %2427 = vmatprep.subr.bf16.mxu0 %v11782_v9  ;;  %2591 = vmatprep.subr.bf16.mxu1 %v11785_v11  ;;  %v11897_v9 = vld [vmem:[#allocation2 + $0x638] ss:$28 sps:$4 sm:$0xff]   ;;  %v11831_v11 = vld [vmem:[#allocation2 + $0x2b0] ss:$28 sps:$4 sm:$0xff]  }
 0x11b   :  { %2428 = vmatpush1.bf16.msra.mxu0 %v11780_v12  ;;  %2592 = vmatpush1.bf16.msra.mxu1 %v11783_v14  ;;  %v11898_v12 = vld [vmem:[#allocation2 + $0x478] ss:$28 sps:$4 sm:$0xff]   ;;  %v11836_v14 = vld [vmem:[#allocation2 + $0x2ec] ss:$28 sps:$4 sm:$0xff]  }
 0x11c   :  { %2438 = vmatprep.subr.bf16.mxu0 %v11790_v16  ;;  %2602 = vmatprep.subr.bf16.mxu1 %v11793_v17  ;;  %v11902_v16 = vld [vmem:[#allocation2 + $0x670] ss:$28 sps:$4 sm:$0xff]   ;;  %v11834_v17 = vld [vmem:[#allocation2 + $0x2e8] ss:$28 sps:$4 sm:$0xff]  }
 0x11e   :  { %2430 = vmatmul.mubr.bf16.vlgmr.msra.gmra.mrb[0].mxu0 %v13455_v18  ;;  %2594 = vmatmul.mubr.bf16.vlgmr.msra.gmra.mrb[0].mxu1 %v13455_v18 }
 0x11f   :  { %2439 = vmatpush1.bf16.msra.mxu0 %v11788_v19  ;;  %2603 = vmatpush1.bf16.msra.mxu1 %v11791_v20  ;;  %v11903_v19 = vld [vmem:[#allocation2 + $0x4b0] ss:$28 sps:$4 sm:$0xff]   ;;  %v11841_v20 = vld [vmem:[#allocation2 + $0x324] ss:$28 sps:$4 sm:$0xff]  }
 0x120   :  { %2470 = vmatprep.mubr.bf16.mxu0 %v13310_v23  ;;  %2634 = vmatprep.mubr.bf16.mxu1 %v13310_v23 }
 0x121   :  { %2643 = vmatprep.subr.bf16.mxu0 %v11796_v21  ;;  %11025 = vmatprep.subr.bf16.mxu1 %v11837_v22  ;;  %v11907_v21 = vld [vmem:[#allocation2 + $0x6a8] ss:$28 sps:$4 sm:$0xff]   ;;  %v11839_v22 = vld [vmem:[#allocation2 + $0x320] ss:$28 sps:$4 sm:$0xff]  }
 0x12a   :  { %10188 = vmatmul.mubr.msk.bf16.vlgmr.msra.gmra.mrb[0].mxu0 %vm2311_vm0, %v13464_v24  ;;  %10189 = vmatmul.mubr.msk.bf16.vlgmr.msra.gmra.mrb[0].mxu1 %vm2311_vm0, %v13464_v24 }
 0x12b   :  { %2644 = vmatpush1.bf16.msra.mxu0 %v11794_v13  ;;  %11026 = vmatpush3.bf16.msra.mxu1 %v11838_v26  ;;  %v11908_v13 = vld [vmem:[#allocation2 + $0x4e8] ss:$28 sps:$4 sm:$0xff]   ;;  %v11912_v26 = vld [vmem:[#allocation2 + $0x6e0] ss:$28 sps:$4 sm:$0xff]  }
 0x12c   :  { %2645 = vmatprep.subr.bf16.mxu0 %v11800_v25  ;;  %11027 = vmatprep.subr.bf16.mxu1 %v11842_v27  ;;  %v11846_v25 = vld [vmem:[#allocation2 + $0x35c] ss:$28 sps:$4 sm:$0xff]  }
 0x12d   :  { %2675 = vmatprep.mubr.bf16.mxu0 %v13417_v48  ;;  %2839 = vmatprep.mubr.bf16.mxu1 %v13417_v48  ;;  %v11858_v48 = vld [vmem:[#allocation2 + $0xf8] ss:$28 sps:$4 sm:$0xff]  }
 0x12e   :  { %v11844_v27 = vld [vmem:[#allocation2 + $0x358] ss:$28 sps:$4 sm:$0xff]  }
 0x12f   :  { %2646 = vmatpush1.bf16.msra.mxu0 %v11798_v28  ;;  %11028 = vmatpush3.bf16.msra.mxu1 %v11843_v31  ;;  %v11913_v28 = vld [vmem:[#allocation2 + $0x520] ss:$28 sps:$4 sm:$0xff]   ;;  %v11917_v31 = vld [vmem:[#allocation2 + $0x8d8] ss:$28 sps:$4 sm:$0xff]  }
 0x130   :  { %2647 = vmatprep.subr.bf16.mxu0 %v11803_v29  ;;  %11029 = vmatprep.subr.bf16.mxu1 %v11847_v32  ;;  %v11851_v29 = vld [vmem:[#allocation2 + $0x394] ss:$28 sps:$4 sm:$0xff]  }
 0x131   :  { %v11849_v32 = vld [vmem:[#allocation2 + $0x390] ss:$28 sps:$4 sm:$0xff]  }
 0x133   :  { %2648 = vmatpush1.bf16.msra.mxu0 %v11801_v33  ;;  %11030 = vmatpush3.bf16.msra.mxu1 %v11848_v35  ;;  %v11918_v33 = vld [vmem:[#allocation2 + $0x718] ss:$28 sps:$4 sm:$0xff]   ;;  %v11922_v35 = vld [vmem:[#allocation2 + $0x910] ss:$28 sps:$4 sm:$0xff]  }
 0x134   :  { %2649 = vmatprep.subr.bf16.mxu0 %v11806_v34  ;;  %11031 = vmatprep.subr.bf16.mxu1 %v11852_v36  ;;  %v11856_v34 = vld [vmem:[#allocation2 + $0x3cc] ss:$28 sps:$4 sm:$0xff]  }
 0x135   :  { %v11854_v36 = vld [vmem:[#allocation2 + $0x3c8] ss:$28 sps:$4 sm:$0xff]  }
 0x137   :  { %2650 = vmatpush1.bf16.msra.mxu0 %v11804_v37  ;;  %11032 = vmatpush3.bf16.msra.mxu1 %v11853_v38  ;;  %v11923_v37 = vld [vmem:[#allocation2 + $0x750] ss:$28 sps:$4 sm:$0xff]   ;;  %v11861_v38 = vld [vmem:[#allocation2 + $0x404] ss:$28 sps:$4 sm:$0xff]  }
 0x138   :  { %2651 = vmatprep.subr.bf16.mxu0 %v11809_v39  ;;  %11033 = vmatprep.subr.bf16.mxu1 %v11857_v40  ;;  %v11927_v39 = vld [vmem:[#allocation2 + $0x948] ss:$28 sps:$4 sm:$0xff]   ;;  %v11859_v40 = vld [vmem:[#allocation2 + $0x400] ss:$28 sps:$4 sm:$0xff]  }
 0x13b   :  { %2652 = vmatpush1.bf16.msra.mxu0 %v11807_v41  ;;  %11034 = vmatpush3.bf16.msra.mxu1 %v11858_v48  ;;  %v11928_v41 = vld [vmem:[#allocation2 + $0x788] ss:$28 sps:$4 sm:$0xff]   ;;  %v11932_v48 = vld [vmem:[#allocation2 + $0x980] ss:$28 sps:$4 sm:$0xff]  }
 0x13c   :  { %2653 = vmatprep.subr.bf16.mxu0 %v11812_v42  ;;  %11035 = vmatprep.subr.bf16.mxu1 %v11862_v43  ;;  %v11866_v42 = vld [vmem:[#allocation2 + $0x43c] ss:$28 sps:$4 sm:$0xff]  }
 0x13d   :  { %v11933_v43 = vld [vmem:[#allocation2 + $0x7c0] ss:$28 sps:$4 sm:$0xff]  }
 0x13f   :  { %2654 = vmatpush1.bf16.msra.mxu0 %v11810_v44  ;;  %11036 = vmatpush3.bf16.msra.mxu1 %v11863_v46  ;;  %v11871_v44 = vld [vmem:[#allocation2 + $0x474] ss:$28 sps:$4 sm:$0xff]  }
 0x140   :  { %2655 = vmatprep.subr.bf16.mxu0 %v11815_v45  ;;  %11037 = vmatprep.subr.bf16.mxu1 %v11867_v47  ;;  %v11937_v45 = vld [vmem:[#allocation2 + $0x9b8] ss:$28 sps:$4 sm:$0xff]   ;;  %v11869_v46 = vld [vmem:[#allocation2 + $0x470] ss:$28 sps:$4 sm:$0xff]  }
 0x141   :  { %v11876_v47 = vld [vmem:[#allocation2 + $0x4ac] ss:$28 sps:$4 sm:$0xff]  }
 0x143   :  { %2656 = vmatpush1.bf16.msra.mxu0 %v11813_v49  ;;  %11038 = vmatpush3.bf16.msra.mxu1 %v11868_v51  ;;  %v11942_v49 = vld [vmem:[#allocation2 + $0x9f0] ss:$28 sps:$4 sm:$0xff]   ;;  %v11881_v51 = vld [vmem:[#allocation2 + $0x4e4] ss:$28 sps:$4 sm:$0xff]  }
 0x144   :  { %2657 = vmatprep.subr.bf16.mxu0 %v11818_v50  ;;  %11039 = vmatprep.subr.bf16.mxu1 %v11872_v52  ;;  %v11874_v50 = vld [vmem:[#allocation2 + $0x4a8] ss:$28 sps:$4 sm:$0xff]   ;;  %v11943_v52 = vld [vmem:[#allocation2 + $0x830] ss:$28 sps:$4 sm:$0xff]  }
 0x147   :  { %2658 = vmatpush1.bf16.msra.mxu0 %v11816_v53  ;;  %11040 = vmatpush3.bf16.msra.mxu1 %v11873_v55  ;;  %v11947_v53 = vld [vmem:[#allocation2 + $0xa28] ss:$28 sps:$4 sm:$0xff]   ;;  %v11886_v55 = vld [vmem:[#allocation2 + $0x51c] ss:$28 sps:$4 sm:$0xff]  }
 0x148   :  { %2659 = vmatprep.subr.bf16.mxu0 %v11821_v54  ;;  %11047 = vmatprep.subr.bf16.mxu1 %v11877_v56  ;;  %v11879_v54 = vld [vmem:[#allocation2 + $0x4e0] ss:$28 sps:$4 sm:$0xff]   ;;  %v11948_v56 = vld [vmem:[#allocation2 + $0x868] ss:$28 sps:$4 sm:$0xff]  }
 0x14a   :  { %2840 = vmatmul.mubr.bf16.vlgmr.msra.gmra.mrb[4].mxu1 %v13421_v5 }
 0x14b   :  { %2660 = vmatpush1.bf16.msra.mxu0 %v11819_v57  ;;  %11048 = vmatpush3.bf16.msra.mxu1 %v11878_v59  ;;  %v11952_v57 = vld [vmem:[#allocation2 + $0xa60] ss:$28 sps:$4 sm:$0xff]   ;;  %v11891_v59 = vld [vmem:[#allocation2 + $0x554] ss:$28 sps:$4 sm:$0xff]  }
 0x14c   :  { %2661 = vmatprep.subr.bf16.mxu0 %v11824_v58  ;;  %11049 = vmatprep.subr.bf16.mxu1 %v11882_v60  ;;  %v11884_v58 = vld [vmem:[#allocation2 + $0x518] ss:$28 sps:$4 sm:$0xff]   ;;  %v11953_v60 = vld [vmem:[#allocation2 + $0x8a0] ss:$28 sps:$4 sm:$0xff]  }
 0x14d   :  { %2879 = vmatprep.mubr.bf16.mxu1 %v13432_v30 }
 0x14f   :  { %2662 = vmatpush1.bf16.msra.mxu0 %v11822_v61  ;;  %11050 = vmatpush3.bf16.msra.mxu1 %v11883_v62  ;;  %v11889_v61 = vld [vmem:[#allocation2 + $0x550] ss:$28 sps:$4 sm:$0xff]   ;;  %v11960_v62 = vld [vmem:[#allocation2 + $0xa98] ss:$28 sps:$4 sm:$0xff]  }
 0x150   :  { %2663 = vmatprep.subr.bf16.mxu0 %v11827_v63  ;;  %11051 = vmatprep.subr.bf16.mxu1 %v11887_v0  ;;  %v11896_v63 = vld [vmem:[#allocation2 + $0x58c] ss:$28 sps:$4 sm:$0xff]   ;;  %v13311_v0 = vmov 0.0  }
 0x153   :  { %2664 = vmatpush1.bf16.msra.mxu0 %v11825_v1  ;;  %11052 = vmatpush3.bf16.msra.mxu1 %v11888_v2  ;;  %v11966_v1 = vld [vmem:[#allocation7 + $0x4] ss:$52 sps:$4 sm:$0xff]  }
 0x154   :  { %2665 = vmatprep.subr.bf16.mxu0 %v11830_v3  ;;  %11053 = vmatprep.subr.bf16.mxu1 %v11892_v4  ;;  %v11894_v2 = vld [vmem:[#allocation2 + $0x588] ss:$28 sps:$4 sm:$0xff]   ;;  %v11899_v4 = vld [vmem:[#allocation2 + $0x5c0] ss:$28 sps:$4 sm:$0xff]  }
 0x155   :  { %v11901_v3 = vld [vmem:[#allocation2 + $0x5c4] ss:$28 sps:$4 sm:$0xff]  }
 0x157   :  { %2666 = vmatpush1.bf16.msra.mxu0 %v11828_v6  ;;  %11054 = vmatpush3.bf16.msra.mxu1 %v11893_v7  ;;  %v11964_v6 = vld [vmem:[#allocation7] ss:$52 sps:$4 sm:$0xff]   ;;  %v11906_v7 = vld [vmem:[#allocation2 + $0x5fc] ss:$28 sps:$4 sm:$0xff]  }
 0x158   :  { %2667 = vmatprep.subr.bf16.mxu0 %v11833_v8  ;;  %11055 = vmatprep.subr.bf16.mxu1 %v11897_v9  ;;  %v11972_v8 = vld [vmem:[#allocation7 + $0x6c] ss:$52 sps:$4 sm:$0xff]   ;;  %v11904_v9 = vld [vmem:[#allocation2 + $0x5f8] ss:$28 sps:$4 sm:$0xff]  }
 0x15b   :  { %2668 = vmatpush1.bf16.msra.mxu0 %v11831_v11  ;;  %11056 = vmatpush3.bf16.msra.mxu1 %v11898_v12  ;;  %v11970_v11 = vld [vmem:[#allocation7 + $0x68] ss:$52 sps:$4 sm:$0xff]   ;;  %v11911_v12 = vld [vmem:[#allocation2 + $0x634] ss:$28 sps:$4 sm:$0xff]  }
 0x15c   :  { %2669 = vmatprep.subr.bf16.mxu0 %v11836_v14  ;;  %11057 = vmatprep.subr.bf16.mxu1 %v11902_v16  ;;  %v11978_v14 = vld [vmem:[#allocation7 + $0xd4] ss:$52 sps:$4 sm:$0xff]   ;;  %v11909_v16 = vld [vmem:[#allocation2 + $0x630] ss:$28 sps:$4 sm:$0xff]  }
 0x15f   :  { %2670 = vmatpush1.bf16.msra.mxu0 %v11834_v17  ;;  %11058 = vmatpush3.bf16.msra.mxu1 %v11903_v19  ;;  %v11976_v17 = vld [vmem:[#allocation7 + $0xd0] ss:$52 sps:$4 sm:$0xff]   ;;  %v11916_v19 = vld [vmem:[#allocation2 + $0x66c] ss:$28 sps:$4 sm:$0xff]  }
 0x160   :  { %2671 = vmatprep.subr.bf16.mxu0 %v11841_v20  ;;  %11059 = vmatprep.subr.bf16.mxu1 %v11907_v21  ;;  %v11984_v20 = vld [vmem:[#allocation7 + $0x13c] ss:$52 sps:$4 sm:$0xff]   ;;  %v11914_v21 = vld [vmem:[#allocation2 + $0x668] ss:$28 sps:$4 sm:$0xff]  }
 0x163   :  { %2672 = vmatpush1.bf16.msra.mxu0 %v11839_v22  ;;  %11060 = vmatpush3.bf16.msra.mxu1 %v11908_v13  ;;  %v11921_v22 = vld [vmem:[#allocation2 + $0x6a4] ss:$28 sps:$4 sm:$0xff]  }
 0x164   :  { %2673 = vmatprep.subr.bf16.mxu0 %v11846_v25  ;;  %11061 = vmatprep.subr.bf16.mxu1 %v11912_v26  ;;  %v11990_v13 = vld [vmem:[#allocation7 + $0x1a4] ss:$52 sps:$4 sm:$0xff]   ;;  %v11919_v25 = vld [vmem:[#allocation2 + $0x6a0] ss:$28 sps:$4 sm:$0xff]  }
 0x165   :  { %v11988_v26 = vld [vmem:[#allocation7 + $0x1a0] ss:$52 sps:$4 sm:$0xff]  }
 0x167   :  { %2674 = vmatpush1.bf16.msra.mxu0 %v11844_v27  ;;  %11062 = vmatpush3.bf16.msra.mxu1 %v11913_v28  ;;  %v11926_v27 = vld [vmem:[#allocation2 + $0x6dc] ss:$28 sps:$4 sm:$0xff]   ;;  %v11996_v28 = vld [vmem:[#allocation7 + $0x20c] ss:$52 sps:$4 sm:$0xff]  }
 0x168   :  { %2684 = vmatprep.subr.bf16.mxu0 %v11851_v29  ;;  %11069 = vmatprep.subr.bf16.mxu1 %v11917_v31  ;;  %v11924_v29 = vld [vmem:[#allocation2 + $0x6d8] ss:$28 sps:$4 sm:$0xff]   ;;  %v11994_v31 = vld [vmem:[#allocation7 + $0x208] ss:$52 sps:$4 sm:$0xff]  }
 0x16a   :  { %2676 = vmatmul.mubr.bf16.vlgmr.msra.gmra.mrb[4].mxu0 %v13421_v5  ;;  %2880 = vmatmul.mubr.bf16.vlgmr.msra.gmra.mrb[8].mxu1 %v13438_v10  ;;  %v11864_v5 = vld [vmem:[#allocation2 + $0x438] ss:$28 sps:$4 sm:$0xff]  }
 0x16b   :  { %2685 = vmatpush1.bf16.msra.mxu0 %v11849_v32  ;;  %11070 = vmatpush3.bf16.msra.mxu1 %v11918_v33  ;;  %v11931_v32 = vld [vmem:[#allocation2 + $0x714] ss:$28 sps:$4 sm:$0xff]  }
 0x16c   :  { %2686 = vmatprep.subr.bf16.mxu0 %v11856_v34  ;;  %11071 = vmatprep.subr.bf16.mxu1 %v11922_v35  ;;  %v12002_v33 = vld [vmem:[#allocation7 + $0x274] ss:$52 sps:$4 sm:$0xff]   ;;  %v11929_v34 = vld [vmem:[#allocation2 + $0x710] ss:$28 sps:$4 sm:$0xff]  }
 0x16d   :  { %2716 = vmatprep.mubr.bf16.mxu0 %v13432_v30  ;;  %2919 = vmatprep.mubr.bf16.mxu1 %v13447_v15  ;;  %v11938_v30 = vld [vmem:[#allocation2 + $0x7f8] ss:$28 sps:$4 sm:$0xff]   ;;  %v12000_v35 = vld [vmem:[#allocation7 + $0x270] ss:$52 sps:$4 sm:$0xff]  }
 0x16f   :  { %2687 = vmatpush1.bf16.msra.mxu0 %v11854_v36  ;;  %11072 = vmatpush3.bf16.msra.mxu1 %v11923_v37  ;;  %v11936_v36 = vld [vmem:[#allocation2 + $0x74c] ss:$28 sps:$4 sm:$0xff]   ;;  %v12008_v37 = vld [vmem:[#allocation7 + $0x2dc] ss:$52 sps:$4 sm:$0xff]  }
 0x170   :  { %2688 = vmatprep.subr.bf16.mxu0 %v11861_v38  ;;  %11073 = vmatprep.subr.bf16.mxu1 %v11927_v39  ;;  %v11934_v38 = vld [vmem:[#allocation2 + $0x748] ss:$28 sps:$4 sm:$0xff]   ;;  %v12006_v39 = vld [vmem:[#allocation7 + $0x2d8] ss:$52 sps:$4 sm:$0xff]  }
 0x173   :  { %2689 = vmatpush1.bf16.msra.mxu0 %v11859_v40  ;;  %11074 = vmatpush3.bf16.msra.mxu1 %v11928_v41  ;;  %v11941_v40 = vld [vmem:[#allocation2 + $0x784] ss:$28 sps:$4 sm:$0xff]  }
 0x174   :  { %2690 = vmatprep.subr.bf16.mxu0 %v11866_v42  ;;  %11075 = vmatprep.subr.bf16.mxu1 %v11932_v48  ;;  %v12014_v41 = vld [vmem:[#allocation7 + $0x344] ss:$52 sps:$4 sm:$0xff]   ;;  %v11939_v42 = vld [vmem:[#allocation2 + $0x780] ss:$28 sps:$4 sm:$0xff]  }
 0x175   :  { %v12012_v48 = vld [vmem:[#allocation7 + $0x340] ss:$52 sps:$4 sm:$0xff]  }
 0x177   :  { %2691 = vmatpush1.bf16.msra.mxu0 %v11864_v5  ;;  %11076 = vmatpush3.bf16.msra.mxu1 %v11933_v43  ;;  %v11946_v5 = vld [vmem:[#allocation2 + $0x7bc] ss:$28 sps:$4 sm:$0xff]   ;;  %v12020_v43 = vld [vmem:[#allocation7 + $0x3ac] ss:$52 sps:$4 sm:$0xff]  }
 0x178   :  { %2692 = vmatprep.subr.bf16.mxu0 %v11871_v44  ;;  %11077 = vmatprep.subr.bf16.mxu1 %v11937_v45  ;;  %v11944_v44 = vld [vmem:[#allocation2 + $0x7b8] ss:$28 sps:$4 sm:$0xff]  }
 0x179   :  { %v11951_v45 = vld [vmem:[#allocation2 + $0x7f4] ss:$28 sps:$4 sm:$0xff]  }
 0x17b   :  { %2693 = vmatpush1.bf16.msra.mxu0 %v11869_v46  ;;  %11078 = vmatpush3.bf16.msra.mxu1 %v11938_v30  ;;  %v12023_v46 = vld [vmem:[#allocation7 + $0x414] ss:$52 sps:$4 sm:$0xff]   ;;  %v11949_v30 = vld [vmem:[#allocation2 + $0x7f0] ss:$28 sps:$4 sm:$0xff]  }
 0x17c   :  { %2694 = vmatprep.subr.bf16.mxu0 %v11876_v47  ;;  %11079 = vmatprep.subr.bf16.mxu1 %v11942_v49  ;;  %v12021_v47 = vld [vmem:[#allocation7 + $0x410] ss:$52 sps:$4 sm:$0xff]  }
 0x17d   :  { %v12026_v49 = vld [vmem:[#allocation7 + $0x47c] ss:$52 sps:$4 sm:$0xff]  }
 0x17f   :  { %2695 = vmatpush1.bf16.msra.mxu0 %v11874_v50  ;;  %11080 = vmatpush3.bf16.msra.mxu1 %v11943_v52  ;;  %v11954_v50 = vld [vmem:[#allocation2 + $0x828] ss:$28 sps:$4 sm:$0xff]  }
 0x180   :  { %2696 = vmatprep.subr.bf16.mxu0 %v11881_v51  ;;  %11081 = vmatprep.subr.bf16.mxu1 %v11947_v53  ;;  %v12024_v51 = vld [vmem:[#allocation7 + $0x478] ss:$52 sps:$4 sm:$0xff]   ;;  %v11959_v52 = vld [vmem:[#allocation2 + $0x864] ss:$28 sps:$4 sm:$0xff]  }
 0x181   :  { %v12032_v53 = vld [vmem:[#allocation7 + $0x4e4] ss:$52 sps:$4 sm:$0xff]  }
 0x183   :  { %2697 = vmatpush1.bf16.msra.mxu0 %v11879_v54  ;;  %11082 = vmatpush3.bf16.msra.mxu1 %v11948_v56  ;;  %v11957_v54 = vld [vmem:[#allocation2 + $0x860] ss:$28 sps:$4 sm:$0xff]  }
 0x184   :  { %2698 = vmatprep.subr.bf16.mxu0 %v11886_v55  ;;  %11083 = vmatprep.subr.bf16.mxu1 %v11952_v57  ;;  %v12030_v55 = vld [vmem:[#allocation7 + $0x4e0] ss:$52 sps:$4 sm:$0xff]   ;;  %v11963_v56 = vld [vmem:[#allocation2 + $0x89c] ss:$28 sps:$4 sm:$0xff]  }
 0x185   :  { %v12038_v57 = vld [vmem:[#allocation7 + $0x54c] ss:$52 sps:$4 sm:$0xff]  }
 0x187   :  { %2699 = vmatpush1.bf16.msra.mxu0 %v11884_v58  ;;  %11084 = vmatpush3.bf16.msra.mxu1 %v11953_v60  ;;  %v11961_v58 = vld [vmem:[#allocation2 + $0x898] ss:$28 sps:$4 sm:$0xff]  }
 0x188   :  { %2700 = vmatprep.subr.bf16.mxu0 %v11891_v59  ;;  %11309 = vmatprep.subr.bf16.mxu1 %v13311_v0  ;;  %v12036_v59 = vld [vmem:[#allocation7 + $0x548] ss:$52 sps:$4 sm:$0xff]   ;;  %v11969_v60 = vld [vmem:[#allocation2 + $0x8d4] ss:$28 sps:$4 sm:$0xff]  }
 0x18a   :  { %2920 = vmatmul.mubr.bf16.vlgmr.msra.gmra.mrb[12].mxu1 %v13455_v18 }
 0x18b   :  { %2701 = vmatpush1.bf16.msra.mxu0 %v11889_v61  ;;  %11310 = vmatpush3.bf16.msra.mxu1 %v11960_v62  ;;  %v12044_v61 = vld [vmem:[#allocation7 + $0x5b4] ss:$52 sps:$4 sm:$0xff]   ;;  %v11967_v62 = vld [vmem:[#allocation2 + $0x8d0] ss:$28 sps:$4 sm:$0xff]  }
 0x18c   :  { %2702 = vmatprep.subr.bf16.mxu0 %v11896_v63  ;;  %11311 = vmatprep.mubr.msk.bf16.mxu1 %vm13312_vm1, %v13311_v0  ;;  %v11975_v63 = vld [vmem:[#allocation2 + $0x90c] ss:$28 sps:$4 sm:$0xff]  }
 0x18d   :  { %7530 = vmatprep.subr.bf16.mxu1 %v11966_v1  ;;  %v12042_v1 = vld [vmem:[#allocation7 + $0x5b0] ss:$52 sps:$4 sm:$0xff]  }
 0x18f   :  { %2703 = vmatpush1.bf16.msra.mxu0 %v11894_v2  ;;  %v12050_v2 = vld [vmem:[#allocation7 + $0x61c] ss:$52 sps:$4 sm:$0xff]  }
 0x190   :  { %2704 = vmatprep.subr.bf16.mxu0 %v11901_v3  ;;  %v11973_v3 = vld [vmem:[#allocation2 + $0x908] ss:$28 sps:$4 sm:$0xff]  }
 0x192   :  { %11312 = vmatmul.mubr.msk.bf16.vlgmr.msra.gmra.mrb[16].mxu1 %vm2311_vm0, %v13464_v24  ;;  %v11982_v24 = vld [vmem:[#allocation7 + $0x138] ss:$52 sps:$4 sm:$0xff]  }
 0x193   :  { %2705 = vmatpush1.bf16.msra.mxu0 %v11899_v4  ;;  %7531 = vmatpush1.bf16.msra.mxu1 %v11964_v6  ;;  %v11981_v4 = vld [vmem:[#allocation2 + $0x944] ss:$28 sps:$4 sm:$0xff]   ;;  %v12048_v6 = vld [vmem:[#allocation7 + $0x618] ss:$52 sps:$4 sm:$0xff]  }
 0x194   :  { %2706 = vmatprep.subr.bf16.mxu0 %v11906_v7  ;;  %7532 = vmatprep.subr.bf16.mxu1 %v11972_v8  ;;  %v12056_v7 = vld [vmem:[#allocation7 + $0x684] ss:$52 sps:$4 sm:$0xff]   ;;  %v11979_v8 = vld [vmem:[#allocation2 + $0x940] ss:$28 sps:$4 sm:$0xff]  }
 0x197   :  { %2707 = vmatpush1.bf16.msra.mxu0 %v11904_v9  ;;  %7533 = vmatpush1.bf16.msra.mxu1 %v11970_v11  ;;  %v11987_v9 = vld [vmem:[#allocation2 + $0x97c] ss:$28 sps:$4 sm:$0xff]  }
 0x198   :  { %2708 = vmatprep.subr.bf16.mxu0 %v11911_v12  ;;  %7534 = vmatprep.subr.bf16.mxu1 %v11978_v14  ;;  %v11985_v11 = vld [vmem:[#allocation2 + $0x978] ss:$28 sps:$4 sm:$0xff]   ;;  %v11991_v14 = vld [vmem:[#allocation2 + $0x9b0] ss:$28 sps:$4 sm:$0xff]  }
 0x199   :  { %v11993_v12 = vld [vmem:[#allocation2 + $0x9b4] ss:$28 sps:$4 sm:$0xff]  }
 0x19b   :  { %2709 = vmatpush1.bf16.msra.mxu0 %v11909_v16  ;;  %7535 = vmatpush1.bf16.msra.mxu1 %v11976_v17  ;;  %v11999_v16 = vld [vmem:[#allocation2 + $0x9ec] ss:$28 sps:$4 sm:$0xff]  }
 0x19c   :  { %2710 = vmatprep.subr.bf16.mxu0 %v11916_v19  ;;  %7536 = vmatprep.subr.bf16.mxu1 %v11984_v20  ;;  %v11997_v17 = vld [vmem:[#allocation2 + $0x9e8] ss:$28 sps:$4 sm:$0xff]   ;;  %v12003_v20 = vld [vmem:[#allocation2 + $0xa20] ss:$28 sps:$4 sm:$0xff]  }
 0x19d   :  { %v12005_v19 = vld [vmem:[#allocation2 + $0xa24] ss:$28 sps:$4 sm:$0xff]  }
 0x19f   :  { %2711 = vmatpush1.bf16.msra.mxu0 %v11914_v21  ;;  %7537 = vmatpush1.bf16.msra.mxu1 %v11982_v24  ;;  %v12011_v21 = vld [vmem:[#allocation2 + $0xa5c] ss:$28 sps:$4 sm:$0xff]  }
 0x1a0   :  { %2712 = vmatprep.subr.bf16.mxu0 %v11921_v22  ;;  %7538 = vmatprep.subr.bf16.mxu1 %v11990_v13  ;;  %v12009_v24 = vld [vmem:[#allocation2 + $0xa58] ss:$28 sps:$4 sm:$0xff]   ;;  %v12015_v13 = vld [vmem:[#allocation2 + $0xa90] ss:$28 sps:$4 sm:$0xff]  }
 0x1a1   :  { %v12017_v22 = vld [vmem:[#allocation2 + $0xa94] ss:$28 sps:$4 sm:$0xff]  }
 0x1a3   :  { %2713 = vmatpush1.bf16.msra.mxu0 %v11919_v25  ;;  %7539 = vmatpush1.bf16.msra.mxu1 %v11988_v26  ;;  %v12029_v25 = vld [vmem:[#allocation7 + $0xc] ss:$52 sps:$4 sm:$0xff]   ;;  %v488_v26 = vlaneseq }
 0x1a4   :  { %2714 = vmatprep.subr.bf16.mxu0 %v11926_v27  ;;  %7540 = vmatprep.subr.bf16.mxu1 %v11996_v28  ;;  %v12027_v27 = vld [vmem:[#allocation7 + $0x8] ss:$52 sps:$4 sm:$0xff]  }
 0x1a5   :  { %v12035_v28 = vld [vmem:[#allocation7 + $0x74] ss:$52 sps:$4 sm:$0xff]  }
 0x1a7   :  { %2715 = vmatpush1.bf16.msra.mxu0 %v11924_v29  ;;  %7541 = vmatpush1.bf16.msra.mxu1 %v11994_v31  ;;  %v13488_v29 = vshrl.u32 %v488_v26, 7  ;;  %v13159_v31 = vld [vmem:[%s14001_s0 + $0x18] ss:$0 sps:$4 sm:$0xff]   ;;  %v12098_v26 = vld [vmem:[#allocation7 + $0x95c] ss:$52 sps:$4 sm:$0xff]  }
 0x1a8   :  { %2725 = vmatprep.subr.bf16.mxu0 %v11931_v32  ;;  %7542 = vmatprep.subr.bf16.mxu1 %v12002_v33  ;;  %v13497_v33 = vld [vmem:[#allocation5] sm:$0xff] }
 0x1a9   :  { %v13495_v32 = vsub.s32 0, %v13488_v29 }
 0x1aa   :  { %2717 = vmatmul.mubr.bf16.vlgmr.msra.gmra.mrb[4].mxu0 %v13438_v10  ;;  %v12018_v10 = vld [vmem:[#allocation7 + $0x3a8] ss:$52 sps:$4 sm:$0xff]  }
 0x1ab   :  { %2726 = vmatpush1.bf16.msra.mxu0 %v11929_v34  ;;  %7543 = vmatpush1.bf16.msra.mxu1 %v12000_v35  ;;  %v13500_v34 = vsub.s32 1, %v13488_v29  ;;  %v13503_v35 = vsub.s32 3, %v13488_v29 }
 0x1ac   :  { %2727 = vmatprep.subr.bf16.mxu0 %v11936_v36  ;;  %7544 = vmatprep.subr.bf16.mxu1 %v12008_v37  ;;  %v12041_v36 = vld [vmem:[#allocation7 + $0xdc] ss:$52 sps:$4 sm:$0xff]   ;;  %v491_v37 = vrot.slane %v13497_v33, %v13495_v32 }
 0x1ad   :  { %2757 = vmatprep.mubr.bf16.mxu0 %v13447_v15  ;;  %v11956_v15 = vld [vmem:[#allocation2 + $0x82c] ss:$28 sps:$4 sm:$0xff]  }
 0x1af   :  { %2728 = vmatpush1.bf16.msra.mxu0 %v11934_v38  ;;  %7545 = vmatpush1.bf16.msra.mxu1 %v12006_v39  ;;  %v12039_v38 = vld [vmem:[#allocation7 + $0xd8] ss:$52 sps:$4 sm:$0xff]   ;;  %v495_v39 = vrot.slane %v13497_v33, %v13500_v34 }
 0x1b0   :  { %2729 = vmatprep.subr.bf16.mxu0 %v11941_v40  ;;  %7546 = vmatprep.subr.bf16.mxu1 %v12014_v41  ;;  %v503_v40 = vrot.slane %v13497_v33, %v13503_v35  ;;  %v12047_v41 = vld [vmem:[#allocation7 + $0x144] ss:$52 sps:$4 sm:$0xff]  }
 0x1b3   :  { %2730 = vmatpush1.bf16.msra.mxu0 %v11939_v42  ;;  %7547 = vmatpush1.bf16.msra.mxu1 %v12012_v48 }
 0x1b4   :  { %2731 = vmatprep.subr.bf16.mxu0 %v11946_v5  ;;  %7548 = vmatprep.subr.bf16.mxu1 %v12020_v43 }
 0x1b7   :  { %2732 = vmatpush1.bf16.msra.mxu0 %v11944_v44  ;;  %7549 = vmatpush1.bf16.msra.mxu1 %v12018_v10 }
 0x1b8   :  { %2733 = vmatprep.subr.bf16.mxu0 %v11951_v45  ;;  %7550 = vmatprep.subr.bf16.mxu1 %v12023_v46 }
 0x1bb   :  { %2734 = vmatpush1.bf16.msra.mxu0 %v11949_v30  ;;  %7551 = vmatpush1.bf16.msra.mxu1 %v12021_v47  ;;  %v12045_v47 = vld [vmem:[#allocation7 + $0x140] ss:$52 sps:$4 sm:$0xff]  }
 0x1bc   :  { %2735 = vmatprep.subr.bf16.mxu0 %v11956_v15  ;;  %7552 = vmatprep.subr.bf16.mxu1 %v12026_v49 }
 0x1bf   :  { %2736 = vmatpush1.bf16.msra.mxu0 %v11954_v50  ;;  %7553 = vmatpush1.bf16.msra.mxu1 %v12024_v51  ;;  %v12053_v51 = vld [vmem:[#allocation7 + $0x1ac] ss:$52 sps:$4 sm:$0xff]  }
 0x1c0   :  { %2737 = vmatprep.subr.bf16.mxu0 %v11959_v52  ;;  %7554 = vmatprep.subr.bf16.mxu1 %v12032_v53 }
 0x1c3   :  { %2738 = vmatpush1.bf16.msra.mxu0 %v11957_v54  ;;  %7555 = vmatpush1.bf16.msra.mxu1 %v12030_v55  ;;  %v12051_v55 = vld [vmem:[#allocation7 + $0x1a8] ss:$52 sps:$4 sm:$0xff]  }
 0x1c4   :  { %2739 = vmatprep.subr.bf16.mxu0 %v11963_v56  ;;  %7556 = vmatprep.subr.bf16.mxu1 %v12038_v57  ;;  %v12054_v56 = vld [vmem:[#allocation7 + $0x680] ss:$52 sps:$4 sm:$0xff]  }
 0x1c5   :  { %v12059_v57 = vld [vmem:[#allocation7 + $0x214] ss:$52 sps:$4 sm:$0xff]  }
 0x1c7   :  { %2740 = vmatpush1.bf16.msra.mxu0 %v11961_v58  ;;  %7557 = vmatpush1.bf16.msra.mxu1 %v12036_v59  ;;  %v12062_v59 = vld [vmem:[#allocation7 + $0x6ec] ss:$52 sps:$4 sm:$0xff]  }
 0x1c8   :  { %2741 = vmatprep.subr.bf16.mxu0 %v11969_v60  ;;  %7558 = vmatprep.subr.bf16.mxu1 %v12044_v61  ;;  %v12057_v61 = vld [vmem:[#allocation7 + $0x210] ss:$52 sps:$4 sm:$0xff]  }
 0x1cb   :  { %2742 = vmatpush1.bf16.msra.mxu0 %v11967_v62  ;;  %7559 = vmatpush1.bf16.msra.mxu1 %v12042_v1  ;;  %v12060_v62 = vld [vmem:[#allocation7 + $0x6e8] ss:$52 sps:$4 sm:$0xff]  }
 0x1cc   :  { %2743 = vmatprep.subr.bf16.mxu0 %v11975_v63  ;;  %7560 = vmatprep.subr.bf16.mxu1 %v12050_v2  ;;  %v12065_v63 = vld [vmem:[#allocation7 + $0x27c] ss:$52 sps:$4 sm:$0xff]   ;;  %v12068_v1 = vld [vmem:[#allocation7 + $0x754] ss:$52 sps:$4 sm:$0xff]   ;;  %v12063_v2 = vld [vmem:[#allocation7 + $0x278] ss:$52 sps:$4 sm:$0xff]  }
 0x1cf   :  { %2744 = vmatpush1.bf16.msra.mxu0 %v11973_v3  ;;  %7561 = vmatpush1.bf16.msra.mxu1 %v12048_v6  ;;  %v12066_v3 = vld [vmem:[#allocation7 + $0x750] ss:$52 sps:$4 sm:$0xff]  }
 0x1d0   :  { %2745 = vmatprep.subr.bf16.mxu0 %v11981_v4  ;;  %7571 = vmatprep.subr.bf16.mxu1 %v12056_v7  ;;  %v12071_v4 = vld [vmem:[#allocation7 + $0x2e4] ss:$52 sps:$4 sm:$0xff]   ;;  %v12074_v6 = vld [vmem:[#allocation7 + $0x7bc] ss:$52 sps:$4 sm:$0xff]   ;;  %v12069_v7 = vld [vmem:[#allocation7 + $0x2e0] ss:$52 sps:$4 sm:$0xff]  }
 0x1d3   :  { %2746 = vmatpush1.bf16.msra.mxu0 %v11979_v8  ;;  %v12072_v8 = vld [vmem:[#allocation7 + $0x7b8] ss:$52 sps:$4 sm:$0xff]  }
 0x1d4   :  { %2747 = vmatprep.subr.bf16.mxu0 %v11987_v9  ;;  %v12077_v9 = vld [vmem:[#allocation7 + $0x34c] ss:$52 sps:$4 sm:$0xff]  }
 0x1d7   :  { %2748 = vmatpush1.bf16.msra.mxu0 %v11985_v11  ;;  %v12080_v11 = vld [vmem:[#allocation7 + $0x824] ss:$52 sps:$4 sm:$0xff]  }
 0x1d8   :  { %2749 = vmatprep.subr.bf16.mxu0 %v11993_v12  ;;  %v12075_v12 = vld [vmem:[#allocation7 + $0x348] ss:$52 sps:$4 sm:$0xff]  }
 0x1db   :  { %2750 = vmatpush1.bf16.msra.mxu0 %v11991_v14  ;;  %v12078_v14 = vld [vmem:[#allocation7 + $0x820] ss:$52 sps:$4 sm:$0xff]  }
 0x1dc   :  { %2751 = vmatprep.subr.bf16.mxu0 %v11999_v16  ;;  %v12083_v16 = vld [vmem:[#allocation7 + $0x3b4] ss:$52 sps:$4 sm:$0xff]  }
 0x1df   :  { %2752 = vmatpush1.bf16.msra.mxu0 %v11997_v17  ;;  %v12086_v17 = vld [vmem:[#allocation7 + $0x88c] ss:$52 sps:$4 sm:$0xff]  }
 0x1e0   :  { %2753 = vmatprep.subr.bf16.mxu0 %v12005_v19  ;;  %v12081_v19 = vld [vmem:[#allocation7 + $0x3b0] ss:$52 sps:$4 sm:$0xff]  }
 0x1e3   :  { %2754 = vmatpush1.bf16.msra.mxu0 %v12003_v20  ;;  %v12084_v20 = vld [vmem:[#allocation7 + $0x888] ss:$52 sps:$4 sm:$0xff]  }
 0x1e4   :  { %2755 = vmatprep.subr.bf16.mxu0 %v12011_v21  ;;  %v12089_v21 = vld [vmem:[#allocation7 + $0x41c] ss:$52 sps:$4 sm:$0xff]  }
 0x1e7   :  { %2756 = vmatpush1.bf16.msra.mxu0 %v12009_v24  ;;  %v12092_v24 = vld [vmem:[#allocation7 + $0x8f4] ss:$52 sps:$4 sm:$0xff]  }
 0x1e8   :  { %2766 = vmatprep.subr.bf16.mxu0 %v12017_v22  ;;  %v12087_v22 = vld [vmem:[#allocation7 + $0x418] ss:$52 sps:$4 sm:$0xff]  }
 0x1ea   :  { %2758 = vmatmul.mubr.bf16.vlgmr.msra.gmra.mrb[4].mxu0 %v13455_v18  ;;  %v12033_v18 = vld [vmem:[#allocation7 + $0x70] ss:$52 sps:$4 sm:$0xff]  }
 0x1eb   :  { %2767 = vmatpush1.bf16.msra.mxu0 %v12015_v13  ;;  %2798 = vmatprep.mubr.bf16.mxu0 %v13310_v23  ;;  %v12090_v13 = vld [vmem:[#allocation7 + $0x8f0] ss:$52 sps:$4 sm:$0xff]  }
 0x1ec   :  { %7694 = vmatprep.subr.bf16.mxu0 %v12029_v25  ;;  %v12095_v25 = vld [vmem:[#allocation7 + $0x484] ss:$52 sps:$4 sm:$0xff]  }
 0x1f6   :  { %10190 = vmatmul.mubr.msk.bf16.vlgmr.msra.gmra.mrb[4].mxu0 %vm2311_vm0, %v13159_v31  ;;  %v12093_v31 = vld [vmem:[#allocation7 + $0x480] ss:$52 sps:$4 sm:$0xff]  }
 0x1f7   :  { %7695 = vmatpush1.bf16.msra.mxu0 %v12027_v27 }
 0x1f8   :  { %7696 = vmatprep.subr.bf16.mxu0 %v12035_v28 }
 0x1fb   :  { %7697 = vmatpush1.bf16.msra.mxu0 %v12033_v18  ;;  %v12096_v18 = vld [vmem:[#allocation7 + $0x958] ss:$52 sps:$4 sm:$0xff]  }
 0x1fc   :  { %7698 = vmatprep.subr.bf16.mxu0 %v12041_v36 }
 0x1fd   :  { %v2472_v42 = vpop.f32.mrb[0].mxu0  ;;  %v13511_v48 = vpop.f32.mrb[0].mxu1 }
 0x1fe   :  { %v11355_v5 = vadd.f32 %v2472_v42, %v491_v37  ;;  %v2474_v43 = vpop.f32.mrb[1].mxu0  ;;  %v2638_v44 = vpop.f32.mrb[1].mxu1  ;;  %v12102_v42 = vld [vmem:[#allocation7 + $0x9c0] ss:$52 sps:$4 sm:$0xff]  }
 0x1ff   :  { %7699 = vmatpush1.bf16.msra.mxu0 %v12039_v38  ;;  %v11356_v10 = vadd.f32 %v2474_v43, %v495_v39  ;;  %v11358_v45 = vadd.f32 %v2638_v44, %v503_v40  ;;  %v2476_v46 = vpop.f32.mrb[2].mxu0  ;;  %v2640_v30 = vpop.f32.mrb[2].mxu1  ;;  %v12101_v38 = vld [vmem:[#allocation7 + $0x4ec] ss:$52 sps:$4 sm:$0xff]   ;;  %v12104_v39 = vld [vmem:[#allocation7 + $0x9c4] ss:$52 sps:$4 sm:$0xff]  }
 0x200   :  { %v2967_v15 = vmax.f32 %v11355_v5, 0.0  ;;  %v2477_v49 = vpop.f32.mrb[3].mxu0  ;;  %v2641_v50 = vpop.f32.mrb[3].mxu1  ;;  %7700 = vmatprep.subr.bf16.mxu0 %v12047_v41  ;;  %v12099_v41 = vld [vmem:[#allocation7 + $0x4e8] ss:$52 sps:$4 sm:$0xff]  }
 0x201   :  { %v2968_v52 = vmax.f32 %v11356_v10, 0.0  ;;  %v2970_v53 = vmax.f32 %v11358_v45, 0.0  ;;  %v12107_v5 = vld [vmem:[#allocation7 + $0x554] ss:$52 sps:$4 sm:$0xff]   ;;  %v12110_v43 = vld [vmem:[#allocation7 + $0xa2c] ss:$52 sps:$4 sm:$0xff]  }
 0x202   :  { %v13515_v58 = vpack.c.bf16 %v2967_v15, %v2967_v15  ;;  %v12105_v44 = vld [vmem:[#allocation7 + $0x550] ss:$52 sps:$4 sm:$0xff]   ;;  %v12108_v10 = vld [vmem:[#allocation7 + $0xa28] ss:$52 sps:$4 sm:$0xff]   ;;  %v12111_v30 = vld [vmem:[#allocation7 + $0x5b8] ss:$52 sps:$4 sm:$0xff]  }
 0x203   :  { %v13513_v54 = vpack.c.bf16 %v2968_v52, %v2968_v52  ;;  %7701 = vmatpush1.bf16.msra.mxu0 %v12045_v47  ;;  %v13519_v60 = vpack.c.bf16 %v2970_v53, %v2970_v53  ;;  %v12113_v45 = vld [vmem:[#allocation7 + $0x5bc] ss:$52 sps:$4 sm:$0xff]   ;;  %v12116_v46 = vld [vmem:[#allocation7 + $0xa94] ss:$52 sps:$4 sm:$0xff]   ;;  %v12119_v15 = vld [vmem:[#allocation7 + $0x624] ss:$52 sps:$4 sm:$0xff]  }
 0x204   :  { %7702 = vmatprep.subr.bf16.mxu0 %v12053_v51  ;;  %v12114_v47 = vld [vmem:[#allocation7 + $0xa90] ss:$52 sps:$4 sm:$0xff]   ;;  %v12117_v50 = vld [vmem:[#allocation7 + $0x620] ss:$52 sps:$4 sm:$0xff]   ;;  %v12120_v51 = vld [vmem:[#allocation7 + $0xaf8] ss:$52 sps:$4 sm:$0xff]  }
 0x205   :  { %7562 = vmatprep.mubr.bf16.mxu1 %v13513_v54  ;;  %7726 = vmatprep.mubr.bf16.mxu0 %v13513_v54  ;;  %v12122_v49 = vld [vmem:[#allocation7 + $0xafc] ss:$52 sps:$4 sm:$0xff]   ;;  %v12125_v52 = vld [vmem:[#allocation7 + $0x68c] ss:$52 sps:$4 sm:$0xff]   ;;  %v12128_v53 = vld [vmem:[#allocation7 + $0xb64] ss:$52 sps:$4 sm:$0xff]  }
 0x206   :  { %7563 = vmatmul.mubr.bf16.vlgmr.msra.gmra.mrb[20].mxu1 %v13515_v58 }
 0x207   :  { %7703 = vmatpush1.bf16.msra.mxu0 %v12051_v55  ;;  %7572 = vmatpush1.bf16.msra.mxu1 %v12054_v56  ;;  %v12123_v55 = vld [vmem:[#allocation7 + $0x688] ss:$52 sps:$4 sm:$0xff]   ;;  %v12126_v56 = vld [vmem:[#allocation7 + $0xb60] ss:$52 sps:$4 sm:$0xff]  }
 0x208   :  { %7603 = vmatprep.mubr.bf16.mxu1 %v13519_v60  ;;  %7704 = vmatprep.subr.bf16.mxu0 %v12059_v57  ;;  %v12131_v57 = vld [vmem:[#allocation7 + $0x6f4] ss:$52 sps:$4 sm:$0xff]  }
 0x209   :  { %7573 = vmatprep.subr.bf16.mxu1 %v12062_v59  ;;  %v12134_v59 = vld [vmem:[#allocation7 + $0xbcc] ss:$52 sps:$4 sm:$0xff]  }
 0x20b   :  { %7705 = vmatpush1.bf16.msra.mxu0 %v12057_v61  ;;  %7574 = vmatpush1.bf16.msra.mxu1 %v12060_v62  ;;  %v13526_v61 = vsub.s32 2, %v13488_v29  ;;  %v12129_v62 = vld [vmem:[#allocation7 + $0x6f0] ss:$52 sps:$4 sm:$0xff]  }
 0x20c   :  { %7706 = vmatprep.subr.bf16.mxu0 %v12065_v63  ;;  %7575 = vmatprep.subr.bf16.mxu1 %v12068_v1  ;;  %v514_v63 = vsub.s32 6, %v13488_v29  ;;  %v12132_v1 = vld [vmem:[#allocation7 + $0xbc8] ss:$52 sps:$4 sm:$0xff]  }
 0x20f   :  { %7707 = vmatpush1.bf16.msra.mxu0 %v12063_v2  ;;  %7576 = vmatpush1.bf16.msra.mxu1 %v12066_v3  ;;  %v12137_v2 = vld [vmem:[#allocation7 + $0x75c] ss:$52 sps:$4 sm:$0xff]   ;;  %v12140_v3 = vld [vmem:[#allocation7 + $0xc34] ss:$52 sps:$4 sm:$0xff]  }
 0x210   :  { %7708 = vmatprep.subr.bf16.mxu0 %v12071_v4  ;;  %7577 = vmatprep.subr.bf16.mxu1 %v12074_v6  ;;  %v499_v4 = vrot.slane %v13497_v33, %v13526_v61  ;;  %v12135_v6 = vld [vmem:[#allocation7 + $0x758] ss:$52 sps:$4 sm:$0xff]  }
 0x213   :  { %7709 = vmatpush1.bf16.msra.mxu0 %v12069_v7  ;;  %7578 = vmatpush1.bf16.msra.mxu1 %v12072_v8  ;;  %v515_v7 = vrot.slane %v13497_v33, %v514_v63  ;;  %v12138_v8 = vld [vmem:[#allocation7 + $0xc30] ss:$52 sps:$4 sm:$0xff]  }
 0x214   :  { %7710 = vmatprep.subr.bf16.mxu0 %v12077_v9  ;;  %7579 = vmatprep.subr.bf16.mxu1 %v12080_v11  ;;  %v12143_v9 = vld [vmem:[#allocation7 + $0x7c4] ss:$52 sps:$4 sm:$0xff]   ;;  %v12146_v11 = vld [vmem:[#allocation7 + $0xc9c] ss:$52 sps:$4 sm:$0xff]  }
 0x217   :  { %7711 = vmatpush1.bf16.msra.mxu0 %v12075_v12  ;;  %7580 = vmatpush1.bf16.msra.mxu1 %v12078_v14  ;;  %v11357_v12 = vadd.f32 %v13511_v48, %v499_v4  ;;  %v12141_v14 = vld [vmem:[#allocation7 + $0x7c0] ss:$52 sps:$4 sm:$0xff]  }
 0x218   :  { %7712 = vmatprep.subr.bf16.mxu0 %v12083_v16  ;;  %7581 = vmatprep.subr.bf16.mxu1 %v12086_v17  ;;  %v12152_v48 = vld [vmem:[#allocation7 + $0x894] ss:$52 sps:$4 sm:$0xff]  }
 0x21b   :  { %7713 = vmatpush1.bf16.msra.mxu0 %v12081_v19  ;;  %7582 = vmatpush1.bf16.msra.mxu1 %v12084_v20  ;;  %v12144_v19 = vld [vmem:[#allocation7 + $0xc98] ss:$52 sps:$4 sm:$0xff]  }
 0x21c   :  { %7714 = vmatprep.subr.bf16.mxu0 %v12089_v21  ;;  %7583 = vmatprep.subr.bf16.mxu1 %v12092_v24  ;;  %v12149_v20 = vld [vmem:[#allocation7 + $0x82c] ss:$52 sps:$4 sm:$0xff]   ;;  %v12185_v24 = vld [vmem:[#allocation7 + $0xd04] ss:$52 sps:$4 sm:$0xff]  }
 0x21d   :  { %v11041_v27 = vpop.f32.mrb[4].mxu1 }
 0x21e   :  { %v11042_v28 = vpop.f32.mrb[5].mxu1 }
 0x21f   :  { %7715 = vmatpush1.bf16.msra.mxu0 %v12087_v22  ;;  %7584 = vmatpush1.bf16.msra.mxu1 %v12090_v13  ;;  %v13523_v36 = vadd.f32 %v11042_v28, %v11041_v27  ;;  %v11044_v37 = vpop.f32.mrb[6].mxu1  ;;  %v12183_v28 = vld [vmem:[#allocation7 + $0xd00] ss:$52 sps:$4 sm:$0xff]  }
 0x220   :  { %7716 = vmatprep.subr.bf16.mxu0 %v12095_v25  ;;  %7585 = vmatprep.subr.bf16.mxu1 %v12098_v26  ;;  %v11045_v40 = vpop.f32.mrb[7].mxu1  ;;  %v2969_v25 = vmax.f32 %v11357_v12, 0.0  ;;  %v12147_v26 = vld [vmem:[#allocation7 + $0x828] ss:$52 sps:$4 sm:$0xff]  }
 0x221   :  { %v2842_v16 = vadd.f32 %v13523_v36, %v515_v7  ;;  %v12150_v36 = vld [vmem:[#allocation7 + $0x890] ss:$52 sps:$4 sm:$0xff]   ;;  %v12197_v40 = vld [vmem:[#allocation7 + $0xdd4] ss:$52 sps:$4 sm:$0xff]   ;;  %v12225_v7 = vld [vmem:[#allocation7 + $0xfd8] ss:$52 sps:$4 sm:$0xff]  }
 0x222   :  { %v12155_v37 = vld [vmem:[#allocation7 + $0x8fc] ss:$52 sps:$4 sm:$0xff]   ;;  %v12176_v12 = vld [vmem:[#allocation7 + $0xbd4] ss:$52 sps:$4 sm:$0xff]  }
 0x223   :  { %7717 = vmatpush1.bf16.msra.mxu0 %v12093_v31  ;;  %7586 = vmatpush1.bf16.msra.mxu1 %v12096_v18  ;;  %v12191_v31 = vld [vmem:[#allocation7 + $0xd6c] ss:$52 sps:$4 sm:$0xff]   ;;  %v13540_v18 = vpack.c.bf16 %v2969_v25, %v2969_v25 }
 0x224   :  { %7718 = vmatprep.subr.bf16.mxu0 %v12101_v38  ;;  %7587 = vmatprep.subr.bf16.mxu1 %v12104_v39  ;;  %v12189_v38 = vld [vmem:[#allocation7 + $0xd68] ss:$52 sps:$4 sm:$0xff]   ;;  %v12153_v39 = vld [vmem:[#allocation7 + $0x8f8] ss:$52 sps:$4 sm:$0xff]  }
 0x227   :  { %7719 = vmatpush1.bf16.msra.mxu0 %v12099_v41  ;;  %7588 = vmatpush1.bf16.msra.mxu1 %v12102_v42  ;;  %v12158_v41 = vld [vmem:[#allocation7 + $0x964] ss:$52 sps:$4 sm:$0xff]  }
 0x228   :  { %7720 = vmatprep.subr.bf16.mxu0 %v12107_v5  ;;  %7589 = vmatprep.subr.bf16.mxu1 %v12110_v43  ;;  %v12195_v42 = vld [vmem:[#allocation7 + $0xdd0] ss:$52 sps:$4 sm:$0xff]   ;;  %v12156_v5 = vld [vmem:[#allocation7 + $0x960] ss:$52 sps:$4 sm:$0xff]  }
 0x229   :  { %v12203_v43 = vld [vmem:[#allocation7 + $0xe3c] ss:$52 sps:$4 sm:$0xff]  }
 0x22b   :  { %7721 = vmatpush1.bf16.msra.mxu0 %v12105_v44  ;;  %7590 = vmatpush1.bf16.msra.mxu1 %v12108_v10  ;;  %v12161_v44 = vld [vmem:[#allocation7 + $0x9cc] ss:$52 sps:$4 sm:$0xff]  }
 0x22c   :  { %7722 = vmatprep.subr.bf16.mxu0 %v12113_v45  ;;  %7591 = vmatprep.subr.bf16.mxu1 %v12116_v46  ;;  %v12201_v10 = vld [vmem:[#allocation7 + $0xe38] ss:$52 sps:$4 sm:$0xff]   ;;  %v12159_v46 = vld [vmem:[#allocation7 + $0x9c8] ss:$52 sps:$4 sm:$0xff]  }
 0x22d   :  { %v12209_v45 = vld [vmem:[#allocation7 + $0xea4] ss:$52 sps:$4 sm:$0xff]  }
 0x22f   :  { %7723 = vmatpush1.bf16.msra.mxu0 %v12111_v30  ;;  %7592 = vmatpush1.bf16.msra.mxu1 %v12114_v47  ;;  %v12164_v30 = vld [vmem:[#allocation7 + $0xa34] ss:$52 sps:$4 sm:$0xff]  }
 0x230   :  { %7724 = vmatprep.subr.bf16.mxu0 %v12119_v15  ;;  %7593 = vmatprep.subr.bf16.mxu1 %v12122_v49  ;;  %v12207_v47 = vld [vmem:[#allocation7 + $0xea0] ss:$52 sps:$4 sm:$0xff]   ;;  %v12162_v49 = vld [vmem:[#allocation7 + $0xa30] ss:$52 sps:$4 sm:$0xff]  }
 0x231   :  { %v12215_v15 = vld [vmem:[#allocation7 + $0xf0c] ss:$52 sps:$4 sm:$0xff]  }
 0x233   :  { %7725 = vmatpush1.bf16.msra.mxu0 %v12117_v50  ;;  %7594 = vmatpush1.bf16.msra.mxu1 %v12120_v51  ;;  %v12167_v50 = vld [vmem:[#allocation7 + $0xa9c] ss:$52 sps:$4 sm:$0xff]  }
 0x234   :  { %7735 = vmatprep.subr.bf16.mxu0 %v12125_v52  ;;  %7595 = vmatprep.subr.bf16.mxu1 %v12128_v53  ;;  %v12213_v51 = vld [vmem:[#allocation7 + $0xf08] ss:$52 sps:$4 sm:$0xff]   ;;  %v12165_v53 = vld [vmem:[#allocation7 + $0xa98] ss:$52 sps:$4 sm:$0xff]  }
 0x235   :  { %v12221_v52 = vld [vmem:[#allocation7 + $0xf74] ss:$52 sps:$4 sm:$0xff]  }
 0x236   :  { %7727 = vmatmul.mubr.bf16.vlgmr.msra.gmra.mrb[8].mxu0 %v13515_v58 }
 0x237   :  { %7736 = vmatpush1.bf16.msra.mxu0 %v12123_v55  ;;  %7767 = vmatprep.mubr.bf16.mxu0 %v13519_v60  ;;  %v12170_v55 = vld [vmem:[#allocation7 + $0xb04] ss:$52 sps:$4 sm:$0xff]  }
 0x238   :  { %7596 = vmatpush1.bf16.msra.mxu1 %v12126_v56  ;;  %7737 = vmatprep.subr.bf16.mxu0 %v12131_v57  ;;  %v12219_v56 = vld [vmem:[#allocation7 + $0xf70] ss:$52 sps:$4 sm:$0xff]  }
 0x239   :  { %7597 = vmatprep.subr.bf16.mxu1 %v12134_v59  ;;  %v12227_v57 = vld [vmem:[#allocation7 + $0xfdc] ss:$52 sps:$4 sm:$0xff]  }
 0x23b   :  { %7738 = vmatpush1.bf16.msra.mxu0 %v12129_v62 }
 0x23c   :  { %7598 = vmatpush1.bf16.msra.mxu1 %v12132_v1  ;;  %7739 = vmatprep.subr.bf16.mxu0 %v12137_v2  ;;  %v12168_v1 = vld [vmem:[#allocation7 + $0xb00] ss:$52 sps:$4 sm:$0xff]  }
 0x23d   :  { %7599 = vmatprep.subr.bf16.mxu1 %v12140_v3  ;;  %v11063_v17 = vpop.f32.mrb[8].mxu1  ;;  %v12173_v2 = vld [vmem:[#allocation7 + $0xb6c] ss:$52 sps:$4 sm:$0xff]  }
 0x23e   :  { %v11064_v21 = vpop.f32.mrb[9].mxu1 }
 0x23f   :  { %7740 = vmatpush1.bf16.msra.mxu0 %v12135_v6  ;;  %v11065_v22 = vadd.f32 %v11064_v21, %v11063_v17  ;;  %v11066_v33 = vpop.f32.mrb[10].mxu1  ;;  %v12174_v21 = vld [vmem:[#allocation7 + $0xbd0] ss:$52 sps:$4 sm:$0xff]  }
 0x240   :  { %7600 = vmatpush1.bf16.msra.mxu1 %v12138_v8  ;;  %7741 = vmatprep.subr.bf16.mxu0 %v12143_v9  ;;  %v11067_v13 = vpop.f32.mrb[11].mxu1  ;;  %v12233_v8 = vld [vmem:[#allocation7 + $0x1044] ss:$52 sps:$4 sm:$0xff]   ;;  %v12237_v33 = vld [vmem:[#allocation7 + $0x10a8] ss:$52 sps:$4 sm:$0xff]  }
 0x241   :  { %7601 = vmatprep.subr.bf16.mxu1 %v12146_v11  ;;  %v13538_v27 = vadd.f32 %v11065_v22, %v2842_v16  ;;  %v12171_v11 = vld [vmem:[#allocation7 + $0xb68] ss:$52 sps:$4 sm:$0xff]   ;;  %v12239_v16 = vld [vmem:[#allocation7 + $0x10ac] ss:$52 sps:$4 sm:$0xff]  }
 0x242   :  { %v12245_v13 = vld [vmem:[#allocation7 + $0x1114] ss:$52 sps:$4 sm:$0xff]  }
 0x243   :  { %7742 = vmatpush1.bf16.msra.mxu0 %v12141_v14  ;;  %v12231_v14 = vld [vmem:[#allocation7 + $0x1040] ss:$52 sps:$4 sm:$0xff]  }
 0x244   :  { %7602 = vmatpush1.bf16.msra.mxu1 %v12144_v19  ;;  %7743 = vmatprep.subr.bf16.mxu0 %v12149_v20 }
 0x245   :  { %7612 = vmatprep.subr.bf16.mxu1 %v12185_v24  ;;  %v12179_v24 = vld [vmem:[#allocation7 + $0xc3c] ss:$52 sps:$4 sm:$0xff]  }
 0x247   :  { %7604 = vmatmul.mubr.bf16.vlgmr.msra.gmra.mrb[20].mxu1 %v13540_v18  ;;  %7744 = vmatpush1.bf16.msra.mxu0 %v12147_v26  ;;  %v12177_v26 = vld [vmem:[#allocation7 + $0xc38] ss:$52 sps:$4 sm:$0xff]  }
 0x248   :  { %7745 = vmatprep.subr.bf16.mxu0 %v12152_v48  ;;  %7613 = vmatpush1.bf16.msra.mxu1 %v12183_v28  ;;  %v12243_v48 = vld [vmem:[#allocation7 + $0x1110] ss:$52 sps:$4 sm:$0xff]  }
 0x249   :  { %7614 = vmatprep.subr.bf16.mxu1 %v12191_v31  ;;  %v12251_v28 = vld [vmem:[#allocation7 + $0x117c] ss:$52 sps:$4 sm:$0xff]   ;;  %v12180_v31 = vld [vmem:[#allocation7 + $0xca0] ss:$52 sps:$4 sm:$0xff]  }
 0x24b   :  { %7746 = vmatpush1.bf16.msra.mxu0 %v12150_v36  ;;  %v12188_v36 = vld [vmem:[#allocation7 + $0xd0c] ss:$52 sps:$4 sm:$0xff]  }
 0x24c   :  { %7747 = vmatprep.subr.bf16.mxu0 %v12155_v37  ;;  %7615 = vmatpush1.bf16.msra.mxu1 %v12189_v38  ;;  %v12249_v37 = vld [vmem:[#allocation7 + $0x1178] ss:$52 sps:$4 sm:$0xff]   ;;  %v12186_v38 = vld [vmem:[#allocation7 + $0xd08] ss:$52 sps:$4 sm:$0xff]  }
 0x24d   :  { %7616 = vmatprep.subr.bf16.mxu1 %v12197_v40  ;;  %v12194_v40 = vld [vmem:[#allocation7 + $0xd74] ss:$52 sps:$4 sm:$0xff]  }
 0x24f   :  { %7748 = vmatpush1.bf16.msra.mxu0 %v12153_v39  ;;  %v12257_v39 = vld [vmem:[#allocation7 + $0x11e4] ss:$52 sps:$4 sm:$0xff]  }
 0x250   :  { %7749 = vmatprep.subr.bf16.mxu0 %v12158_v41  ;;  %7617 = vmatpush1.bf16.msra.mxu1 %v12195_v42  ;;  %v12255_v41 = vld [vmem:[#allocation7 + $0x11e0] ss:$52 sps:$4 sm:$0xff]   ;;  %v12192_v42 = vld [vmem:[#allocation7 + $0xd70] ss:$52 sps:$4 sm:$0xff]  }
 0x251   :  { %7618 = vmatprep.subr.bf16.mxu1 %v12203_v43  ;;  %v12200_v43 = vld [vmem:[#allocation7 + $0xddc] ss:$52 sps:$4 sm:$0xff]  }
 0x253   :  { %7750 = vmatpush1.bf16.msra.mxu0 %v12156_v5  ;;  %v12263_v5 = vld [vmem:[#allocation7 + $0x124c] ss:$52 sps:$4 sm:$0xff]  }
 0x254   :  { %7751 = vmatprep.subr.bf16.mxu0 %v12161_v44  ;;  %7619 = vmatpush1.bf16.msra.mxu1 %v12201_v10  ;;  %v12261_v44 = vld [vmem:[#allocation7 + $0x1248] ss:$52 sps:$4 sm:$0xff]   ;;  %v12198_v10 = vld [vmem:[#allocation7 + $0xdd8] ss:$52 sps:$4 sm:$0xff]  }
 0x255   :  { %7620 = vmatprep.subr.bf16.mxu1 %v12209_v45  ;;  %v12269_v45 = vld [vmem:[#allocation7 + $0x12b4] ss:$52 sps:$4 sm:$0xff]  }
 0x257   :  { %7752 = vmatpush1.bf16.msra.mxu0 %v12159_v46  ;;  %v12206_v46 = vld [vmem:[#allocation7 + $0xe44] ss:$52 sps:$4 sm:$0xff]  }
 0x258   :  { %7753 = vmatprep.subr.bf16.mxu0 %v12164_v30  ;;  %7621 = vmatpush1.bf16.msra.mxu1 %v12207_v47  ;;  %v12267_v30 = vld [vmem:[#allocation7 + $0x12b0] ss:$52 sps:$4 sm:$0xff]   ;;  %v12204_v47 = vld [vmem:[#allocation7 + $0xe40] ss:$52 sps:$4 sm:$0xff]  }
 0x259   :  { %7622 = vmatprep.subr.bf16.mxu1 %v12215_v15  ;;  %v12275_v15 = vld [vmem:[#allocation7 + $0x131c] ss:$52 sps:$4 sm:$0xff]  }
 0x25b   :  { %7754 = vmatpush1.bf16.msra.mxu0 %v12162_v49  ;;  %v12212_v49 = vld [vmem:[#allocation7 + $0xeac] ss:$52 sps:$4 sm:$0xff]  }
 0x25c   :  { %7755 = vmatprep.subr.bf16.mxu0 %v12167_v50  ;;  %7623 = vmatpush1.bf16.msra.mxu1 %v12213_v51  ;;  %v12273_v50 = vld [vmem:[#allocation7 + $0x1318] ss:$52 sps:$4 sm:$0xff]   ;;  %v12210_v51 = vld [vmem:[#allocation7 + $0xea8] ss:$52 sps:$4 sm:$0xff]  }
 0x25d   :  { %v11085_v59 = vpop.f32.mrb[12].mxu1  ;;  %7624 = vmatprep.subr.bf16.mxu1 %v12221_v52  ;;  %v12281_v52 = vld [vmem:[#allocation7 + $0x1384] ss:$52 sps:$4 sm:$0xff]  }
 0x25e   :  { %v11086_v62 = vpop.f32.mrb[13].mxu1 }
 0x25f   :  { %7756 = vmatpush1.bf16.msra.mxu0 %v12165_v53  ;;  %v11087_v3 = vadd.f32 %v11086_v62, %v11085_v59  ;;  %v11088_v4 = vpop.f32.mrb[14].mxu1  ;;  %v12218_v53 = vld [vmem:[#allocation7 + $0xf14] ss:$52 sps:$4 sm:$0xff]   ;;  %v12230_v59 = vld [vmem:[#allocation7 + $0xfe4] ss:$52 sps:$4 sm:$0xff]  }
 0x260   :  { %7757 = vmatprep.subr.bf16.mxu0 %v12170_v55  ;;  %v11089_v6 = vpop.f32.mrb[15].mxu1  ;;  %7625 = vmatpush1.bf16.msra.mxu1 %v12219_v56  ;;  %v12216_v55 = vld [vmem:[#allocation7 + $0xf10] ss:$52 sps:$4 sm:$0xff]   ;;  %v12228_v62 = vld [vmem:[#allocation7 + $0xfe0] ss:$52 sps:$4 sm:$0xff]  }
 0x261   :  { %v2922_v9 = vadd.f32 %v11087_v3, %v13538_v27  ;;  %7626 = vmatprep.subr.bf16.mxu1 %v12227_v57  ;;  %v12182_v27 = vld [vmem:[#allocation7 + $0xca4] ss:$52 sps:$4 sm:$0xff]   ;;  %v12224_v56 = vld [vmem:[#allocation7 + $0xf7c] ss:$52 sps:$4 sm:$0xff]   ;;  %v12242_v3 = vld [vmem:[#allocation7 + $0x10b4] ss:$52 sps:$4 sm:$0xff]  }
 0x262   :  { %v12222_v57 = vld [vmem:[#allocation7 + $0xf78] ss:$52 sps:$4 sm:$0xff]   ;;  %v12240_v4 = vld [vmem:[#allocation7 + $0x10b0] ss:$52 sps:$4 sm:$0xff]  }
 0x263   :  { %7758 = vmatpush1.bf16.msra.mxu0 %v12168_v1  ;;  %v12236_v1 = vld [vmem:[#allocation7 + $0x104c] ss:$52 sps:$4 sm:$0xff]   ;;  %v12248_v6 = vld [vmem:[#allocation7 + $0x111c] ss:$52 sps:$4 sm:$0xff]  }
 0x264   :  { %7759 = vmatprep.subr.bf16.mxu0 %v12173_v2  ;;  %7627 = vmatpush1.bf16.msra.mxu1 %v12225_v7  ;;  %v12234_v2 = vld [vmem:[#allocation7 + $0x1048] ss:$52 sps:$4 sm:$0xff]   ;;  %v12246_v7 = vld [vmem:[#allocation7 + $0x1118] ss:$52 sps:$4 sm:$0xff]  }
 0x265   :  { %v2961_v17 = vpop.f32.mrb[16].mxu1  ;;  %7628 = vmatprep.subr.bf16.mxu1 %v12233_v8  ;;  %v12254_v8 = vld [vmem:[#allocation7 + $0x1184] ss:$52 sps:$4 sm:$0xff]  }
 0x266   :  { %v13544_v19 = vadd.f32 %v2961_v17, %v2922_v9  ;;  %v11313_v20 = vpop.f32.mrb[17].mxu1  ;;  %v12252_v9 = vld [vmem:[#allocation7 + $0x1180] ss:$52 sps:$4 sm:$0xff]   ;;  %v12272_v17 = vld [vmem:[#allocation7 + $0x12bc] ss:$52 sps:$4 sm:$0xff]  }
 0x267   :  { %7760 = vmatpush1.bf16.msra.mxu0 %v12171_v11  ;;  %v2964_v22 = vpop.f32.mrb[18].mxu1  ;;  %v12260_v11 = vld [vmem:[#allocation7 + $0x11ec] ss:$52 sps:$4 sm:$0xff]  }
 0x268   :  { %7761 = vmatprep.subr.bf16.mxu0 %v12176_v12  ;;  %7629 = vmatpush1.bf16.msra.mxu1 %v12231_v14  ;;  %v11314_v25 = vpop.f32.mrb[19].mxu1  ;;  %v12258_v12 = vld [vmem:[#allocation7 + $0x11e8] ss:$52 sps:$4 sm:$0xff]   ;;  %v12270_v20 = vld [vmem:[#allocation7 + $0x12b8] ss:$52 sps:$4 sm:$0xff]  }
 0x269   :  { %7630 = vmatprep.subr.bf16.mxu1 %v12239_v16  ;;  %v12266_v14 = vld [vmem:[#allocation7 + $0x1254] ss:$52 sps:$4 sm:$0xff]   ;;  %v12264_v16 = vld [vmem:[#allocation7 + $0x1250] ss:$52 sps:$4 sm:$0xff]   ;;  %v12284_v22 = vld [vmem:[#allocation7 + $0x138c] ss:$52 sps:$4 sm:$0xff]  }
 0x26a   :  { %v13160_v25 = vld [vmem:[#allocation5] sm:$0xff] }
 0x26b   :  { %7762 = vmatpush1.bf16.msra.mxu0 %v12174_v21  ;;  %v12278_v21 = vld [vmem:[#allocation7 + $0x1324] ss:$52 sps:$4 sm:$0xff]  }
 0x26c   :  { %7763 = vmatprep.subr.bf16.mxu0 %v12179_v24  ;;  %7631 = vmatpush1.bf16.msra.mxu1 %v12237_v33  ;;  %v12276_v24 = vld [vmem:[#allocation7 + $0x1320] ss:$52 sps:$4 sm:$0xff]   ;;  %v13548_v33 = vsub.s32 4, %v13488_v29 }
 0x26d   :  { %7632 = vmatprep.subr.bf16.mxu1 %v12245_v13  ;;  %v510_v13 = vsub.s32 5, %v13488_v29 }
 0x26f   :  { %7764 = vmatpush1.bf16.msra.mxu0 %v12177_v26  ;;  %v507_v26 = vrot.slane %v13160_v25, %v13548_v33 }
 0x270   :  { %7765 = vmatprep.subr.bf16.mxu0 %v12182_v27  ;;  %7633 = vmatpush1.bf16.msra.mxu1 %v12243_v48  ;;  %v511_v27 = vrot.slane %v13160_v25, %v510_v13  ;;  %v12338_v25 = vld [vmem:[#allocation7 + $0x84] ss:$52 sps:$4 sm:$0xff]  }
 0x271   :  { %7634 = vmatprep.subr.bf16.mxu1 %v12251_v28 }
 0x273   :  { %7766 = vmatpush1.bf16.msra.mxu0 %v12180_v31 }
 0x274   :  { %7776 = vmatprep.subr.bf16.mxu0 %v12188_v36  ;;  %7635 = vmatpush1.bf16.msra.mxu1 %v12249_v37 }
 0x275   :  { %7636 = vmatprep.subr.bf16.mxu1 %v12257_v39 }
 0x276   :  { %7768 = vmatmul.mubr.bf16.vlgmr.msra.gmra.mrb[8].mxu0 %v13540_v18 }
 0x277   :  { %7777 = vmatpush1.bf16.msra.mxu0 %v12186_v38 }
 0x278   :  { %7778 = vmatprep.subr.bf16.mxu0 %v12194_v40  ;;  %7637 = vmatpush1.bf16.msra.mxu1 %v12255_v41  ;;  %v12279_v41 = vld [vmem:[#allocation7 + $0x1380] ss:$52 sps:$4 sm:$0xff]  }
 0x279   :  { %7638 = vmatprep.subr.bf16.mxu1 %v12263_v5 }
 0x27b   :  { %7779 = vmatpush1.bf16.msra.mxu0 %v12192_v42  ;;  %v12282_v42 = vld [vmem:[#allocation7 + $0x1388] ss:$52 sps:$4 sm:$0xff]  }
 0x27c   :  { %7780 = vmatprep.subr.bf16.mxu0 %v12200_v43  ;;  %7639 = vmatpush1.bf16.msra.mxu1 %v12261_v44  ;;  %v12287_v44 = vld [vmem:[#allocation7 + $0x13ec] ss:$52 sps:$4 sm:$0xff]  }
 0x27d   :  { %7640 = vmatprep.subr.bf16.mxu1 %v12269_v45  ;;  %v12285_v45 = vld [vmem:[#allocation7 + $0x13e8] ss:$52 sps:$4 sm:$0xff]  }
 0x27f   :  { %7781 = vmatpush1.bf16.msra.mxu0 %v12198_v10  ;;  %v12290_v10 = vld [vmem:[#allocation7 + $0x13f4] ss:$52 sps:$4 sm:$0xff]  }
 0x280   :  { %7782 = vmatprep.subr.bf16.mxu0 %v12206_v46  ;;  %7641 = vmatpush1.bf16.msra.mxu1 %v12267_v30  ;;  %v12288_v46 = vld [vmem:[#allocation7 + $0x13f0] ss:$52 sps:$4 sm:$0xff]   ;;  %v12293_v30 = vld [vmem:[#allocation7 + $0x1454] ss:$52 sps:$4 sm:$0xff]  }
 0x281   :  { %7642 = vmatprep.subr.bf16.mxu1 %v12275_v15  ;;  %v12291_v15 = vld [vmem:[#allocation7 + $0x1450] ss:$52 sps:$4 sm:$0xff]  }
 0x283   :  { %7783 = vmatpush1.bf16.msra.mxu0 %v12204_v47  ;;  %v12296_v47 = vld [vmem:[#allocation7 + $0x145c] ss:$52 sps:$4 sm:$0xff]  }
 0x284   :  { %7784 = vmatprep.subr.bf16.mxu0 %v12212_v49  ;;  %7643 = vmatpush1.bf16.msra.mxu1 %v12273_v50  ;;  %v12294_v49 = vld [vmem:[#allocation7 + $0x1458] ss:$52 sps:$4 sm:$0xff]   ;;  %v12299_v50 = vld [vmem:[#allocation7 + $0x14bc] ss:$52 sps:$4 sm:$0xff]  }
 0x285   :  { %7653 = vmatprep.subr.bf16.mxu1 %v12281_v52  ;;  %v12297_v52 = vld [vmem:[#allocation7 + $0x14b8] ss:$52 sps:$4 sm:$0xff]  }
 0x287   :  { %7785 = vmatpush1.bf16.msra.mxu0 %v12210_v51  ;;  %v12302_v51 = vld [vmem:[#allocation7 + $0x14c4] ss:$52 sps:$4 sm:$0xff]  }
 0x288   :  { %7786 = vmatprep.subr.bf16.mxu0 %v12218_v53  ;;  %v12300_v53 = vld [vmem:[#allocation7 + $0x14c0] ss:$52 sps:$4 sm:$0xff]  }
 0x28b   :  { %7787 = vmatpush1.bf16.msra.mxu0 %v12216_v55  ;;  %v12305_v55 = vld [vmem:[#allocation7 + $0x1524] ss:$52 sps:$4 sm:$0xff]  }
 0x28c   :  { %7788 = vmatprep.subr.bf16.mxu0 %v12224_v56  ;;  %v12308_v56 = vld [vmem:[#allocation7 + $0x152c] ss:$52 sps:$4 sm:$0xff]  }
 0x28f   :  { %7789 = vmatpush1.bf16.msra.mxu0 %v12222_v57  ;;  %v12303_v57 = vld [vmem:[#allocation7 + $0x1520] ss:$52 sps:$4 sm:$0xff]  }
 0x290   :  { %7790 = vmatprep.subr.bf16.mxu0 %v12230_v59  ;;  %v12306_v59 = vld [vmem:[#allocation7 + $0x1528] ss:$52 sps:$4 sm:$0xff]  }
 0x293   :  { %7791 = vmatpush1.bf16.msra.mxu0 %v12228_v62  ;;  %v12311_v62 = vld [vmem:[#allocation7 + $0x158c] ss:$52 sps:$4 sm:$0xff]  }
 0x294   :  { %7792 = vmatprep.subr.bf16.mxu0 %v12236_v1  ;;  %v12314_v1 = vld [vmem:[#allocation7 + $0x1594] ss:$52 sps:$4 sm:$0xff]  }
 0x297   :  { %7793 = vmatpush1.bf16.msra.mxu0 %v12234_v2  ;;  %v12309_v2 = vld [vmem:[#allocation7 + $0x1588] ss:$52 sps:$4 sm:$0xff]  }
 0x298   :  { %7794 = vmatprep.subr.bf16.mxu0 %v12242_v3  ;;  %v12312_v3 = vld [vmem:[#allocation7 + $0x1590] ss:$52 sps:$4 sm:$0xff]  }
 0x29b   :  { %7795 = vmatpush1.bf16.msra.mxu0 %v12240_v4  ;;  %v12317_v4 = vld [vmem:[#allocation7 + $0x15f4] ss:$52 sps:$4 sm:$0xff]  }
 0x29c   :  { %7796 = vmatprep.subr.bf16.mxu0 %v12248_v6  ;;  %v12320_v6 = vld [vmem:[#allocation7 + $0x15fc] ss:$52 sps:$4 sm:$0xff]  }
 0x29f   :  { %7797 = vmatpush1.bf16.msra.mxu0 %v12246_v7  ;;  %v12315_v7 = vld [vmem:[#allocation7 + $0x15f0] ss:$52 sps:$4 sm:$0xff]  }
 0x2a0   :  { %7798 = vmatprep.subr.bf16.mxu0 %v12254_v8  ;;  %v12318_v8 = vld [vmem:[#allocation7 + $0x15f8] ss:$52 sps:$4 sm:$0xff]  }
 0x2a3   :  { %7799 = vmatpush1.bf16.msra.mxu0 %v12252_v9  ;;  %v12323_v9 = vld [vmem:[#allocation7 + $0x165c] ss:$52 sps:$4 sm:$0xff]  }
 0x2a4   :  { %7800 = vmatprep.subr.bf16.mxu0 %v12260_v11  ;;  %v12326_v11 = vld [vmem:[#allocation7 + $0x1664] ss:$52 sps:$4 sm:$0xff]  }
 0x2a7   :  { %7801 = vmatpush1.bf16.msra.mxu0 %v12258_v12  ;;  %v12321_v12 = vld [vmem:[#allocation7 + $0x1658] ss:$52 sps:$4 sm:$0xff]  }
 0x2a8   :  { %7802 = vmatprep.subr.bf16.mxu0 %v12266_v14  ;;  %v12324_v14 = vld [vmem:[#allocation7 + $0x1660] ss:$52 sps:$4 sm:$0xff]  }
 0x2ab   :  { %7803 = vmatpush1.bf16.msra.mxu0 %v12264_v16  ;;  %v2973_v16 = vmax.f32 %v13544_v19, 0.0  ;;  %v12336_v19 = vld [vmem:[#allocation7 + $0x80] ss:$52 sps:$4 sm:$0xff]  }
 0x2ac   :  { %7804 = vmatprep.subr.bf16.mxu0 %v12272_v17  ;;  %v12329_v17 = vld [vmem:[#allocation7 + $0x14] ss:$52 sps:$4 sm:$0xff]  }
 0x2af   :  { %7805 = vmatpush1.bf16.msra.mxu0 %v12270_v20  ;;  %v12332_v20 = vld [vmem:[#allocation7 + $0x1c] ss:$52 sps:$4 sm:$0xff]  }
 0x2b0   :  { %7806 = vmatprep.subr.bf16.mxu0 %v12278_v21  ;;  %v12327_v21 = vld [vmem:[#allocation7 + $0x10] ss:$52 sps:$4 sm:$0xff]  }
 0x2b3   :  { %7807 = vmatpush1.bf16.msra.mxu0 %v12276_v24  ;;  %v12330_v24 = vld [vmem:[#allocation7 + $0x18] ss:$52 sps:$4 sm:$0xff]  }
 0x2b4   :  { %7817 = vmatprep.subr.bf16.mxu0 %v12284_v22  ;;  %v12335_v22 = vld [vmem:[#allocation7 + $0x7c] ss:$52 sps:$4 sm:$0xff]  }
 0x2c9   :  { %v2800_v48 = vpop.f32.mrb[4].mxu0 }
 0x2ca   :  { %v11359_v28 = vadd.f32 %v2800_v48, %v507_v26  ;;  %v2802_v31 = vpop.f32.mrb[5].mxu0  ;;  %v13565_v26 = vpack.c.bf16 %v2973_v16, %v2973_v16  ;;  %v12341_v48 = vld [vmem:[#allocation7 + $0xe4] ss:$52 sps:$4 sm:$0xff]   ;;  %v12398_v16 = vld [vmem:[#allocation7 + $0x494] ss:$52 sps:$4 sm:$0xff]  }
 0x2cb   :  { %v11360_v36 = vadd.f32 %v2802_v31, %v511_v27  ;;  %v2804_v37 = vpop.f32.mrb[6].mxu0  ;;  %v12333_v27 = vld [vmem:[#allocation7 + $0x78] ss:$52 sps:$4 sm:$0xff]   ;;  %v12339_v31 = vld [vmem:[#allocation7 + $0xe0] ss:$52 sps:$4 sm:$0xff]  }
 0x2cc   :  { %v2971_v38 = vmax.f32 %v11359_v28, 0.0  ;;  %v2805_v39 = vpop.f32.mrb[7].mxu0  ;;  %v12344_v28 = vld [vmem:[#allocation7 + $0xec] ss:$52 sps:$4 sm:$0xff]  }
 0x2cd   :  { %v2972_v40 = vmax.f32 %v11360_v36, 0.0  ;;  %v12342_v36 = vld [vmem:[#allocation7 + $0xe8] ss:$52 sps:$4 sm:$0xff]   ;;  %v12347_v37 = vld [vmem:[#allocation7 + $0x14c] ss:$52 sps:$4 sm:$0xff]  }
 0x2ce   :  { %v13556_v43 = vpack.c.bf16 %v2971_v38, %v2971_v38  ;;  %v12345_v38 = vld [vmem:[#allocation7 + $0x148] ss:$52 sps:$4 sm:$0xff]  }
 0x2cf   :  { %v13554_v5 = vpack.c.bf16 %v2972_v40, %v2972_v40  ;;  %v12350_v39 = vld [vmem:[#allocation7 + $0x154] ss:$52 sps:$4 sm:$0xff]   ;;  %v12348_v40 = vld [vmem:[#allocation7 + $0x150] ss:$52 sps:$4 sm:$0xff]  }
 0x2d1   :  { %7644 = vmatprep.mubr.bf16.mxu1 %v13554_v5  ;;  %7808 = vmatprep.mubr.bf16.mxu0 %v13554_v5 }
 0x2d2   :  { %7645 = vmatmul.mubr.bf16.vlgmr.msra.gmra.mrb[20].mxu1 %v13556_v43  ;;  %7809 = vmatmul.mubr.bf16.vlgmr.msra.gmra.mrb[8].mxu0 %v13556_v43 }
 0x2d3   :  { %7654 = vmatpush1.bf16.msra.mxu1 %v12279_v41  ;;  %7818 = vmatpush1.bf16.msra.mxu0 %v12282_v42  ;;  %v12353_v41 = vld [vmem:[#allocation7 + $0x1b4] ss:$52 sps:$4 sm:$0xff]   ;;  %v12351_v42 = vld [vmem:[#allocation7 + $0x1b0] ss:$52 sps:$4 sm:$0xff]  }
 0x2d4   :  { %7655 = vmatprep.subr.bf16.mxu1 %v12287_v44  ;;  %7819 = vmatprep.subr.bf16.mxu0 %v12290_v10  ;;  %v12356_v44 = vld [vmem:[#allocation7 + $0x1bc] ss:$52 sps:$4 sm:$0xff]   ;;  %v12354_v10 = vld [vmem:[#allocation7 + $0x1b8] ss:$52 sps:$4 sm:$0xff]  }
 0x2d5   :  { %7685 = vmatprep.mubr.bf16.mxu1 %v13310_v23  ;;  %7849 = vmatprep.mubr.bf16.mxu0 %v13310_v23 }
 0x2d7   :  { %7656 = vmatpush1.bf16.msra.mxu1 %v12285_v45  ;;  %7820 = vmatpush1.bf16.msra.mxu0 %v12288_v46  ;;  %v12359_v45 = vld [vmem:[#allocation7 + $0x21c] ss:$52 sps:$4 sm:$0xff]   ;;  %v12357_v46 = vld [vmem:[#allocation7 + $0x218] ss:$52 sps:$4 sm:$0xff]  }
 0x2d8   :  { %7657 = vmatprep.subr.bf16.mxu1 %v12293_v30  ;;  %7821 = vmatprep.subr.bf16.mxu0 %v12296_v47  ;;  %v12362_v30 = vld [vmem:[#allocation7 + $0x224] ss:$52 sps:$4 sm:$0xff]   ;;  %v12360_v47 = vld [vmem:[#allocation7 + $0x220] ss:$52 sps:$4 sm:$0xff]  }
 0x2db   :  { %7658 = vmatpush1.bf16.msra.mxu1 %v12291_v15  ;;  %7822 = vmatpush1.bf16.msra.mxu0 %v12294_v49  ;;  %v12365_v15 = vld [vmem:[#allocation7 + $0x284] ss:$52 sps:$4 sm:$0xff]   ;;  %v12363_v49 = vld [vmem:[#allocation7 + $0x280] ss:$52 sps:$4 sm:$0xff]  }
 0x2dc   :  { %7659 = vmatprep.subr.bf16.mxu1 %v12299_v50  ;;  %7823 = vmatprep.subr.bf16.mxu0 %v12302_v51  ;;  %v12368_v50 = vld [vmem:[#allocation7 + $0x28c] ss:$52 sps:$4 sm:$0xff]   ;;  %v12366_v51 = vld [vmem:[#allocation7 + $0x288] ss:$52 sps:$4 sm:$0xff]  }
 0x2df   :  { %7660 = vmatpush1.bf16.msra.mxu1 %v12297_v52  ;;  %7824 = vmatpush1.bf16.msra.mxu0 %v12300_v53  ;;  %v12371_v52 = vld [vmem:[#allocation7 + $0x2ec] ss:$52 sps:$4 sm:$0xff]   ;;  %v12369_v53 = vld [vmem:[#allocation7 + $0x2e8] ss:$52 sps:$4 sm:$0xff]  }
 0x2e0   :  { %7661 = vmatprep.subr.bf16.mxu1 %v12305_v55  ;;  %7825 = vmatprep.subr.bf16.mxu0 %v12308_v56  ;;  %v12374_v55 = vld [vmem:[#allocation7 + $0x2f4] ss:$52 sps:$4 sm:$0xff]   ;;  %v12372_v56 = vld [vmem:[#allocation7 + $0x2f0] ss:$52 sps:$4 sm:$0xff]  }
 0x2e3   :  { %7662 = vmatpush1.bf16.msra.mxu1 %v12303_v57  ;;  %7826 = vmatpush1.bf16.msra.mxu0 %v12306_v59  ;;  %v12377_v57 = vld [vmem:[#allocation7 + $0x354] ss:$52 sps:$4 sm:$0xff]   ;;  %v12375_v59 = vld [vmem:[#allocation7 + $0x350] ss:$52 sps:$4 sm:$0xff]  }
 0x2e4   :  { %7663 = vmatprep.subr.bf16.mxu1 %v12311_v62  ;;  %7827 = vmatprep.subr.bf16.mxu0 %v12314_v1  ;;  %v12380_v62 = vld [vmem:[#allocation7 + $0x35c] ss:$52 sps:$4 sm:$0xff]   ;;  %v12378_v1 = vld [vmem:[#allocation7 + $0x358] ss:$52 sps:$4 sm:$0xff]  }
 0x2e7   :  { %7664 = vmatpush1.bf16.msra.mxu1 %v12309_v2  ;;  %7828 = vmatpush1.bf16.msra.mxu0 %v12312_v3  ;;  %v12383_v2 = vld [vmem:[#allocation7 + $0x3bc] ss:$52 sps:$4 sm:$0xff]   ;;  %v12381_v3 = vld [vmem:[#allocation7 + $0x3b8] ss:$52 sps:$4 sm:$0xff]  }
 0x2e8   :  { %7665 = vmatprep.subr.bf16.mxu1 %v12317_v4  ;;  %7829 = vmatprep.subr.bf16.mxu0 %v12320_v6  ;;  %v12386_v4 = vld [vmem:[#allocation7 + $0x3c4] ss:$52 sps:$4 sm:$0xff]   ;;  %v12384_v6 = vld [vmem:[#allocation7 + $0x3c0] ss:$52 sps:$4 sm:$0xff]  }
 0x2eb   :  { %7666 = vmatpush1.bf16.msra.mxu1 %v12315_v7  ;;  %7830 = vmatpush1.bf16.msra.mxu0 %v12318_v8  ;;  %v12389_v7 = vld [vmem:[#allocation7 + $0x424] ss:$52 sps:$4 sm:$0xff]   ;;  %v12387_v8 = vld [vmem:[#allocation7 + $0x420] ss:$52 sps:$4 sm:$0xff]  }
 0x2ec   :  { %7667 = vmatprep.subr.bf16.mxu1 %v12323_v9  ;;  %7831 = vmatprep.subr.bf16.mxu0 %v12326_v11  ;;  %v12392_v9 = vld [vmem:[#allocation7 + $0x42c] ss:$52 sps:$4 sm:$0xff]   ;;  %v12390_v11 = vld [vmem:[#allocation7 + $0x428] ss:$52 sps:$4 sm:$0xff]  }
 0x2ef   :  { %7668 = vmatpush1.bf16.msra.mxu1 %v12321_v12  ;;  %7832 = vmatpush1.bf16.msra.mxu0 %v12324_v14  ;;  %v12395_v12 = vld [vmem:[#allocation7 + $0x48c] ss:$52 sps:$4 sm:$0xff]   ;;  %v12393_v14 = vld [vmem:[#allocation7 + $0x488] ss:$52 sps:$4 sm:$0xff]  }
 0x2f0   :  { %7858 = vmatprep.subr.bf16.mxu1 %v12329_v17  ;;  %8022 = vmatprep.subr.bf16.mxu0 %v12332_v20  ;;  %v12396_v17 = vld [vmem:[#allocation7 + $0x490] ss:$52 sps:$4 sm:$0xff]   ;;  %v12401_v20 = vld [vmem:[#allocation7 + $0x4f4] ss:$52 sps:$4 sm:$0xff]  }
 0x2f2   :  { %7686 = vmatmul.mubr.bf16.vlgmr.msra.gmra.mrb[20].mxu1 %v13565_v26  ;;  %7850 = vmatmul.mubr.bf16.vlgmr.msra.gmra.mrb[8].mxu0 %v13565_v26 }
 0x2f3   :  { %7859 = vmatpush1.bf16.msra.mxu1 %v12327_v21  ;;  %7890 = vmatprep.mubr.bf16.mxu1 %v13513_v54  ;;  %v12399_v21 = vld [vmem:[#allocation7 + $0x4f0] ss:$52 sps:$4 sm:$0xff]  }
 0x2f4   :  { %8023 = vmatpush1.bf16.msra.mxu0 %v12330_v24  ;;  %8054 = vmatprep.mubr.bf16.mxu0 %v13513_v54  ;;  %v12404_v24 = vld [vmem:[#allocation7 + $0x4fc] ss:$52 sps:$4 sm:$0xff]  }
 0x2f5   :  { %7860 = vmatprep.subr.bf16.mxu1 %v12335_v22  ;;  %8024 = vmatprep.subr.bf16.mxu0 %v12338_v25  ;;  %v12402_v22 = vld [vmem:[#allocation7 + $0x4f8] ss:$52 sps:$4 sm:$0xff]   ;;  %v12407_v25 = vld [vmem:[#allocation7 + $0x55c] ss:$52 sps:$4 sm:$0xff]  }
 0x2f7   :  { %7861 = vmatpush1.bf16.msra.mxu1 %v12333_v27  ;;  %v12405_v27 = vld [vmem:[#allocation7 + $0x558] ss:$52 sps:$4 sm:$0xff]  }
 0x2f8   :  { %8025 = vmatpush1.bf16.msra.mxu0 %v12336_v19  ;;  %7862 = vmatprep.subr.bf16.mxu1 %v12341_v48  ;;  %v12410_v19 = vld [vmem:[#allocation7 + $0x564] ss:$52 sps:$4 sm:$0xff]   ;;  %v12408_v48 = vld [vmem:[#allocation7 + $0x560] ss:$52 sps:$4 sm:$0xff]  }
 0x2f9   :  { %8026 = vmatprep.subr.bf16.mxu0 %v12344_v28  ;;  %v12413_v28 = vld [vmem:[#allocation7 + $0x5c4] ss:$52 sps:$4 sm:$0xff]  }
 0x2fb   :  { %7863 = vmatpush1.bf16.msra.mxu1 %v12339_v31  ;;  %v12416_v31 = vld [vmem:[#allocation7 + $0x5cc] ss:$52 sps:$4 sm:$0xff]  }
 0x2fc   :  { %8027 = vmatpush1.bf16.msra.mxu0 %v12342_v36  ;;  %7864 = vmatprep.subr.bf16.mxu1 %v12347_v37  ;;  %v12411_v36 = vld [vmem:[#allocation7 + $0x5c0] ss:$52 sps:$4 sm:$0xff]   ;;  %v12414_v37 = vld [vmem:[#allocation7 + $0x5c8] ss:$52 sps:$4 sm:$0xff]  }
 0x2fd   :  { %8028 = vmatprep.subr.bf16.mxu0 %v12350_v39  ;;  %v12422_v39 = vld [vmem:[#allocation7 + $0x634] ss:$52 sps:$4 sm:$0xff]  }
 0x2ff   :  { %7865 = vmatpush1.bf16.msra.mxu1 %v12345_v38  ;;  %v12419_v38 = vld [vmem:[#allocation7 + $0x62c] ss:$52 sps:$4 sm:$0xff]  }
 0x300   :  { %8029 = vmatpush1.bf16.msra.mxu0 %v12348_v40  ;;  %7866 = vmatprep.subr.bf16.mxu1 %v12353_v41  ;;  %v12417_v40 = vld [vmem:[#allocation7 + $0x628] ss:$52 sps:$4 sm:$0xff]   ;;  %v12420_v41 = vld [vmem:[#allocation7 + $0x630] ss:$52 sps:$4 sm:$0xff]  }
 0x301   :  { %8030 = vmatprep.subr.bf16.mxu0 %v12356_v44  ;;  %v12428_v44 = vld [vmem:[#allocation7 + $0x69c] ss:$52 sps:$4 sm:$0xff]  }
 0x303   :  { %7867 = vmatpush1.bf16.msra.mxu1 %v12351_v42  ;;  %v12425_v42 = vld [vmem:[#allocation7 + $0x694] ss:$52 sps:$4 sm:$0xff]  }
 0x304   :  { %8031 = vmatpush1.bf16.msra.mxu0 %v12354_v10  ;;  %7868 = vmatprep.subr.bf16.mxu1 %v12359_v45  ;;  %v12423_v10 = vld [vmem:[#allocation7 + $0x690] ss:$52 sps:$4 sm:$0xff]   ;;  %v12426_v45 = vld [vmem:[#allocation7 + $0x698] ss:$52 sps:$4 sm:$0xff]  }
 0x305   :  { %8032 = vmatprep.subr.bf16.mxu0 %v12362_v30  ;;  %v12434_v30 = vld [vmem:[#allocation7 + $0x704] ss:$52 sps:$4 sm:$0xff]  }
 0x307   :  { %7869 = vmatpush1.bf16.msra.mxu1 %v12357_v46  ;;  %v12431_v46 = vld [vmem:[#allocation7 + $0x6fc] ss:$52 sps:$4 sm:$0xff]  }
 0x308   :  { %8033 = vmatpush1.bf16.msra.mxu0 %v12360_v47  ;;  %7870 = vmatprep.subr.bf16.mxu1 %v12365_v15  ;;  %v12429_v47 = vld [vmem:[#allocation7 + $0x6f8] ss:$52 sps:$4 sm:$0xff]   ;;  %v12432_v15 = vld [vmem:[#allocation7 + $0x700] ss:$52 sps:$4 sm:$0xff]  }
 0x309   :  { %8034 = vmatprep.subr.bf16.mxu0 %v12368_v50  ;;  %v12440_v50 = vld [vmem:[#allocation7 + $0x76c] ss:$52 sps:$4 sm:$0xff]  }
 0x30b   :  { %7871 = vmatpush1.bf16.msra.mxu1 %v12363_v49  ;;  %v12437_v49 = vld [vmem:[#allocation7 + $0x764] ss:$52 sps:$4 sm:$0xff]  }
 0x30c   :  { %8035 = vmatpush1.bf16.msra.mxu0 %v12366_v51  ;;  %7872 = vmatprep.subr.bf16.mxu1 %v12371_v52  ;;  %v12435_v51 = vld [vmem:[#allocation7 + $0x760] ss:$52 sps:$4 sm:$0xff]   ;;  %v12438_v52 = vld [vmem:[#allocation7 + $0x768] ss:$52 sps:$4 sm:$0xff]  }
 0x30d   :  { %8036 = vmatprep.subr.bf16.mxu0 %v12374_v55  ;;  %v12446_v55 = vld [vmem:[#allocation7 + $0x7d4] ss:$52 sps:$4 sm:$0xff]  }
 0x30f   :  { %7873 = vmatpush1.bf16.msra.mxu1 %v12369_v53  ;;  %v12443_v53 = vld [vmem:[#allocation7 + $0x7cc] ss:$52 sps:$4 sm:$0xff]  }
 0x310   :  { %8037 = vmatpush1.bf16.msra.mxu0 %v12372_v56  ;;  %7874 = vmatprep.subr.bf16.mxu1 %v12377_v57  ;;  %v12441_v56 = vld [vmem:[#allocation7 + $0x7c8] ss:$52 sps:$4 sm:$0xff]   ;;  %v12444_v57 = vld [vmem:[#allocation7 + $0x7d0] ss:$52 sps:$4 sm:$0xff]  }
 0x311   :  { %8038 = vmatprep.subr.bf16.mxu0 %v12380_v62  ;;  %v12452_v62 = vld [vmem:[#allocation7 + $0x83c] ss:$52 sps:$4 sm:$0xff]  }
 0x313   :  { %7875 = vmatpush1.bf16.msra.mxu1 %v12375_v59  ;;  %v12449_v59 = vld [vmem:[#allocation7 + $0x834] ss:$52 sps:$4 sm:$0xff]  }
 0x314   :  { %8039 = vmatpush1.bf16.msra.mxu0 %v12378_v1  ;;  %7876 = vmatprep.subr.bf16.mxu1 %v12383_v2  ;;  %v12447_v1 = vld [vmem:[#allocation7 + $0x830] ss:$52 sps:$4 sm:$0xff]   ;;  %v12450_v2 = vld [vmem:[#allocation7 + $0x838] ss:$52 sps:$4 sm:$0xff]  }
 0x315   :  { %8040 = vmatprep.subr.bf16.mxu0 %v12386_v4  ;;  %v12458_v4 = vld [vmem:[#allocation7 + $0x8a4] ss:$52 sps:$4 sm:$0xff]  }
 0x317   :  { %7877 = vmatpush1.bf16.msra.mxu1 %v12381_v3  ;;  %v12455_v3 = vld [vmem:[#allocation7 + $0x89c] ss:$52 sps:$4 sm:$0xff]  }
 0x318   :  { %8041 = vmatpush1.bf16.msra.mxu0 %v12384_v6  ;;  %7878 = vmatprep.subr.bf16.mxu1 %v12389_v7  ;;  %v12453_v6 = vld [vmem:[#allocation7 + $0x898] ss:$52 sps:$4 sm:$0xff]   ;;  %v12456_v7 = vld [vmem:[#allocation7 + $0x8a0] ss:$52 sps:$4 sm:$0xff]  }
 0x319   :  { %8042 = vmatprep.subr.bf16.mxu0 %v12392_v9  ;;  %v12464_v9 = vld [vmem:[#allocation7 + $0x90c] ss:$52 sps:$4 sm:$0xff]  }
 0x31b   :  { %7879 = vmatpush1.bf16.msra.mxu1 %v12387_v8  ;;  %v12461_v8 = vld [vmem:[#allocation7 + $0x904] ss:$52 sps:$4 sm:$0xff]  }
 0x31c   :  { %8043 = vmatpush1.bf16.msra.mxu0 %v12390_v11  ;;  %7880 = vmatprep.subr.bf16.mxu1 %v12395_v12  ;;  %v12459_v11 = vld [vmem:[#allocation7 + $0x900] ss:$52 sps:$4 sm:$0xff]   ;;  %v12462_v12 = vld [vmem:[#allocation7 + $0x908] ss:$52 sps:$4 sm:$0xff]  }
 0x31d   :  { %8044 = vmatprep.subr.bf16.mxu0 %v12398_v16  ;;  %v12470_v16 = vld [vmem:[#allocation7 + $0x974] ss:$52 sps:$4 sm:$0xff]  }
 0x31f   :  { %7881 = vmatpush1.bf16.msra.mxu1 %v12393_v14  ;;  %v12467_v14 = vld [vmem:[#allocation7 + $0x96c] ss:$52 sps:$4 sm:$0xff]  }
 0x320   :  { %8045 = vmatpush1.bf16.msra.mxu0 %v12396_v17  ;;  %7882 = vmatprep.subr.bf16.mxu1 %v12401_v20  ;;  %v12465_v17 = vld [vmem:[#allocation7 + $0x968] ss:$52 sps:$4 sm:$0xff]   ;;  %v12468_v20 = vld [vmem:[#allocation7 + $0x970] ss:$52 sps:$4 sm:$0xff]  }
 0x321   :  { %8046 = vmatprep.subr.bf16.mxu0 %v12404_v24  ;;  %v12476_v24 = vld [vmem:[#allocation7 + $0x9dc] ss:$52 sps:$4 sm:$0xff]  }
 0x323   :  { %7883 = vmatpush1.bf16.msra.mxu1 %v12399_v21  ;;  %v12473_v21 = vld [vmem:[#allocation7 + $0x9d4] ss:$52 sps:$4 sm:$0xff]  }
 0x324   :  { %8047 = vmatpush1.bf16.msra.mxu0 %v12402_v22  ;;  %7884 = vmatprep.subr.bf16.mxu1 %v12407_v25  ;;  %v12471_v22 = vld [vmem:[#allocation7 + $0x9d0] ss:$52 sps:$4 sm:$0xff]   ;;  %v12474_v25 = vld [vmem:[#allocation7 + $0x9d8] ss:$52 sps:$4 sm:$0xff]  }
 0x325   :  { %8048 = vmatprep.subr.bf16.mxu0 %v12410_v19  ;;  %v12482_v19 = vld [vmem:[#allocation7 + $0xa44] ss:$52 sps:$4 sm:$0xff]  }
 0x327   :  { %7885 = vmatpush1.bf16.msra.mxu1 %v12405_v27  ;;  %v12479_v27 = vld [vmem:[#allocation7 + $0xa3c] ss:$52 sps:$4 sm:$0xff]  }
 0x328   :  { %8049 = vmatpush1.bf16.msra.mxu0 %v12408_v48  ;;  %7886 = vmatprep.subr.bf16.mxu1 %v12413_v28  ;;  %v12477_v48 = vld [vmem:[#allocation7 + $0xa38] ss:$52 sps:$4 sm:$0xff]   ;;  %v12480_v28 = vld [vmem:[#allocation7 + $0xa40] ss:$52 sps:$4 sm:$0xff]  }
 0x329   :  { %8050 = vmatprep.subr.bf16.mxu0 %v12416_v31  ;;  %v12485_v31 = vld [vmem:[#allocation7 + $0xaa4] ss:$52 sps:$4 sm:$0xff]  }
 0x32b   :  { %7887 = vmatpush1.bf16.msra.mxu1 %v12411_v36  ;;  %v12488_v36 = vld [vmem:[#allocation7 + $0xaac] ss:$52 sps:$4 sm:$0xff]  }
 0x32c   :  { %8051 = vmatpush1.bf16.msra.mxu0 %v12414_v37  ;;  %7888 = vmatprep.subr.bf16.mxu1 %v12419_v38  ;;  %v12483_v37 = vld [vmem:[#allocation7 + $0xaa0] ss:$52 sps:$4 sm:$0xff]   ;;  %v12486_v38 = vld [vmem:[#allocation7 + $0xaa8] ss:$52 sps:$4 sm:$0xff]  }
 0x32d   :  { %8052 = vmatprep.subr.bf16.mxu0 %v12422_v39  ;;  %v12491_v39 = vld [vmem:[#allocation7 + $0xb0c] ss:$52 sps:$4 sm:$0xff]  }
 0x32f   :  { %7889 = vmatpush1.bf16.msra.mxu1 %v12417_v40  ;;  %v12494_v40 = vld [vmem:[#allocation7 + $0xb14] ss:$52 sps:$4 sm:$0xff]  }
 0x330   :  { %8053 = vmatpush1.bf16.msra.mxu0 %v12420_v41  ;;  %7899 = vmatprep.subr.bf16.mxu1 %v12425_v42  ;;  %v12489_v41 = vld [vmem:[#allocation7 + $0xb08] ss:$52 sps:$4 sm:$0xff]   ;;  %v12492_v42 = vld [vmem:[#allocation7 + $0xb10] ss:$52 sps:$4 sm:$0xff]  }
 0x331   :  { %8063 = vmatprep.subr.bf16.mxu0 %v12428_v44  ;;  %v12497_v44 = vld [vmem:[#allocation7 + $0xb74] ss:$52 sps:$4 sm:$0xff]  }
 0x332   :  { %7891 = vmatmul.mubr.bf16.vlgmr.msra.gmra.mrb[24].mxu1 %v13515_v58 }
 0x333   :  { %8055 = vmatmul.mubr.bf16.vlgmr.msra.gmra.mrb[12].mxu0 %v13515_v58  ;;  %7900 = vmatpush1.bf16.msra.mxu1 %v12423_v10  ;;  %v12500_v10 = vld [vmem:[#allocation7 + $0xb7c] ss:$52 sps:$4 sm:$0xff]  }
 0x334   :  { %7931 = vmatprep.mubr.bf16.mxu1 %v13519_v60  ;;  %8064 = vmatpush1.bf16.msra.mxu0 %v12426_v45  ;;  %v12495_v45 = vld [vmem:[#allocation7 + $0xb70] ss:$52 sps:$4 sm:$0xff]  }
 0x335   :  { %8095 = vmatprep.mubr.bf16.mxu0 %v13519_v60  ;;  %7901 = vmatprep.subr.bf16.mxu1 %v12431_v46  ;;  %v12498_v46 = vld [vmem:[#allocation7 + $0xb78] ss:$52 sps:$4 sm:$0xff]  }
 0x336   :  { %8065 = vmatprep.subr.bf16.mxu0 %v12434_v30  ;;  %v12503_v30 = vld [vmem:[#allocation7 + $0xbdc] ss:$52 sps:$4 sm:$0xff]  }
 0x337   :  { %7902 = vmatpush1.bf16.msra.mxu1 %v12429_v47  ;;  %v12506_v47 = vld [vmem:[#allocation7 + $0xbe4] ss:$52 sps:$4 sm:$0xff]  }
 0x338   :  { %8066 = vmatpush1.bf16.msra.mxu0 %v12432_v15  ;;  %7903 = vmatprep.subr.bf16.mxu1 %v12437_v49  ;;  %v12501_v15 = vld [vmem:[#allocation7 + $0xbd8] ss:$52 sps:$4 sm:$0xff]   ;;  %v12504_v49 = vld [vmem:[#allocation7 + $0xbe0] ss:$52 sps:$4 sm:$0xff]  }
 0x339   :  { %8067 = vmatprep.subr.bf16.mxu0 %v12440_v50  ;;  %v12509_v50 = vld [vmem:[#allocation7 + $0xc44] ss:$52 sps:$4 sm:$0xff]  }
 0x33b   :  { %7904 = vmatpush1.bf16.msra.mxu1 %v12435_v51  ;;  %v12512_v51 = vld [vmem:[#allocation7 + $0xc4c] ss:$52 sps:$4 sm:$0xff]  }
 0x33c   :  { %8068 = vmatpush1.bf16.msra.mxu0 %v12438_v52  ;;  %7905 = vmatprep.subr.bf16.mxu1 %v12443_v53  ;;  %v12507_v52 = vld [vmem:[#allocation7 + $0xc40] ss:$52 sps:$4 sm:$0xff]   ;;  %v12510_v53 = vld [vmem:[#allocation7 + $0xc48] ss:$52 sps:$4 sm:$0xff]  }
 0x33d   :  { %8069 = vmatprep.subr.bf16.mxu0 %v12446_v55  ;;  %v12515_v55 = vld [vmem:[#allocation7 + $0xcac] ss:$52 sps:$4 sm:$0xff]  }
 0x33f   :  { %7906 = vmatpush1.bf16.msra.mxu1 %v12441_v56  ;;  %v12518_v56 = vld [vmem:[#allocation7 + $0xcb4] ss:$52 sps:$4 sm:$0xff]  }
 0x340   :  { %8070 = vmatpush1.bf16.msra.mxu0 %v12444_v57  ;;  %7907 = vmatprep.subr.bf16.mxu1 %v12449_v59  ;;  %v12513_v57 = vld [vmem:[#allocation7 + $0xca8] ss:$52 sps:$4 sm:$0xff]   ;;  %v12516_v59 = vld [vmem:[#allocation7 + $0xcb0] ss:$52 sps:$4 sm:$0xff]  }
 0x341   :  { %8071 = vmatprep.subr.bf16.mxu0 %v12452_v62  ;;  %v12521_v62 = vld [vmem:[#allocation7 + $0xd14] ss:$52 sps:$4 sm:$0xff]  }
 0x343   :  { %7908 = vmatpush1.bf16.msra.mxu1 %v12447_v1  ;;  %v12524_v1 = vld [vmem:[#allocation7 + $0xd1c] ss:$52 sps:$4 sm:$0xff]  }
 0x344   :  { %8072 = vmatpush1.bf16.msra.mxu0 %v12450_v2  ;;  %7909 = vmatprep.subr.bf16.mxu1 %v12455_v3  ;;  %v12519_v2 = vld [vmem:[#allocation7 + $0xd10] ss:$52 sps:$4 sm:$0xff]   ;;  %v12522_v3 = vld [vmem:[#allocation7 + $0xd18] ss:$52 sps:$4 sm:$0xff]  }
 0x345   :  { %8073 = vmatprep.subr.bf16.mxu0 %v12458_v4  ;;  %v12527_v4 = vld [vmem:[#allocation7 + $0xd7c] ss:$52 sps:$4 sm:$0xff]  }
 0x347   :  { %7910 = vmatpush1.bf16.msra.mxu1 %v12453_v6  ;;  %v12530_v6 = vld [vmem:[#allocation7 + $0xd84] ss:$52 sps:$4 sm:$0xff]  }
 0x348   :  { %8074 = vmatpush1.bf16.msra.mxu0 %v12456_v7  ;;  %7911 = vmatprep.subr.bf16.mxu1 %v12461_v8  ;;  %v12525_v7 = vld [vmem:[#allocation7 + $0xd78] ss:$52 sps:$4 sm:$0xff]   ;;  %v12528_v8 = vld [vmem:[#allocation7 + $0xd80] ss:$52 sps:$4 sm:$0xff]  }
 0x349   :  { %8075 = vmatprep.subr.bf16.mxu0 %v12464_v9  ;;  %v12533_v9 = vld [vmem:[#allocation7 + $0xde4] ss:$52 sps:$4 sm:$0xff]  }
 0x34b   :  { %7912 = vmatpush1.bf16.msra.mxu1 %v12459_v11  ;;  %v12536_v11 = vld [vmem:[#allocation7 + $0xdec] ss:$52 sps:$4 sm:$0xff]  }
 0x34c   :  { %8076 = vmatpush1.bf16.msra.mxu0 %v12462_v12  ;;  %7913 = vmatprep.subr.bf16.mxu1 %v12467_v14  ;;  %v12531_v12 = vld [vmem:[#allocation7 + $0xde0] ss:$52 sps:$4 sm:$0xff]   ;;  %v12534_v14 = vld [vmem:[#allocation7 + $0xde8] ss:$52 sps:$4 sm:$0xff]  }
 0x34d   :  { %8077 = vmatprep.subr.bf16.mxu0 %v12470_v16  ;;  %v12539_v16 = vld [vmem:[#allocation7 + $0xe4c] ss:$52 sps:$4 sm:$0xff]  }
 0x34f   :  { %7914 = vmatpush1.bf16.msra.mxu1 %v12465_v17  ;;  %v12542_v17 = vld [vmem:[#allocation7 + $0xe54] ss:$52 sps:$4 sm:$0xff]  }
 0x350   :  { %8078 = vmatpush1.bf16.msra.mxu0 %v12468_v20  ;;  %7915 = vmatprep.subr.bf16.mxu1 %v12473_v21  ;;  %v12537_v20 = vld [vmem:[#allocation7 + $0xe48] ss:$52 sps:$4 sm:$0xff]   ;;  %v12540_v21 = vld [vmem:[#allocation7 + $0xe50] ss:$52 sps:$4 sm:$0xff]  }
 0x351   :  { %8079 = vmatprep.subr.bf16.mxu0 %v12476_v24  ;;  %v12545_v24 = vld [vmem:[#allocation7 + $0xeb4] ss:$52 sps:$4 sm:$0xff]  }
 0x353   :  { %7916 = vmatpush1.bf16.msra.mxu1 %v12471_v22  ;;  %v12548_v22 = vld [vmem:[#allocation7 + $0xebc] ss:$52 sps:$4 sm:$0xff]  }
 0x354   :  { %8080 = vmatpush1.bf16.msra.mxu0 %v12474_v25  ;;  %7917 = vmatprep.subr.bf16.mxu1 %v12479_v27  ;;  %v12543_v25 = vld [vmem:[#allocation7 + $0xeb0] ss:$52 sps:$4 sm:$0xff]   ;;  %v12546_v27 = vld [vmem:[#allocation7 + $0xeb8] ss:$52 sps:$4 sm:$0xff]  }
 0x355   :  { %8081 = vmatprep.subr.bf16.mxu0 %v12482_v19  ;;  %v12551_v19 = vld [vmem:[#allocation7 + $0xf1c] ss:$52 sps:$4 sm:$0xff]  }
 0x357   :  { %7918 = vmatpush1.bf16.msra.mxu1 %v12477_v48  ;;  %v12554_v48 = vld [vmem:[#allocation7 + $0xf24] ss:$52 sps:$4 sm:$0xff]  }
 0x358   :  { %8082 = vmatpush1.bf16.msra.mxu0 %v12480_v28  ;;  %7919 = vmatprep.subr.bf16.mxu1 %v12485_v31  ;;  %v12549_v28 = vld [vmem:[#allocation7 + $0xf18] ss:$52 sps:$4 sm:$0xff]   ;;  %v12552_v31 = vld [vmem:[#allocation7 + $0xf20] ss:$52 sps:$4 sm:$0xff]  }
 0x359   :  { %8083 = vmatprep.subr.bf16.mxu0 %v12488_v36  ;;  %v12557_v36 = vld [vmem:[#allocation7 + $0xf84] ss:$52 sps:$4 sm:$0xff]  }
 0x35b   :  { %7920 = vmatpush1.bf16.msra.mxu1 %v12483_v37  ;;  %v12560_v37 = vld [vmem:[#allocation7 + $0xf8c] ss:$52 sps:$4 sm:$0xff]  }
 0x35c   :  { %8084 = vmatpush1.bf16.msra.mxu0 %v12486_v38  ;;  %7921 = vmatprep.subr.bf16.mxu1 %v12491_v39  ;;  %v12555_v38 = vld [vmem:[#allocation7 + $0xf80] ss:$52 sps:$4 sm:$0xff]   ;;  %v12558_v39 = vld [vmem:[#allocation7 + $0xf88] ss:$52 sps:$4 sm:$0xff]  }
 0x35d   :  { %8085 = vmatprep.subr.bf16.mxu0 %v12494_v40  ;;  %v12563_v40 = vld [vmem:[#allocation7 + $0xfec] ss:$52 sps:$4 sm:$0xff]  }
 0x35f   :  { %7922 = vmatpush1.bf16.msra.mxu1 %v12489_v41  ;;  %v12566_v41 = vld [vmem:[#allocation7 + $0xff4] ss:$52 sps:$4 sm:$0xff]  }
 0x360   :  { %8086 = vmatpush1.bf16.msra.mxu0 %v12492_v42  ;;  %7923 = vmatprep.subr.bf16.mxu1 %v12497_v44  ;;  %v12561_v42 = vld [vmem:[#allocation7 + $0xfe8] ss:$52 sps:$4 sm:$0xff]   ;;  %v12564_v44 = vld [vmem:[#allocation7 + $0xff0] ss:$52 sps:$4 sm:$0xff]  }
 0x361   :  { %8087 = vmatprep.subr.bf16.mxu0 %v12500_v10  ;;  %v12569_v10 = vld [vmem:[#allocation7 + $0x1054] ss:$52 sps:$4 sm:$0xff]  }
 0x363   :  { %7924 = vmatpush1.bf16.msra.mxu1 %v12495_v45  ;;  %v12572_v45 = vld [vmem:[#allocation7 + $0x105c] ss:$52 sps:$4 sm:$0xff]  }
 0x364   :  { %8088 = vmatpush1.bf16.msra.mxu0 %v12498_v46  ;;  %7925 = vmatprep.subr.bf16.mxu1 %v12503_v30  ;;  %v12567_v46 = vld [vmem:[#allocation7 + $0x1050] ss:$52 sps:$4 sm:$0xff]   ;;  %v12570_v30 = vld [vmem:[#allocation7 + $0x1058] ss:$52 sps:$4 sm:$0xff]  }
 0x365   :  { %8089 = vmatprep.subr.bf16.mxu0 %v12506_v47  ;;  %v12575_v47 = vld [vmem:[#allocation7 + $0x10bc] ss:$52 sps:$4 sm:$0xff]  }
 0x367   :  { %7926 = vmatpush1.bf16.msra.mxu1 %v12501_v15  ;;  %v12578_v15 = vld [vmem:[#allocation7 + $0x10c4] ss:$52 sps:$4 sm:$0xff]  }
 0x368   :  { %8090 = vmatpush1.bf16.msra.mxu0 %v12504_v49  ;;  %7927 = vmatprep.subr.bf16.mxu1 %v12509_v50  ;;  %v12573_v49 = vld [vmem:[#allocation7 + $0x10b8] ss:$52 sps:$4 sm:$0xff]   ;;  %v12576_v50 = vld [vmem:[#allocation7 + $0x10c0] ss:$52 sps:$4 sm:$0xff]  }
 0x369   :  { %8091 = vmatprep.subr.bf16.mxu0 %v12512_v51  ;;  %v12581_v51 = vld [vmem:[#allocation7 + $0x1124] ss:$52 sps:$4 sm:$0xff]  }
 0x36b   :  { %7928 = vmatpush1.bf16.msra.mxu1 %v12507_v52  ;;  %v12584_v52 = vld [vmem:[#allocation7 + $0x112c] ss:$52 sps:$4 sm:$0xff]  }
 0x36c   :  { %8092 = vmatpush1.bf16.msra.mxu0 %v12510_v53  ;;  %7929 = vmatprep.subr.bf16.mxu1 %v12515_v55  ;;  %v12579_v53 = vld [vmem:[#allocation7 + $0x1120] ss:$52 sps:$4 sm:$0xff]   ;;  %v12582_v55 = vld [vmem:[#allocation7 + $0x1128] ss:$52 sps:$4 sm:$0xff]  }
 0x36d   :  { %8093 = vmatprep.subr.bf16.mxu0 %v12518_v56  ;;  %v12587_v56 = vld [vmem:[#allocation7 + $0x118c] ss:$52 sps:$4 sm:$0xff]  }
 0x36f   :  { %7930 = vmatpush1.bf16.msra.mxu1 %v12513_v57  ;;  %v12590_v57 = vld [vmem:[#allocation7 + $0x1194] ss:$52 sps:$4 sm:$0xff]  }
 0x370   :  { %8094 = vmatpush1.bf16.msra.mxu0 %v12516_v59  ;;  %7940 = vmatprep.subr.bf16.mxu1 %v12521_v62  ;;  %v12585_v59 = vld [vmem:[#allocation7 + $0x1188] ss:$52 sps:$4 sm:$0xff]   ;;  %v12588_v62 = vld [vmem:[#allocation7 + $0x1190] ss:$52 sps:$4 sm:$0xff]  }
 0x371   :  { %8104 = vmatprep.subr.bf16.mxu0 %v12524_v1  ;;  %v12593_v1 = vld [vmem:[#allocation7 + $0x11f4] ss:$52 sps:$4 sm:$0xff]  }
 0x372   :  { %7932 = vmatmul.mubr.bf16.vlgmr.msra.gmra.mrb[24].mxu1 %v13540_v18 }
 0x373   :  { %8096 = vmatmul.mubr.bf16.vlgmr.msra.gmra.mrb[12].mxu0 %v13540_v18  ;;  %7941 = vmatpush1.bf16.msra.mxu1 %v12519_v2  ;;  %v12596_v2 = vld [vmem:[#allocation7 + $0x11fc] ss:$52 sps:$4 sm:$0xff]  }
 0x374   :  { %7972 = vmatprep.mubr.bf16.mxu1 %v13554_v5  ;;  %8105 = vmatpush1.bf16.msra.mxu0 %v12522_v3  ;;  %v12591_v3 = vld [vmem:[#allocation7 + $0x11f0] ss:$52 sps:$4 sm:$0xff]  }
 0x375   :  { %8136 = vmatprep.mubr.bf16.mxu0 %v13554_v5  ;;  %7942 = vmatprep.subr.bf16.mxu1 %v12527_v4  ;;  %v12594_v4 = vld [vmem:[#allocation7 + $0x11f8] ss:$52 sps:$4 sm:$0xff]  }
 0x376   :  { %8106 = vmatprep.subr.bf16.mxu0 %v12530_v6  ;;  %v12599_v6 = vld [vmem:[#allocation7 + $0x125c] ss:$52 sps:$4 sm:$0xff]  }
 0x377   :  { %7943 = vmatpush1.bf16.msra.mxu1 %v12525_v7  ;;  %v12602_v7 = vld [vmem:[#allocation7 + $0x1264] ss:$52 sps:$4 sm:$0xff]  }
 0x378   :  { %8107 = vmatpush1.bf16.msra.mxu0 %v12528_v8  ;;  %7944 = vmatprep.subr.bf16.mxu1 %v12533_v9  ;;  %v12597_v8 = vld [vmem:[#allocation7 + $0x1258] ss:$52 sps:$4 sm:$0xff]   ;;  %v12600_v9 = vld [vmem:[#allocation7 + $0x1260] ss:$52 sps:$4 sm:$0xff]  }
 0x379   :  { %8108 = vmatprep.subr.bf16.mxu0 %v12536_v11  ;;  %v12605_v11 = vld [vmem:[#allocation7 + $0x12c4] ss:$52 sps:$4 sm:$0xff]  }
 0x37b   :  { %7945 = vmatpush1.bf16.msra.mxu1 %v12531_v12  ;;  %v12608_v12 = vld [vmem:[#allocation7 + $0x12cc] ss:$52 sps:$4 sm:$0xff]  }
 0x37c   :  { %8109 = vmatpush1.bf16.msra.mxu0 %v12534_v14  ;;  %7946 = vmatprep.subr.bf16.mxu1 %v12539_v16  ;;  %v12603_v14 = vld [vmem:[#allocation7 + $0x12c0] ss:$52 sps:$4 sm:$0xff]   ;;  %v12606_v16 = vld [vmem:[#allocation7 + $0x12c8] ss:$52 sps:$4 sm:$0xff]  }
 0x37d   :  { %8110 = vmatprep.subr.bf16.mxu0 %v12542_v17  ;;  %v12611_v17 = vld [vmem:[#allocation7 + $0x132c] ss:$52 sps:$4 sm:$0xff]  }
 0x37f   :  { %7947 = vmatpush1.bf16.msra.mxu1 %v12537_v20  ;;  %v12614_v20 = vld [vmem:[#allocation7 + $0x1334] ss:$52 sps:$4 sm:$0xff]  }
 0x380   :  { %8111 = vmatpush1.bf16.msra.mxu0 %v12540_v21  ;;  %7948 = vmatprep.subr.bf16.mxu1 %v12545_v24  ;;  %v12609_v21 = vld [vmem:[#allocation7 + $0x1328] ss:$52 sps:$4 sm:$0xff]   ;;  %v12612_v24 = vld [vmem:[#allocation7 + $0x1330] ss:$52 sps:$4 sm:$0xff]  }
 0x381   :  { %8112 = vmatprep.subr.bf16.mxu0 %v12548_v22  ;;  %v12617_v22 = vld [vmem:[#allocation7 + $0x1394] ss:$52 sps:$4 sm:$0xff]  }
 0x383   :  { %7949 = vmatpush1.bf16.msra.mxu1 %v12543_v25  ;;  %v12620_v25 = vld [vmem:[#allocation7 + $0x139c] ss:$52 sps:$4 sm:$0xff]  }
 0x384   :  { %8113 = vmatpush1.bf16.msra.mxu0 %v12546_v27  ;;  %7950 = vmatprep.subr.bf16.mxu1 %v12551_v19  ;;  %v12615_v27 = vld [vmem:[#allocation7 + $0x1390] ss:$52 sps:$4 sm:$0xff]   ;;  %v12618_v19 = vld [vmem:[#allocation7 + $0x1398] ss:$52 sps:$4 sm:$0xff]  }
 0x385   :  { %8114 = vmatprep.subr.bf16.mxu0 %v12554_v48  ;;  %v12623_v48 = vld [vmem:[#allocation7 + $0x13fc] ss:$52 sps:$4 sm:$0xff]  }
 0x387   :  { %7951 = vmatpush1.bf16.msra.mxu1 %v12549_v28  ;;  %v12626_v28 = vld [vmem:[#allocation7 + $0x1404] ss:$52 sps:$4 sm:$0xff]  }
 0x388   :  { %8115 = vmatpush1.bf16.msra.mxu0 %v12552_v31  ;;  %7952 = vmatprep.subr.bf16.mxu1 %v12557_v36  ;;  %v12621_v31 = vld [vmem:[#allocation7 + $0x13f8] ss:$52 sps:$4 sm:$0xff]   ;;  %v12624_v36 = vld [vmem:[#allocation7 + $0x1400] ss:$52 sps:$4 sm:$0xff]  }
 0x389   :  { %8116 = vmatprep.subr.bf16.mxu0 %v12560_v37  ;;  %v12629_v37 = vld [vmem:[#allocation7 + $0x1464] ss:$52 sps:$4 sm:$0xff]  }
 0x38b   :  { %7953 = vmatpush1.bf16.msra.mxu1 %v12555_v38  ;;  %v12632_v38 = vld [vmem:[#allocation7 + $0x146c] ss:$52 sps:$4 sm:$0xff]  }
 0x38c   :  { %8117 = vmatpush1.bf16.msra.mxu0 %v12558_v39  ;;  %7954 = vmatprep.subr.bf16.mxu1 %v12563_v40  ;;  %v12627_v39 = vld [vmem:[#allocation7 + $0x1460] ss:$52 sps:$4 sm:$0xff]   ;;  %v12630_v40 = vld [vmem:[#allocation7 + $0x1468] ss:$52 sps:$4 sm:$0xff]  }
 0x38d   :  { %8118 = vmatprep.subr.bf16.mxu0 %v12566_v41  ;;  %v12635_v41 = vld [vmem:[#allocation7 + $0x14cc] ss:$52 sps:$4 sm:$0xff]  }
 0x38f   :  { %7955 = vmatpush1.bf16.msra.mxu1 %v12561_v42  ;;  %v12638_v42 = vld [vmem:[#allocation7 + $0x14d4] ss:$52 sps:$4 sm:$0xff]  }
 0x390   :  { %8119 = vmatpush1.bf16.msra.mxu0 %v12564_v44  ;;  %7956 = vmatprep.subr.bf16.mxu1 %v12569_v10  ;;  %v12633_v44 = vld [vmem:[#allocation7 + $0x14c8] ss:$52 sps:$4 sm:$0xff]   ;;  %v12636_v10 = vld [vmem:[#allocation7 + $0x14d0] ss:$52 sps:$4 sm:$0xff]  }
 0x391   :  { %8120 = vmatprep.subr.bf16.mxu0 %v12572_v45  ;;  %v12641_v45 = vld [vmem:[#allocation7 + $0x1534] ss:$52 sps:$4 sm:$0xff]  }
 0x393   :  { %7957 = vmatpush1.bf16.msra.mxu1 %v12567_v46  ;;  %v12644_v46 = vld [vmem:[#allocation7 + $0x153c] ss:$52 sps:$4 sm:$0xff]  }
 0x394   :  { %8121 = vmatpush1.bf16.msra.mxu0 %v12570_v30  ;;  %7958 = vmatprep.subr.bf16.mxu1 %v12575_v47  ;;  %v12639_v30 = vld [vmem:[#allocation7 + $0x1530] ss:$52 sps:$4 sm:$0xff]   ;;  %v12642_v47 = vld [vmem:[#allocation7 + $0x1538] ss:$52 sps:$4 sm:$0xff]  }
 0x395   :  { %8122 = vmatprep.subr.bf16.mxu0 %v12578_v15  ;;  %v12647_v15 = vld [vmem:[#allocation7 + $0x159c] ss:$52 sps:$4 sm:$0xff]  }
 0x397   :  { %7959 = vmatpush1.bf16.msra.mxu1 %v12573_v49  ;;  %v12650_v49 = vld [vmem:[#allocation7 + $0x15a4] ss:$52 sps:$4 sm:$0xff]  }
 0x398   :  { %8123 = vmatpush1.bf16.msra.mxu0 %v12576_v50  ;;  %7960 = vmatprep.subr.bf16.mxu1 %v12581_v51  ;;  %v12645_v50 = vld [vmem:[#allocation7 + $0x1598] ss:$52 sps:$4 sm:$0xff]   ;;  %v12648_v51 = vld [vmem:[#allocation7 + $0x15a0] ss:$52 sps:$4 sm:$0xff]  }
 0x399   :  { %8124 = vmatprep.subr.bf16.mxu0 %v12584_v52  ;;  %v12653_v52 = vld [vmem:[#allocation7 + $0x1604] ss:$52 sps:$4 sm:$0xff]  }
 0x39b   :  { %7961 = vmatpush1.bf16.msra.mxu1 %v12579_v53 }
 0x39c   :  { %8125 = vmatpush1.bf16.msra.mxu0 %v12582_v55  ;;  %7962 = vmatprep.subr.bf16.mxu1 %v12587_v56  ;;  %v12656_v56 = vld [vmem:[#allocation7 + $0x160c] ss:$52 sps:$4 sm:$0xff]  }
 0x39d   :  { %8126 = vmatprep.subr.bf16.mxu0 %v12590_v57 }
 0x39f   :  { %7963 = vmatpush1.bf16.msra.mxu1 %v12585_v59 }
 0x3a0   :  { %8127 = vmatpush1.bf16.msra.mxu0 %v12588_v62  ;;  %7964 = vmatprep.subr.bf16.mxu1 %v12593_v1 }
 0x3a1   :  { %8128 = vmatprep.subr.bf16.mxu0 %v12596_v2  ;;  %v12651_v2 = vld [vmem:[#allocation7 + $0x1600] ss:$52 sps:$4 sm:$0xff]  }
 0x3a3   :  { %7965 = vmatpush1.bf16.msra.mxu1 %v12591_v3 }
 0x3a4   :  { %8129 = vmatpush1.bf16.msra.mxu0 %v12594_v4  ;;  %7966 = vmatprep.subr.bf16.mxu1 %v12599_v6  ;;  %v12654_v6 = vld [vmem:[#allocation7 + $0x1608] ss:$52 sps:$4 sm:$0xff]  }
 0x3a5   :  { %8130 = vmatprep.subr.bf16.mxu0 %v12602_v7  ;;  %v12659_v7 = vld [vmem:[#allocation7 + $0x166c] ss:$52 sps:$4 sm:$0xff]  }
 0x3a7   :  { %7967 = vmatpush1.bf16.msra.mxu1 %v12597_v8  ;;  %v12662_v8 = vld [vmem:[#allocation7 + $0x1674] ss:$52 sps:$4 sm:$0xff]  }
 0x3a8   :  { %8131 = vmatpush1.bf16.msra.mxu0 %v12600_v9  ;;  %7968 = vmatprep.subr.bf16.mxu1 %v12605_v11  ;;  %v12657_v9 = vld [vmem:[#allocation7 + $0x1668] ss:$52 sps:$4 sm:$0xff]   ;;  %v12660_v11 = vld [vmem:[#allocation7 + $0x1670] ss:$52 sps:$4 sm:$0xff]  }
 0x3a9   :  { %8132 = vmatprep.subr.bf16.mxu0 %v12608_v12  ;;  %v12665_v12 = vld [vmem:[#allocation7 + $0x24] ss:$52 sps:$4 sm:$0xff]  }
 0x3ab   :  { %7969 = vmatpush1.bf16.msra.mxu1 %v12603_v14  ;;  %v12668_v14 = vld [vmem:[#allocation7 + $0x2c] ss:$52 sps:$4 sm:$0xff]  }
 0x3ac   :  { %8133 = vmatpush1.bf16.msra.mxu0 %v12606_v16  ;;  %7970 = vmatprep.subr.bf16.mxu1 %v12611_v17  ;;  %v12663_v16 = vld [vmem:[#allocation7 + $0x20] ss:$52 sps:$4 sm:$0xff]   ;;  %v12666_v17 = vld [vmem:[#allocation7 + $0x28] ss:$52 sps:$4 sm:$0xff]  }
 0x3ad   :  { %8134 = vmatprep.subr.bf16.mxu0 %v12614_v20  ;;  %v12671_v20 = vld [vmem:[#allocation7 + $0x8c] ss:$52 sps:$4 sm:$0xff]  }
 0x3af   :  { %7971 = vmatpush1.bf16.msra.mxu1 %v12609_v21  ;;  %v12674_v21 = vld [vmem:[#allocation7 + $0x94] ss:$52 sps:$4 sm:$0xff]  }
 0x3b0   :  { %8135 = vmatpush1.bf16.msra.mxu0 %v12612_v24  ;;  %7981 = vmatprep.subr.bf16.mxu1 %v12617_v22  ;;  %v12669_v24 = vld [vmem:[#allocation7 + $0x88] ss:$52 sps:$4 sm:$0xff]   ;;  %v12672_v22 = vld [vmem:[#allocation7 + $0x90] ss:$52 sps:$4 sm:$0xff]  }
 0x3b1   :  { %8145 = vmatprep.subr.bf16.mxu0 %v12620_v25  ;;  %v12677_v25 = vld [vmem:[#allocation7 + $0xf4] ss:$52 sps:$4 sm:$0xff]  }
 0x3b2   :  { %7973 = vmatmul.mubr.bf16.vlgmr.msra.gmra.mrb[24].mxu1 %v13556_v43 }
 0x3b3   :  { %8137 = vmatmul.mubr.bf16.vlgmr.msra.gmra.mrb[12].mxu0 %v13556_v43  ;;  %7982 = vmatpush1.bf16.msra.mxu1 %v12615_v27  ;;  %v12680_v27 = vld [vmem:[#allocation7 + $0xfc] ss:$52 sps:$4 sm:$0xff]  }
 0x3b4   :  { %8146 = vmatpush1.bf16.msra.mxu0 %v12618_v19  ;;  %7983 = vmatprep.subr.bf16.mxu1 %v12623_v48  ;;  %v12675_v19 = vld [vmem:[#allocation7 + $0xf0] ss:$52 sps:$4 sm:$0xff]   ;;  %v12678_v48 = vld [vmem:[#allocation7 + $0xf8] ss:$52 sps:$4 sm:$0xff]  }
 0x3b5   :  { %8147 = vmatprep.subr.bf16.mxu0 %v12626_v28  ;;  %8013 = vmatprep.mubr.bf16.mxu1 %v13310_v23  ;;  %v12683_v28 = vld [vmem:[#allocation7 + $0x15c] ss:$52 sps:$4 sm:$0xff]  }
 0x3b6   :  { %8177 = vmatprep.mubr.bf16.mxu0 %v13310_v23 }
 0x3b7   :  { %7984 = vmatpush1.bf16.msra.mxu1 %v12621_v31  ;;  %v12686_v31 = vld [vmem:[#allocation7 + $0x164] ss:$52 sps:$4 sm:$0xff]  }
 0x3b8   :  { %8148 = vmatpush1.bf16.msra.mxu0 %v12624_v36  ;;  %7985 = vmatprep.subr.bf16.mxu1 %v12629_v37  ;;  %v12681_v36 = vld [vmem:[#allocation7 + $0x158] ss:$52 sps:$4 sm:$0xff]   ;;  %v12684_v37 = vld [vmem:[#allocation7 + $0x160] ss:$52 sps:$4 sm:$0xff]  }
 0x3b9   :  { %8149 = vmatprep.subr.bf16.mxu0 %v12632_v38  ;;  %v12689_v38 = vld [vmem:[#allocation7 + $0x1c4] ss:$52 sps:$4 sm:$0xff]  }
 0x3bb   :  { %7986 = vmatpush1.bf16.msra.mxu1 %v12627_v39  ;;  %v12692_v39 = vld [vmem:[#allocation7 + $0x1cc] ss:$52 sps:$4 sm:$0xff]  }
 0x3bc   :  { %8150 = vmatpush1.bf16.msra.mxu0 %v12630_v40  ;;  %7987 = vmatprep.subr.bf16.mxu1 %v12635_v41  ;;  %v12687_v40 = vld [vmem:[#allocation7 + $0x1c0] ss:$52 sps:$4 sm:$0xff]   ;;  %v12690_v41 = vld [vmem:[#allocation7 + $0x1c8] ss:$52 sps:$4 sm:$0xff]  }
 0x3bd   :  { %8151 = vmatprep.subr.bf16.mxu0 %v12638_v42  ;;  %v12695_v42 = vld [vmem:[#allocation7 + $0x22c] ss:$52 sps:$4 sm:$0xff]  }
 0x3bf   :  { %7988 = vmatpush1.bf16.msra.mxu1 %v12633_v44  ;;  %v12698_v44 = vld [vmem:[#allocation7 + $0x234] ss:$52 sps:$4 sm:$0xff]  }
 0x3c0   :  { %8152 = vmatpush1.bf16.msra.mxu0 %v12636_v10  ;;  %7989 = vmatprep.subr.bf16.mxu1 %v12641_v45  ;;  %v12693_v10 = vld [vmem:[#allocation7 + $0x228] ss:$52 sps:$4 sm:$0xff]   ;;  %v12696_v45 = vld [vmem:[#allocation7 + $0x230] ss:$52 sps:$4 sm:$0xff]  }
 0x3c1   :  { %8153 = vmatprep.subr.bf16.mxu0 %v12644_v46  ;;  %v12701_v46 = vld [vmem:[#allocation7 + $0x294] ss:$52 sps:$4 sm:$0xff]  }
 0x3c3   :  { %7990 = vmatpush1.bf16.msra.mxu1 %v12639_v30  ;;  %v12704_v30 = vld [vmem:[#allocation7 + $0x29c] ss:$52 sps:$4 sm:$0xff]  }
 0x3c4   :  { %8154 = vmatpush1.bf16.msra.mxu0 %v12642_v47  ;;  %7991 = vmatprep.subr.bf16.mxu1 %v12647_v15  ;;  %v12699_v47 = vld [vmem:[#allocation7 + $0x290] ss:$52 sps:$4 sm:$0xff]   ;;  %v12702_v15 = vld [vmem:[#allocation7 + $0x298] ss:$52 sps:$4 sm:$0xff]  }
 0x3c5   :  { %v13583_v53 = vpop.f32.mrb[20].mxu1  ;;  %v13585_v55 = vpop.f32.mrb[8].mxu0  ;;  %8155 = vmatprep.subr.bf16.mxu0 %v12650_v49  ;;  %v12707_v49 = vld [vmem:[#allocation7 + $0x2fc] ss:$52 sps:$4 sm:$0xff]  }
 0x3c6   :  { %v13587_v57 = vpop.f32.mrb[21].mxu1  ;;  %v13589_v59 = vpop.f32.mrb[9].mxu0 }
 0x3c7   :  { %v7691_v62 = vpop.f32.mrb[22].mxu1  ;;  %v7855_v1 = vpop.f32.mrb[10].mxu0  ;;  %7992 = vmatpush1.bf16.msra.mxu1 %v12645_v50  ;;  %v12710_v50 = vld [vmem:[#allocation7 + $0x304] ss:$52 sps:$4 sm:$0xff]  }
 0x3c8   :  { %8156 = vmatpush1.bf16.msra.mxu0 %v12648_v51  ;;  %v7692_v3 = vpop.f32.mrb[23].mxu1  ;;  %v7856_v4 = vpop.f32.mrb[11].mxu0  ;;  %7993 = vmatprep.subr.bf16.mxu1 %v12653_v52  ;;  %v12705_v51 = vld [vmem:[#allocation7 + $0x2f8] ss:$52 sps:$4 sm:$0xff]   ;;  %v12708_v52 = vld [vmem:[#allocation7 + $0x300] ss:$52 sps:$4 sm:$0xff]  }
 0x3c9   :  { %8157 = vmatprep.subr.bf16.mxu0 %v12656_v56  ;;  %v12713_v56 = vld [vmem:[#allocation7 + $0x364] ss:$52 sps:$4 sm:$0xff]   ;;  %v12716_v62 = vld [vmem:[#allocation7 + $0x36c] ss:$52 sps:$4 sm:$0xff]   ;;  %v12722_v4 = vld [vmem:[#allocation7 + $0x3d4] ss:$52 sps:$4 sm:$0xff]  }
 0x3ca   :  { %v12711_v1 = vld [vmem:[#allocation7 + $0x360] ss:$52 sps:$4 sm:$0xff]  }
 0x3cb   :  { %7994 = vmatpush1.bf16.msra.mxu1 %v12651_v2  ;;  %v12714_v2 = vld [vmem:[#allocation7 + $0x368] ss:$52 sps:$4 sm:$0xff]   ;;  %v12719_v3 = vld [vmem:[#allocation7 + $0x3cc] ss:$52 sps:$4 sm:$0xff]  }
 0x3cc   :  { %8158 = vmatpush1.bf16.msra.mxu0 %v12654_v6  ;;  %7995 = vmatprep.subr.bf16.mxu1 %v12659_v7  ;;  %v12717_v6 = vld [vmem:[#allocation7 + $0x3c8] ss:$52 sps:$4 sm:$0xff]   ;;  %v12720_v7 = vld [vmem:[#allocation7 + $0x3d0] ss:$52 sps:$4 sm:$0xff]  }
 0x3cd   :  { %8159 = vmatprep.subr.bf16.mxu0 %v12662_v8  ;;  %v12725_v8 = vld [vmem:[#allocation7 + $0x434] ss:$52 sps:$4 sm:$0xff]  }
 0x3cf   :  { %7996 = vmatpush1.bf16.msra.mxu1 %v12657_v9  ;;  %v12728_v9 = vld [vmem:[#allocation7 + $0x43c] ss:$52 sps:$4 sm:$0xff]  }
 0x3d0   :  { %8160 = vmatpush1.bf16.msra.mxu0 %v12660_v11  ;;  %8186 = vmatprep.subr.bf16.mxu1 %v12665_v12  ;;  %v12723_v11 = vld [vmem:[#allocation7 + $0x430] ss:$52 sps:$4 sm:$0xff]   ;;  %v12726_v12 = vld [vmem:[#allocation7 + $0x438] ss:$52 sps:$4 sm:$0xff]  }
 0x3d1   :  { %8350 = vmatprep.subr.bf16.mxu0 %v12668_v14  ;;  %v12731_v14 = vld [vmem:[#allocation7 + $0x49c] ss:$52 sps:$4 sm:$0xff]  }
 0x3d2   :  { %8014 = vmatmul.mubr.bf16.vlgmr.msra.gmra.mrb[24].mxu1 %v13565_v26 }
 0x3d3   :  { %8178 = vmatmul.mubr.bf16.vlgmr.msra.gmra.mrb[12].mxu0 %v13565_v26  ;;  %8187 = vmatpush1.bf16.msra.mxu1 %v12663_v16  ;;  %v12734_v16 = vld [vmem:[#allocation7 + $0x4a4] ss:$52 sps:$4 sm:$0xff]  }
 0x3d4   :  { %8218 = vmatprep.mubr.bf16.mxu1 %v13513_v54  ;;  %8351 = vmatpush1.bf16.msra.mxu0 %v12666_v17  ;;  %v12729_v17 = vld [vmem:[#allocation7 + $0x498] ss:$52 sps:$4 sm:$0xff]  }
 0x3d5   :  { %8382 = vmatprep.mubr.bf16.mxu0 %v13513_v54  ;;  %8188 = vmatprep.subr.bf16.mxu1 %v12671_v20  ;;  %v12732_v20 = vld [vmem:[#allocation7 + $0x4a0] ss:$52 sps:$4 sm:$0xff]  }
 0x3d6   :  { %8352 = vmatprep.subr.bf16.mxu0 %v12674_v21  ;;  %v12737_v21 = vld [vmem:[#allocation7 + $0x504] ss:$52 sps:$4 sm:$0xff]  }
 0x3d7   :  { %8189 = vmatpush1.bf16.msra.mxu1 %v12669_v24  ;;  %v12740_v24 = vld [vmem:[#allocation7 + $0x50c] ss:$52 sps:$4 sm:$0xff]  }
 0x3d8   :  { %8353 = vmatpush1.bf16.msra.mxu0 %v12672_v22  ;;  %8190 = vmatprep.subr.bf16.mxu1 %v12677_v25  ;;  %v12735_v22 = vld [vmem:[#allocation7 + $0x500] ss:$52 sps:$4 sm:$0xff]   ;;  %v12738_v25 = vld [vmem:[#allocation7 + $0x508] ss:$52 sps:$4 sm:$0xff]  }
 0x3d9   :  { %8354 = vmatprep.subr.bf16.mxu0 %v12680_v27  ;;  %v12743_v27 = vld [vmem:[#allocation7 + $0x56c] ss:$52 sps:$4 sm:$0xff]  }
 0x3db   :  { %8191 = vmatpush1.bf16.msra.mxu1 %v12675_v19  ;;  %v12746_v19 = vld [vmem:[#allocation7 + $0x574] ss:$52 sps:$4 sm:$0xff]  }
 0x3dc   :  { %8355 = vmatpush1.bf16.msra.mxu0 %v12678_v48  ;;  %8192 = vmatprep.subr.bf16.mxu1 %v12683_v28  ;;  %v12741_v48 = vld [vmem:[#allocation7 + $0x568] ss:$52 sps:$4 sm:$0xff]   ;;  %v12744_v28 = vld [vmem:[#allocation7 + $0x570] ss:$52 sps:$4 sm:$0xff]  }
 0x3dd   :  { %8356 = vmatprep.subr.bf16.mxu0 %v12686_v31  ;;  %v12749_v31 = vld [vmem:[#allocation7 + $0x5d4] ss:$52 sps:$4 sm:$0xff]  }
 0x3df   :  { %8193 = vmatpush1.bf16.msra.mxu1 %v12681_v36  ;;  %v12752_v36 = vld [vmem:[#allocation7 + $0x5dc] ss:$52 sps:$4 sm:$0xff]  }
 0x3e0   :  { %8357 = vmatpush1.bf16.msra.mxu0 %v12684_v37  ;;  %8194 = vmatprep.subr.bf16.mxu1 %v12689_v38  ;;  %v12747_v37 = vld [vmem:[#allocation7 + $0x5d0] ss:$52 sps:$4 sm:$0xff]   ;;  %v12750_v38 = vld [vmem:[#allocation7 + $0x5d8] ss:$52 sps:$4 sm:$0xff]  }
 0x3e1   :  { %8358 = vmatprep.subr.bf16.mxu0 %v12692_v39  ;;  %v12755_v39 = vld [vmem:[#allocation7 + $0x63c] ss:$52 sps:$4 sm:$0xff]  }
 0x3e3   :  { %8195 = vmatpush1.bf16.msra.mxu1 %v12687_v40  ;;  %v12758_v40 = vld [vmem:[#allocation7 + $0x644] ss:$52 sps:$4 sm:$0xff]  }
 0x3e4   :  { %8359 = vmatpush1.bf16.msra.mxu0 %v12690_v41  ;;  %8196 = vmatprep.subr.bf16.mxu1 %v12695_v42  ;;  %v12753_v41 = vld [vmem:[#allocation7 + $0x638] ss:$52 sps:$4 sm:$0xff]   ;;  %v12756_v42 = vld [vmem:[#allocation7 + $0x640] ss:$52 sps:$4 sm:$0xff]  }
 0x3e5   :  { %8360 = vmatprep.subr.bf16.mxu0 %v12698_v44  ;;  %v12761_v44 = vld [vmem:[#allocation7 + $0x6a4] ss:$52 sps:$4 sm:$0xff]  }
 0x3e7   :  { %8197 = vmatpush1.bf16.msra.mxu1 %v12693_v10  ;;  %v12764_v10 = vld [vmem:[#allocation7 + $0x6ac] ss:$52 sps:$4 sm:$0xff]  }
 0x3e8   :  { %8361 = vmatpush1.bf16.msra.mxu0 %v12696_v45  ;;  %8198 = vmatprep.subr.bf16.mxu1 %v12701_v46  ;;  %v12759_v45 = vld [vmem:[#allocation7 + $0x6a0] ss:$52 sps:$4 sm:$0xff]   ;;  %v12762_v46 = vld [vmem:[#allocation7 + $0x6a8] ss:$52 sps:$4 sm:$0xff]  }
 0x3e9   :  { %8362 = vmatprep.subr.bf16.mxu0 %v12704_v30  ;;  %v12767_v30 = vld [vmem:[#allocation7 + $0x70c] ss:$52 sps:$4 sm:$0xff]  }
 0x3eb   :  { %8199 = vmatpush1.bf16.msra.mxu1 %v12699_v47  ;;  %v12770_v47 = vld [vmem:[#allocation7 + $0x714] ss:$52 sps:$4 sm:$0xff]  }
 0x3ec   :  { %8363 = vmatpush1.bf16.msra.mxu0 %v12702_v15  ;;  %8200 = vmatprep.subr.bf16.mxu1 %v12707_v49  ;;  %v12765_v15 = vld [vmem:[#allocation7 + $0x708] ss:$52 sps:$4 sm:$0xff]   ;;  %v12768_v49 = vld [vmem:[#allocation7 + $0x710] ss:$52 sps:$4 sm:$0xff]  }
 0x3ed   :  { %8364 = vmatprep.subr.bf16.mxu0 %v12710_v50  ;;  %v12773_v50 = vld [vmem:[#allocation7 + $0x774] ss:$52 sps:$4 sm:$0xff]  }
 0x3ef   :  { %8201 = vmatpush1.bf16.msra.mxu1 %v12705_v51  ;;  %v12776_v51 = vld [vmem:[#allocation7 + $0x77c] ss:$52 sps:$4 sm:$0xff]  }
 0x3f0   :  { %8365 = vmatpush1.bf16.msra.mxu0 %v12708_v52  ;;  %8202 = vmatprep.subr.bf16.mxu1 %v12713_v56  ;;  %v12771_v52 = vld [vmem:[#allocation7 + $0x770] ss:$52 sps:$4 sm:$0xff]   ;;  %v12774_v56 = vld [vmem:[#allocation7 + $0x778] ss:$52 sps:$4 sm:$0xff]  }
 0x3f1   :  { %8366 = vmatprep.subr.bf16.mxu0 %v12716_v62  ;;  %v12779_v62 = vld [vmem:[#allocation7 + $0x7dc] ss:$52 sps:$4 sm:$0xff]  }
 0x3f3   :  { %8203 = vmatpush1.bf16.msra.mxu1 %v12711_v1  ;;  %v12782_v1 = vld [vmem:[#allocation7 + $0x7e4] ss:$52 sps:$4 sm:$0xff]  }
 0x3f4   :  { %8367 = vmatpush1.bf16.msra.mxu0 %v12714_v2  ;;  %8204 = vmatprep.subr.bf16.mxu1 %v12719_v3  ;;  %v12777_v2 = vld [vmem:[#allocation7 + $0x7d8] ss:$52 sps:$4 sm:$0xff]   ;;  %v12780_v3 = vld [vmem:[#allocation7 + $0x7e0] ss:$52 sps:$4 sm:$0xff]  }
 0x3f5   :  { %8368 = vmatprep.subr.bf16.mxu0 %v12722_v4  ;;  %v12785_v4 = vld [vmem:[#allocation7 + $0x844] ss:$52 sps:$4 sm:$0xff]  }
 0x3f7   :  { %8205 = vmatpush1.bf16.msra.mxu1 %v12717_v6  ;;  %v12788_v6 = vld [vmem:[#allocation7 + $0x84c] ss:$52 sps:$4 sm:$0xff]  }
 0x3f8   :  { %8369 = vmatpush1.bf16.msra.mxu0 %v12720_v7  ;;  %8206 = vmatprep.subr.bf16.mxu1 %v12725_v8  ;;  %v12783_v7 = vld [vmem:[#allocation7 + $0x840] ss:$52 sps:$4 sm:$0xff]   ;;  %v12786_v8 = vld [vmem:[#allocation7 + $0x848] ss:$52 sps:$4 sm:$0xff]  }
 0x3f9   :  { %8370 = vmatprep.subr.bf16.mxu0 %v12728_v9  ;;  %v12791_v9 = vld [vmem:[#allocation7 + $0x8ac] ss:$52 sps:$4 sm:$0xff]  }
 0x3fb   :  { %8207 = vmatpush1.bf16.msra.mxu1 %v12723_v11  ;;  %v12794_v11 = vld [vmem:[#allocation7 + $0x8b4] ss:$52 sps:$4 sm:$0xff]  }
 0x3fc   :  { %8371 = vmatpush1.bf16.msra.mxu0 %v12726_v12  ;;  %8208 = vmatprep.subr.bf16.mxu1 %v12731_v14  ;;  %v12789_v12 = vld [vmem:[#allocation7 + $0x8a8] ss:$52 sps:$4 sm:$0xff]   ;;  %v12792_v14 = vld [vmem:[#allocation7 + $0x8b0] ss:$52 sps:$4 sm:$0xff]  }
 0x3fd   :  { %8372 = vmatprep.subr.bf16.mxu0 %v12734_v16  ;;  %v12797_v16 = vld [vmem:[#allocation7 + $0x914] ss:$52 sps:$4 sm:$0xff]  }
 0x3ff   :  { %8209 = vmatpush1.bf16.msra.mxu1 %v12729_v17  ;;  %v12800_v17 = vld [vmem:[#allocation7 + $0x91c] ss:$52 sps:$4 sm:$0xff]  }
 0x400   :  { %8373 = vmatpush1.bf16.msra.mxu0 %v12732_v20  ;;  %8210 = vmatprep.subr.bf16.mxu1 %v12737_v21  ;;  %v12795_v20 = vld [vmem:[#allocation7 + $0x910] ss:$52 sps:$4 sm:$0xff]   ;;  %v12798_v21 = vld [vmem:[#allocation7 + $0x918] ss:$52 sps:$4 sm:$0xff]  }
 0x401   :  { %8374 = vmatprep.subr.bf16.mxu0 %v12740_v24  ;;  %v12803_v24 = vld [vmem:[#allocation7 + $0x97c] ss:$52 sps:$4 sm:$0xff]  }
 0x403   :  { %8211 = vmatpush1.bf16.msra.mxu1 %v12735_v22  ;;  %v12806_v22 = vld [vmem:[#allocation7 + $0x984] ss:$52 sps:$4 sm:$0xff]  }
 0x404   :  { %8375 = vmatpush1.bf16.msra.mxu0 %v12738_v25  ;;  %8212 = vmatprep.subr.bf16.mxu1 %v12743_v27  ;;  %v12801_v25 = vld [vmem:[#allocation7 + $0x978] ss:$52 sps:$4 sm:$0xff]   ;;  %v12804_v27 = vld [vmem:[#allocation7 + $0x980] ss:$52 sps:$4 sm:$0xff]  }
 0x405   :  { %8376 = vmatprep.subr.bf16.mxu0 %v12746_v19  ;;  %v12809_v19 = vld [vmem:[#allocation7 + $0x9e4] ss:$52 sps:$4 sm:$0xff]  }
 0x407   :  { %8213 = vmatpush1.bf16.msra.mxu1 %v12741_v48  ;;  %v12812_v48 = vld [vmem:[#allocation7 + $0x9ec] ss:$52 sps:$4 sm:$0xff]  }
 0x408   :  { %8377 = vmatpush1.bf16.msra.mxu0 %v12744_v28  ;;  %8214 = vmatprep.subr.bf16.mxu1 %v12749_v31  ;;  %v12807_v28 = vld [vmem:[#allocation7 + $0x9e0] ss:$52 sps:$4 sm:$0xff]   ;;  %v12810_v31 = vld [vmem:[#allocation7 + $0x9e8] ss:$52 sps:$4 sm:$0xff]  }
 0x409   :  { %8378 = vmatprep.subr.bf16.mxu0 %v12752_v36  ;;  %v12815_v36 = vld [vmem:[#allocation7 + $0xa4c] ss:$52 sps:$4 sm:$0xff]  }
 0x40b   :  { %8215 = vmatpush1.bf16.msra.mxu1 %v12747_v37  ;;  %v12818_v37 = vld [vmem:[#allocation7 + $0xa54] ss:$52 sps:$4 sm:$0xff]  }
 0x40c   :  { %8379 = vmatpush1.bf16.msra.mxu0 %v12750_v38  ;;  %8216 = vmatprep.subr.bf16.mxu1 %v12755_v39  ;;  %v12813_v38 = vld [vmem:[#allocation7 + $0xa48] ss:$52 sps:$4 sm:$0xff]   ;;  %v12816_v39 = vld [vmem:[#allocation7 + $0xa50] ss:$52 sps:$4 sm:$0xff]  }
 0x40d   :  { %8380 = vmatprep.subr.bf16.mxu0 %v12758_v40  ;;  %v12821_v40 = vld [vmem:[#allocation7 + $0xab4] ss:$52 sps:$4 sm:$0xff]  }
 0x40f   :  { %8217 = vmatpush1.bf16.msra.mxu1 %v12753_v41  ;;  %v12824_v41 = vld [vmem:[#allocation7 + $0xabc] ss:$52 sps:$4 sm:$0xff]  }
 0x410   :  { %8381 = vmatpush1.bf16.msra.mxu0 %v12756_v42  ;;  %8227 = vmatprep.subr.bf16.mxu1 %v12761_v44  ;;  %v12819_v42 = vld [vmem:[#allocation7 + $0xab0] ss:$52 sps:$4 sm:$0xff]   ;;  %v12822_v44 = vld [vmem:[#allocation7 + $0xab8] ss:$52 sps:$4 sm:$0xff]  }
 0x411   :  { %8391 = vmatprep.subr.bf16.mxu0 %v12764_v10  ;;  %v12827_v10 = vld [vmem:[#allocation7 + $0xb1c] ss:$52 sps:$4 sm:$0xff]  }
 0x412   :  { %8219 = vmatmul.mubr.bf16.vlgmr.msra.gmra.mrb[28].mxu1 %v13515_v58 }
 0x413   :  { %8383 = vmatmul.mubr.bf16.vlgmr.msra.gmra.mrb[16].mxu0 %v13515_v58  ;;  %8228 = vmatpush1.bf16.msra.mxu1 %v12759_v45  ;;  %v12830_v45 = vld [vmem:[#allocation7 + $0xb24] ss:$52 sps:$4 sm:$0xff]  }
 0x414   :  { %8259 = vmatprep.mubr.bf16.mxu1 %v13519_v60  ;;  %8392 = vmatpush1.bf16.msra.mxu0 %v12762_v46  ;;  %v12825_v46 = vld [vmem:[#allocation7 + $0xb18] ss:$52 sps:$4 sm:$0xff]  }
 0x415   :  { %8423 = vmatprep.mubr.bf16.mxu0 %v13519_v60  ;;  %8229 = vmatprep.subr.bf16.mxu1 %v12767_v30  ;;  %v12828_v30 = vld [vmem:[#allocation7 + $0xb20] ss:$52 sps:$4 sm:$0xff]  }
 0x416   :  { %8393 = vmatprep.subr.bf16.mxu0 %v12770_v47  ;;  %v12833_v47 = vld [vmem:[#allocation7 + $0xb84] ss:$52 sps:$4 sm:$0xff]  }
 0x417   :  { %8230 = vmatpush1.bf16.msra.mxu1 %v12765_v15  ;;  %v12836_v15 = vld [vmem:[#allocation7 + $0xb8c] ss:$52 sps:$4 sm:$0xff]  }
 0x418   :  { %8394 = vmatpush1.bf16.msra.mxu0 %v12768_v49  ;;  %8231 = vmatprep.subr.bf16.mxu1 %v12773_v50  ;;  %v12831_v49 = vld [vmem:[#allocation7 + $0xb80] ss:$52 sps:$4 sm:$0xff]   ;;  %v12834_v50 = vld [vmem:[#allocation7 + $0xb88] ss:$52 sps:$4 sm:$0xff]  }
 0x419   :  { %8395 = vmatprep.subr.bf16.mxu0 %v12776_v51  ;;  %v12839_v51 = vld [vmem:[#allocation7 + $0xbec] ss:$52 sps:$4 sm:$0xff]  }
 0x41b   :  { %8232 = vmatpush1.bf16.msra.mxu1 %v12771_v52  ;;  %v12842_v52 = vld [vmem:[#allocation7 + $0xbf4] ss:$52 sps:$4 sm:$0xff]  }
 0x41c   :  { %8396 = vmatpush1.bf16.msra.mxu0 %v12774_v56  ;;  %8233 = vmatprep.subr.bf16.mxu1 %v12779_v62  ;;  %v12837_v56 = vld [vmem:[#allocation7 + $0xbe8] ss:$52 sps:$4 sm:$0xff]   ;;  %v12840_v62 = vld [vmem:[#allocation7 + $0xbf0] ss:$52 sps:$4 sm:$0xff]  }
 0x41d   :  { %8397 = vmatprep.subr.bf16.mxu0 %v12782_v1  ;;  %v12845_v1 = vld [vmem:[#allocation7 + $0xc54] ss:$52 sps:$4 sm:$0xff]  }
 0x41f   :  { %8234 = vmatpush1.bf16.msra.mxu1 %v12777_v2  ;;  %v12848_v2 = vld [vmem:[#allocation7 + $0xc5c] ss:$52 sps:$4 sm:$0xff]  }
 0x420   :  { %8398 = vmatpush1.bf16.msra.mxu0 %v12780_v3  ;;  %8235 = vmatprep.subr.bf16.mxu1 %v12785_v4  ;;  %v12843_v3 = vld [vmem:[#allocation7 + $0xc50] ss:$52 sps:$4 sm:$0xff]   ;;  %v12846_v4 = vld [vmem:[#allocation7 + $0xc58] ss:$52 sps:$4 sm:$0xff]  }
 0x421   :  { %8399 = vmatprep.subr.bf16.mxu0 %v12788_v6  ;;  %v12851_v6 = vld [vmem:[#allocation7 + $0xcbc] ss:$52 sps:$4 sm:$0xff]  }
 0x423   :  { %8236 = vmatpush1.bf16.msra.mxu1 %v12783_v7  ;;  %v12854_v7 = vld [vmem:[#allocation7 + $0xcc4] ss:$52 sps:$4 sm:$0xff]  }
 0x424   :  { %8400 = vmatpush1.bf16.msra.mxu0 %v12786_v8  ;;  %8237 = vmatprep.subr.bf16.mxu1 %v12791_v9  ;;  %v12849_v8 = vld [vmem:[#allocation7 + $0xcb8] ss:$52 sps:$4 sm:$0xff]   ;;  %v12852_v9 = vld [vmem:[#allocation7 + $0xcc0] ss:$52 sps:$4 sm:$0xff]  }
 0x425   :  { %8401 = vmatprep.subr.bf16.mxu0 %v12794_v11  ;;  %v12857_v11 = vld [vmem:[#allocation7 + $0xd24] ss:$52 sps:$4 sm:$0xff]  }
 0x427   :  { %8238 = vmatpush1.bf16.msra.mxu1 %v12789_v12  ;;  %v12860_v12 = vld [vmem:[#allocation7 + $0xd2c] ss:$52 sps:$4 sm:$0xff]  }
 0x428   :  { %8402 = vmatpush1.bf16.msra.mxu0 %v12792_v14  ;;  %8239 = vmatprep.subr.bf16.mxu1 %v12797_v16  ;;  %v12855_v14 = vld [vmem:[#allocation7 + $0xd20] ss:$52 sps:$4 sm:$0xff]   ;;  %v12858_v16 = vld [vmem:[#allocation7 + $0xd28] ss:$52 sps:$4 sm:$0xff]  }
 0x429   :  { %8403 = vmatprep.subr.bf16.mxu0 %v12800_v17  ;;  %v12863_v17 = vld [vmem:[#allocation7 + $0xd8c] ss:$52 sps:$4 sm:$0xff]  }
 0x42b   :  { %8240 = vmatpush1.bf16.msra.mxu1 %v12795_v20  ;;  %v12866_v20 = vld [vmem:[#allocation7 + $0xd94] ss:$52 sps:$4 sm:$0xff]  }
 0x42c   :  { %8404 = vmatpush1.bf16.msra.mxu0 %v12798_v21  ;;  %8241 = vmatprep.subr.bf16.mxu1 %v12803_v24  ;;  %v12861_v21 = vld [vmem:[#allocation7 + $0xd88] ss:$52 sps:$4 sm:$0xff]   ;;  %v12864_v24 = vld [vmem:[#allocation7 + $0xd90] ss:$52 sps:$4 sm:$0xff]  }
 0x42d   :  { %8405 = vmatprep.subr.bf16.mxu0 %v12806_v22  ;;  %v12869_v22 = vld [vmem:[#allocation7 + $0xdf4] ss:$52 sps:$4 sm:$0xff]  }
 0x42f   :  { %8242 = vmatpush1.bf16.msra.mxu1 %v12801_v25  ;;  %v12872_v25 = vld [vmem:[#allocation7 + $0xdfc] ss:$52 sps:$4 sm:$0xff]  }
 0x430   :  { %8406 = vmatpush1.bf16.msra.mxu0 %v12804_v27  ;;  %8243 = vmatprep.subr.bf16.mxu1 %v12809_v19  ;;  %v12867_v27 = vld [vmem:[#allocation7 + $0xdf0] ss:$52 sps:$4 sm:$0xff]   ;;  %v12870_v19 = vld [vmem:[#allocation7 + $0xdf8] ss:$52 sps:$4 sm:$0xff]  }
 0x431   :  { %8407 = vmatprep.subr.bf16.mxu0 %v12812_v48  ;;  %v12875_v48 = vld [vmem:[#allocation7 + $0xe5c] ss:$52 sps:$4 sm:$0xff]  }
 0x433   :  { %8244 = vmatpush1.bf16.msra.mxu1 %v12807_v28  ;;  %v12878_v28 = vld [vmem:[#allocation7 + $0xe64] ss:$52 sps:$4 sm:$0xff]  }
 0x434   :  { %8408 = vmatpush1.bf16.msra.mxu0 %v12810_v31  ;;  %8245 = vmatprep.subr.bf16.mxu1 %v12815_v36  ;;  %v12873_v31 = vld [vmem:[#allocation7 + $0xe58] ss:$52 sps:$4 sm:$0xff]   ;;  %v12876_v36 = vld [vmem:[#allocation7 + $0xe60] ss:$52 sps:$4 sm:$0xff]  }
 0x435   :  { %8409 = vmatprep.subr.bf16.mxu0 %v12818_v37  ;;  %v12881_v37 = vld [vmem:[#allocation7 + $0xec4] ss:$52 sps:$4 sm:$0xff]  }
 0x437   :  { %8246 = vmatpush1.bf16.msra.mxu1 %v12813_v38  ;;  %v12884_v38 = vld [vmem:[#allocation7 + $0xecc] ss:$52 sps:$4 sm:$0xff]  }
 0x438   :  { %8410 = vmatpush1.bf16.msra.mxu0 %v12816_v39  ;;  %8247 = vmatprep.subr.bf16.mxu1 %v12821_v40  ;;  %v12879_v39 = vld [vmem:[#allocation7 + $0xec0] ss:$52 sps:$4 sm:$0xff]   ;;  %v12882_v40 = vld [vmem:[#allocation7 + $0xec8] ss:$52 sps:$4 sm:$0xff]  }
 0x439   :  { %8411 = vmatprep.subr.bf16.mxu0 %v12824_v41  ;;  %v12887_v41 = vld [vmem:[#allocation7 + $0xf2c] ss:$52 sps:$4 sm:$0xff]  }
 0x43b   :  { %8248 = vmatpush1.bf16.msra.mxu1 %v12819_v42  ;;  %v12890_v42 = vld [vmem:[#allocation7 + $0xf34] ss:$52 sps:$4 sm:$0xff]  }
 0x43c   :  { %8412 = vmatpush1.bf16.msra.mxu0 %v12822_v44  ;;  %8249 = vmatprep.subr.bf16.mxu1 %v12827_v10  ;;  %v12885_v44 = vld [vmem:[#allocation7 + $0xf28] ss:$52 sps:$4 sm:$0xff]   ;;  %v12888_v10 = vld [vmem:[#allocation7 + $0xf30] ss:$52 sps:$4 sm:$0xff]  }
 0x43d   :  { %8413 = vmatprep.subr.bf16.mxu0 %v12830_v45  ;;  %v12893_v45 = vld [vmem:[#allocation7 + $0xf94] ss:$52 sps:$4 sm:$0xff]  }
 0x43f   :  { %8250 = vmatpush1.bf16.msra.mxu1 %v12825_v46  ;;  %v12896_v46 = vld [vmem:[#allocation7 + $0xf9c] ss:$52 sps:$4 sm:$0xff]  }
 0x440   :  { %8414 = vmatpush1.bf16.msra.mxu0 %v12828_v30  ;;  %8251 = vmatprep.subr.bf16.mxu1 %v12833_v47  ;;  %v12891_v30 = vld [vmem:[#allocation7 + $0xf90] ss:$52 sps:$4 sm:$0xff]   ;;  %v12894_v47 = vld [vmem:[#allocation7 + $0xf98] ss:$52 sps:$4 sm:$0xff]  }
 0x441   :  { %8415 = vmatprep.subr.bf16.mxu0 %v12836_v15  ;;  %v12899_v15 = vld [vmem:[#allocation7 + $0xffc] ss:$52 sps:$4 sm:$0xff]  }
 0x443   :  { %8252 = vmatpush1.bf16.msra.mxu1 %v12831_v49  ;;  %v12902_v49 = vld [vmem:[#allocation7 + $0x1004] ss:$52 sps:$4 sm:$0xff]  }
 0x444   :  { %8416 = vmatpush1.bf16.msra.mxu0 %v12834_v50  ;;  %8253 = vmatprep.subr.bf16.mxu1 %v12839_v51  ;;  %v12897_v50 = vld [vmem:[#allocation7 + $0xff8] ss:$52 sps:$4 sm:$0xff]   ;;  %v12900_v51 = vld [vmem:[#allocation7 + $0x1000] ss:$52 sps:$4 sm:$0xff]  }
 0x445   :  { %8417 = vmatprep.subr.bf16.mxu0 %v12842_v52  ;;  %v12905_v52 = vld [vmem:[#allocation7 + $0x1064] ss:$52 sps:$4 sm:$0xff]  }
 0x447   :  { %8254 = vmatpush1.bf16.msra.mxu1 %v12837_v56  ;;  %v12908_v56 = vld [vmem:[#allocation7 + $0x106c] ss:$52 sps:$4 sm:$0xff]  }
 0x448   :  { %8418 = vmatpush1.bf16.msra.mxu0 %v12840_v62  ;;  %8255 = vmatprep.subr.bf16.mxu1 %v12845_v1  ;;  %v12903_v62 = vld [vmem:[#allocation7 + $0x1060] ss:$52 sps:$4 sm:$0xff]   ;;  %v12906_v1 = vld [vmem:[#allocation7 + $0x1068] ss:$52 sps:$4 sm:$0xff]  }
 0x449   :  { %8419 = vmatprep.subr.bf16.mxu0 %v12848_v2  ;;  %v12911_v2 = vld [vmem:[#allocation7 + $0x10cc] ss:$52 sps:$4 sm:$0xff]  }
 0x44b   :  { %8256 = vmatpush1.bf16.msra.mxu1 %v12843_v3  ;;  %v12914_v3 = vld [vmem:[#allocation7 + $0x10d4] ss:$52 sps:$4 sm:$0xff]  }
 0x44c   :  { %8420 = vmatpush1.bf16.msra.mxu0 %v12846_v4  ;;  %8257 = vmatprep.subr.bf16.mxu1 %v12851_v6  ;;  %v12909_v4 = vld [vmem:[#allocation7 + $0x10c8] ss:$52 sps:$4 sm:$0xff]   ;;  %v12912_v6 = vld [vmem:[#allocation7 + $0x10d0] ss:$52 sps:$4 sm:$0xff]  }
 0x44d   :  { %8421 = vmatprep.subr.bf16.mxu0 %v12854_v7  ;;  %v12917_v7 = vld [vmem:[#allocation7 + $0x1134] ss:$52 sps:$4 sm:$0xff]  }
 0x44f   :  { %8258 = vmatpush1.bf16.msra.mxu1 %v12849_v8  ;;  %v12920_v8 = vld [vmem:[#allocation7 + $0x113c] ss:$52 sps:$4 sm:$0xff]  }
 0x450   :  { %8422 = vmatpush1.bf16.msra.mxu0 %v12852_v9  ;;  %8268 = vmatprep.subr.bf16.mxu1 %v12857_v11  ;;  %v12915_v9 = vld [vmem:[#allocation7 + $0x1130] ss:$52 sps:$4 sm:$0xff]   ;;  %v12918_v11 = vld [vmem:[#allocation7 + $0x1138] ss:$52 sps:$4 sm:$0xff]  }
 0x451   :  { %8432 = vmatprep.subr.bf16.mxu0 %v12860_v12  ;;  %v12923_v12 = vld [vmem:[#allocation7 + $0x119c] ss:$52 sps:$4 sm:$0xff]  }
 0x452   :  { %8260 = vmatmul.mubr.bf16.vlgmr.msra.gmra.mrb[28].mxu1 %v13540_v18 }
 0x453   :  { %8424 = vmatmul.mubr.bf16.vlgmr.msra.gmra.mrb[16].mxu0 %v13540_v18  ;;  %8269 = vmatpush1.bf16.msra.mxu1 %v12855_v14  ;;  %v12926_v14 = vld [vmem:[#allocation7 + $0x11a4] ss:$52 sps:$4 sm:$0xff]  }
 0x454   :  { %8300 = vmatprep.mubr.bf16.mxu1 %v13554_v5  ;;  %8433 = vmatpush1.bf16.msra.mxu0 %v12858_v16  ;;  %v12921_v16 = vld [vmem:[#allocation7 + $0x1198] ss:$52 sps:$4 sm:$0xff]  }
 0x455   :  { %8464 = vmatprep.mubr.bf16.mxu0 %v13554_v5  ;;  %8270 = vmatprep.subr.bf16.mxu1 %v12863_v17  ;;  %v12924_v17 = vld [vmem:[#allocation7 + $0x11a0] ss:$52 sps:$4 sm:$0xff]  }
 0x456   :  { %8434 = vmatprep.subr.bf16.mxu0 %v12866_v20  ;;  %v12929_v20 = vld [vmem:[#allocation7 + $0x1204] ss:$52 sps:$4 sm:$0xff]  }
 0x457   :  { %8271 = vmatpush1.bf16.msra.mxu1 %v12861_v21  ;;  %v12932_v21 = vld [vmem:[#allocation7 + $0x120c] ss:$52 sps:$4 sm:$0xff]  }
 0x458   :  { %8435 = vmatpush1.bf16.msra.mxu0 %v12864_v24  ;;  %8272 = vmatprep.subr.bf16.mxu1 %v12869_v22  ;;  %v12927_v24 = vld [vmem:[#allocation7 + $0x1200] ss:$52 sps:$4 sm:$0xff]   ;;  %v12930_v22 = vld [vmem:[#allocation7 + $0x1208] ss:$52 sps:$4 sm:$0xff]  }
 0x459   :  { %8436 = vmatprep.subr.bf16.mxu0 %v12872_v25  ;;  %v12935_v25 = vld [vmem:[#allocation7 + $0x126c] ss:$52 sps:$4 sm:$0xff]  }
 0x45b   :  { %8273 = vmatpush1.bf16.msra.mxu1 %v12867_v27  ;;  %v12938_v27 = vld [vmem:[#allocation7 + $0x1274] ss:$52 sps:$4 sm:$0xff]  }
 0x45c   :  { %8437 = vmatpush1.bf16.msra.mxu0 %v12870_v19  ;;  %8274 = vmatprep.subr.bf16.mxu1 %v12875_v48  ;;  %v12933_v19 = vld [vmem:[#allocation7 + $0x1268] ss:$52 sps:$4 sm:$0xff]   ;;  %v12936_v48 = vld [vmem:[#allocation7 + $0x1270] ss:$52 sps:$4 sm:$0xff]  }
 0x45d   :  { %8438 = vmatprep.subr.bf16.mxu0 %v12878_v28  ;;  %v12941_v28 = vld [vmem:[#allocation7 + $0x12d4] ss:$52 sps:$4 sm:$0xff]  }
 0x45f   :  { %8275 = vmatpush1.bf16.msra.mxu1 %v12873_v31  ;;  %v12944_v31 = vld [vmem:[#allocation7 + $0x12dc] ss:$52 sps:$4 sm:$0xff]  }
 0x460   :  { %8439 = vmatpush1.bf16.msra.mxu0 %v12876_v36  ;;  %8276 = vmatprep.subr.bf16.mxu1 %v12881_v37  ;;  %v12939_v36 = vld [vmem:[#allocation7 + $0x12d0] ss:$52 sps:$4 sm:$0xff]   ;;  %v12942_v37 = vld [vmem:[#allocation7 + $0x12d8] ss:$52 sps:$4 sm:$0xff]  }
 0x461   :  { %8440 = vmatprep.subr.bf16.mxu0 %v12884_v38  ;;  %v12947_v38 = vld [vmem:[#allocation7 + $0x133c] ss:$52 sps:$4 sm:$0xff]  }
 0x463   :  { %8277 = vmatpush1.bf16.msra.mxu1 %v12879_v39  ;;  %v12950_v39 = vld [vmem:[#allocation7 + $0x1344] ss:$52 sps:$4 sm:$0xff]  }
 0x464   :  { %8441 = vmatpush1.bf16.msra.mxu0 %v12882_v40  ;;  %8278 = vmatprep.subr.bf16.mxu1 %v12887_v41  ;;  %v12945_v40 = vld [vmem:[#allocation7 + $0x1338] ss:$52 sps:$4 sm:$0xff]   ;;  %v12948_v41 = vld [vmem:[#allocation7 + $0x1340] ss:$52 sps:$4 sm:$0xff]  }
 0x465   :  { %8442 = vmatprep.subr.bf16.mxu0 %v12890_v42  ;;  %v12953_v42 = vld [vmem:[#allocation7 + $0x13a4] ss:$52 sps:$4 sm:$0xff]  }
 0x467   :  { %8279 = vmatpush1.bf16.msra.mxu1 %v12885_v44  ;;  %v12956_v44 = vld [vmem:[#allocation7 + $0x13ac] ss:$52 sps:$4 sm:$0xff]  }
 0x468   :  { %8443 = vmatpush1.bf16.msra.mxu0 %v12888_v10  ;;  %8280 = vmatprep.subr.bf16.mxu1 %v12893_v45  ;;  %v12951_v10 = vld [vmem:[#allocation7 + $0x13a0] ss:$52 sps:$4 sm:$0xff]   ;;  %v12954_v45 = vld [vmem:[#allocation7 + $0x13a8] ss:$52 sps:$4 sm:$0xff]  }
 0x469   :  { %8444 = vmatprep.subr.bf16.mxu0 %v12896_v46  ;;  %v12959_v46 = vld [vmem:[#allocation7 + $0x140c] ss:$52 sps:$4 sm:$0xff]  }
 0x46b   :  { %8281 = vmatpush1.bf16.msra.mxu1 %v12891_v30  ;;  %v12962_v30 = vld [vmem:[#allocation7 + $0x1414] ss:$52 sps:$4 sm:$0xff]  }
 0x46c   :  { %8445 = vmatpush1.bf16.msra.mxu0 %v12894_v47  ;;  %8282 = vmatprep.subr.bf16.mxu1 %v12899_v15  ;;  %v12957_v47 = vld [vmem:[#allocation7 + $0x1408] ss:$52 sps:$4 sm:$0xff]   ;;  %v12960_v15 = vld [vmem:[#allocation7 + $0x1410] ss:$52 sps:$4 sm:$0xff]  }
 0x46d   :  { %8446 = vmatprep.subr.bf16.mxu0 %v12902_v49  ;;  %v12965_v49 = vld [vmem:[#allocation7 + $0x1474] ss:$52 sps:$4 sm:$0xff]  }
 0x46f   :  { %8283 = vmatpush1.bf16.msra.mxu1 %v12897_v50  ;;  %v12968_v50 = vld [vmem:[#allocation7 + $0x147c] ss:$52 sps:$4 sm:$0xff]  }
 0x470   :  { %8447 = vmatpush1.bf16.msra.mxu0 %v12900_v51  ;;  %8284 = vmatprep.subr.bf16.mxu1 %v12905_v52  ;;  %v12963_v51 = vld [vmem:[#allocation7 + $0x1470] ss:$52 sps:$4 sm:$0xff]   ;;  %v12966_v52 = vld [vmem:[#allocation7 + $0x1478] ss:$52 sps:$4 sm:$0xff]  }
 0x471   :  { %8448 = vmatprep.subr.bf16.mxu0 %v12908_v56  ;;  %v12971_v56 = vld [vmem:[#allocation7 + $0x14dc] ss:$52 sps:$4 sm:$0xff]  }
 0x473   :  { %8285 = vmatpush1.bf16.msra.mxu1 %v12903_v62  ;;  %v12974_v62 = vld [vmem:[#allocation7 + $0x14e4] ss:$52 sps:$4 sm:$0xff]  }
 0x474   :  { %8449 = vmatpush1.bf16.msra.mxu0 %v12906_v1  ;;  %8286 = vmatprep.subr.bf16.mxu1 %v12911_v2  ;;  %v12969_v1 = vld [vmem:[#allocation7 + $0x14d8] ss:$52 sps:$4 sm:$0xff]   ;;  %v12972_v2 = vld [vmem:[#allocation7 + $0x14e0] ss:$52 sps:$4 sm:$0xff]  }
 0x475   :  { %8450 = vmatprep.subr.bf16.mxu0 %v12914_v3  ;;  %v12977_v3 = vld [vmem:[#allocation7 + $0x1544] ss:$52 sps:$4 sm:$0xff]  }
 0x477   :  { %8287 = vmatpush1.bf16.msra.mxu1 %v12909_v4  ;;  %v12980_v4 = vld [vmem:[#allocation7 + $0x154c] ss:$52 sps:$4 sm:$0xff]  }
 0x478   :  { %8451 = vmatpush1.bf16.msra.mxu0 %v12912_v6  ;;  %8288 = vmatprep.subr.bf16.mxu1 %v12917_v7  ;;  %v12975_v6 = vld [vmem:[#allocation7 + $0x1540] ss:$52 sps:$4 sm:$0xff]  }
 0x479   :  { %8452 = vmatprep.subr.bf16.mxu0 %v12920_v8  ;;  %v12983_v7 = vld [vmem:[#allocation7 + $0x15ac] ss:$52 sps:$4 sm:$0xff]   ;;  %v12986_v8 = vld [vmem:[#allocation7 + $0x15b4] ss:$52 sps:$4 sm:$0xff]  }
 0x47b   :  { %8289 = vmatpush1.bf16.msra.mxu1 %v12915_v9  ;;  %v12981_v9 = vld [vmem:[#allocation7 + $0x15a8] ss:$52 sps:$4 sm:$0xff]  }
 0x47c   :  { %8453 = vmatpush1.bf16.msra.mxu0 %v12918_v11  ;;  %8290 = vmatprep.subr.bf16.mxu1 %v12923_v12  ;;  %v12984_v11 = vld [vmem:[#allocation7 + $0x15b0] ss:$52 sps:$4 sm:$0xff]   ;;  %v12989_v12 = vld [vmem:[#allocation7 + $0x1614] ss:$52 sps:$4 sm:$0xff]  }
 0x47d   :  { %8454 = vmatprep.subr.bf16.mxu0 %v12926_v14 }
 0x47f   :  { %8291 = vmatpush1.bf16.msra.mxu1 %v12921_v16  ;;  %v12992_v16 = vld [vmem:[#allocation7 + $0x161c] ss:$52 sps:$4 sm:$0xff]  }
 0x480   :  { %8455 = vmatpush1.bf16.msra.mxu0 %v12924_v17  ;;  %8292 = vmatprep.subr.bf16.mxu1 %v12929_v20 }
 0x481   :  { %8456 = vmatprep.subr.bf16.mxu0 %v12932_v21 }
 0x483   :  { %8293 = vmatpush1.bf16.msra.mxu1 %v12927_v24 }
 0x484   :  { %8457 = vmatpush1.bf16.msra.mxu0 %v12930_v22  ;;  %8294 = vmatprep.subr.bf16.mxu1 %v12935_v25  ;;  %v12987_v22 = vld [vmem:[#allocation7 + $0x1610] ss:$52 sps:$4 sm:$0xff]  }
 0x485   :  { %8458 = vmatprep.subr.bf16.mxu0 %v12938_v27 }
 0x487   :  { %8295 = vmatpush1.bf16.msra.mxu1 %v12933_v19  ;;  %v12990_v19 = vld [vmem:[#allocation7 + $0x1618] ss:$52 sps:$4 sm:$0xff]  }
 0x488   :  { %8459 = vmatpush1.bf16.msra.mxu0 %v12936_v48  ;;  %8296 = vmatprep.subr.bf16.mxu1 %v12941_v28  ;;  %v12995_v48 = vld [vmem:[#allocation7 + $0x167c] ss:$52 sps:$4 sm:$0xff]  }
 0x489   :  { %8460 = vmatprep.subr.bf16.mxu0 %v12944_v31  ;;  %v12998_v31 = vld [vmem:[#allocation7 + $0x1684] ss:$52 sps:$4 sm:$0xff]  }
 0x48b   :  { %8297 = vmatpush1.bf16.msra.mxu1 %v12939_v36  ;;  %v12993_v36 = vld [vmem:[#allocation7 + $0x1678] ss:$52 sps:$4 sm:$0xff]  }
 0x48c   :  { %8461 = vmatpush1.bf16.msra.mxu0 %v12942_v37  ;;  %8298 = vmatprep.subr.bf16.mxu1 %v12947_v38  ;;  %v12996_v37 = vld [vmem:[#allocation7 + $0x1680] ss:$52 sps:$4 sm:$0xff]   ;;  %v12999_v38 = vld [vmem:[#allocation7 + $0x370] ss:$52 sps:$4 sm:$0xff]  }
 0x48d   :  { %8462 = vmatprep.subr.bf16.mxu0 %v12950_v39  ;;  %v13000_v39 = vld [vmem:[#allocation7 + $0x30] ss:$52 sps:$4 sm:$0xff]  }
 0x48f   :  { %8299 = vmatpush1.bf16.msra.mxu1 %v12945_v40  ;;  %v13001_v40 = vld [vmem:[#allocation7 + $0x13b0] ss:$52 sps:$4 sm:$0xff]  }
 0x490   :  { %8463 = vmatpush1.bf16.msra.mxu0 %v12948_v41  ;;  %8309 = vmatprep.subr.bf16.mxu1 %v12953_v42  ;;  %v13002_v41 = vld [vmem:[#allocation7 + $0x3d8] ss:$52 sps:$4 sm:$0xff]  }
 0x491   :  { %8473 = vmatprep.subr.bf16.mxu0 %v12956_v44  ;;  %v13003_v42 = vld [vmem:[#allocation7 + $0x98] ss:$52 sps:$4 sm:$0xff]  }
 0x492   :  { %8301 = vmatmul.mubr.bf16.vlgmr.msra.gmra.mrb[28].mxu1 %v13556_v43  ;;  %v13004_v44 = vld [vmem:[#allocation7 + $0x1418] ss:$52 sps:$4 sm:$0xff]  }
 0x493   :  { %8465 = vmatmul.mubr.bf16.vlgmr.msra.gmra.mrb[16].mxu0 %v13556_v43  ;;  %8310 = vmatpush1.bf16.msra.mxu1 %v12951_v10  ;;  %v13005_v10 = vld [vmem:[#allocation7 + $0x440] ss:$52 sps:$4 sm:$0xff]  }
 0x494   :  { %8474 = vmatpush1.bf16.msra.mxu0 %v12954_v45  ;;  %8311 = vmatprep.subr.bf16.mxu1 %v12959_v46  ;;  %v13006_v45 = vld [vmem:[#allocation7 + $0x100] ss:$52 sps:$4 sm:$0xff]  }
 0x495   :  { %8475 = vmatprep.subr.bf16.mxu0 %v12962_v30  ;;  %8341 = vmatprep.mubr.bf16.mxu1 %v13310_v23  ;;  %v13007_v46 = vld [vmem:[#allocation7 + $0x1480] ss:$52 sps:$4 sm:$0xff]   ;;  %v13008_v30 = vld [vmem:[#allocation7 + $0x4a8] ss:$52 sps:$4 sm:$0xff]  }
 0x496   :  { %8505 = vmatprep.mubr.bf16.mxu0 %v13310_v23  ;;  %v12978_v23 = vld [vmem:[#allocation7 + $0x1548] ss:$52 sps:$4 sm:$0xff]  }
 0x497   :  { %8312 = vmatpush1.bf16.msra.mxu1 %v12957_v47  ;;  %v13009_v47 = vld [vmem:[#allocation7 + $0x168] ss:$52 sps:$4 sm:$0xff]  }
 0x498   :  { %8476 = vmatpush1.bf16.msra.mxu0 %v12960_v15  ;;  %8313 = vmatprep.subr.bf16.mxu1 %v12965_v49  ;;  %v13011_v15 = vld [vmem:[#allocation7 + $0x510] ss:$52 sps:$4 sm:$0xff]  }
 0x499   :  { %8477 = vmatprep.subr.bf16.mxu0 %v12968_v50  ;;  %v13012_v49 = vld [vmem:[#allocation7 + $0x1d0] ss:$52 sps:$4 sm:$0xff]  }
 0x49a   :  { %v13013_v50 = vld [vmem:[#allocation7 + $0x1550] ss:$52 sps:$4 sm:$0xff]  }
 0x49b   :  { %8314 = vmatpush1.bf16.msra.mxu1 %v12963_v51  ;;  %v13014_v51 = vld [vmem:[#allocation7 + $0x578] ss:$52 sps:$4 sm:$0xff]  }
 0x49c   :  { %8478 = vmatpush1.bf16.msra.mxu0 %v12966_v52  ;;  %8315 = vmatprep.subr.bf16.mxu1 %v12971_v56  ;;  %v13015_v52 = vld [vmem:[#allocation7 + $0x238] ss:$52 sps:$4 sm:$0xff]   ;;  %v13625_v56 = vld [vmem:[#allocation8] sm:$0xff] }
 0x49d   :  { %8479 = vmatprep.subr.bf16.mxu0 %v12974_v62  ;;  %v13016_v62 = vld [vmem:[#allocation7 + $0x15b8] ss:$52 sps:$4 sm:$0xff]  }
 0x49f   :  { %8316 = vmatpush1.bf16.msra.mxu1 %v12969_v1  ;;  %v13017_v1 = vld [vmem:[#allocation7 + $0x5e0] ss:$52 sps:$4 sm:$0xff]  }
 0x4a0   :  { %8480 = vmatpush1.bf16.msra.mxu0 %v12972_v2  ;;  %8317 = vmatprep.subr.bf16.mxu1 %v12977_v3  ;;  %v3784_v2 = vrot.slane %v13625_v56, %v13503_v35  ;;  %v13018_v3 = vld [vmem:[#allocation7 + $0x2a0] ss:$52 sps:$4 sm:$0xff]  }
 0x4a1   :  { %8481 = vmatprep.subr.bf16.mxu0 %v12980_v4  ;;  %v13019_v4 = vld [vmem:[#allocation7 + $0x1620] ss:$52 sps:$4 sm:$0xff]  }
 0x4a3   :  { %8318 = vmatpush1.bf16.msra.mxu1 %v12975_v6  ;;  %v13020_v6 = vld [vmem:[#allocation7 + $0x648] ss:$52 sps:$4 sm:$0xff]  }
 0x4a4   :  { %8482 = vmatpush1.bf16.msra.mxu0 %v12978_v23  ;;  %8319 = vmatprep.subr.bf16.mxu1 %v12983_v7  ;;  %v11364_v23 = vadd.f32 %v13589_v59, %v3784_v2  ;;  %v13021_v7 = vld [vmem:[#allocation7 + $0x308] ss:$52 sps:$4 sm:$0xff]   ;;  %v13026_v59 = vld [vmem:[%s14006_s5 + $0x80] sm:$0xff]  }
 0x4a5   :  { %v13607_v14 = vpop.f32.mrb[24].mxu1  ;;  %8483 = vmatprep.subr.bf16.mxu0 %v12986_v8  ;;  %v13022_v8 = vld [vmem:[#allocation7 + $0x1688] ss:$52 sps:$4 sm:$0xff]  }
 0x4a6   :  { %v13609_v17 = vpop.f32.mrb[12].mxu0  ;;  %v13611_v20 = vpop.f32.mrb[25].mxu1  ;;  %v13053_v2 = vld [vmem:[#allocation7 + $0x988] ss:$52 sps:$4 sm:$0xff]  }
 0x4a7   :  { %v13613_v21 = vpop.f32.mrb[13].mxu0  ;;  %v8019_v24 = vpop.f32.mrb[26].mxu1  ;;  %8320 = vmatpush1.bf16.msra.mxu1 %v12981_v9  ;;  %v13023_v9 = vld [vmem:[#allocation7 + $0x9f0] ss:$52 sps:$4 sm:$0xff]  }
 0x4a8   :  { %v8183_v25 = vpop.f32.mrb[14].mxu0  ;;  %8484 = vmatpush1.bf16.msra.mxu0 %v12984_v11  ;;  %v8020_v27 = vpop.f32.mrb[27].mxu1  ;;  %8321 = vmatprep.subr.bf16.mxu1 %v12989_v12  ;;  %v13024_v11 = vld [vmem:[%s14006_s5 + $0xc0] sm:$0xff]   ;;  %v8677_v12 = vmax.f32 %v11364_v23, 0.0  ;;  %v13027_v24 = vld [vmem:[#allocation7 + $0xa58] ss:$52 sps:$4 sm:$0xff]  }
 0x4a9   :  { %v8184_v28 = vpop.f32.mrb[15].mxu0  ;;  %8485 = vmatprep.subr.bf16.mxu0 %v12992_v16  ;;  %v13025_v16 = vld [vmem:[#allocation7 + $0x6b0] ss:$52 sps:$4 sm:$0xff]   ;;  %v13029_v27 = vld [vmem:[#allocation7 + $0x718] ss:$52 sps:$4 sm:$0xff]  }
 0x4aa   :  { %v8690_v25 = vpack.c.bf16 %v8677_v12, %v8677_v12  ;;  %v13033_v28 = vld [vmem:[#allocation7 + $0x780] ss:$52 sps:$4 sm:$0xff]  }
 0x4ab   :  { %8322 = vmatpush1.bf16.msra.mxu1 %v12987_v22  ;;  %v13028_v22 = vld [vmem:[%s14006_s5 + $0xc8] sm:$0xff]  }
 0x4ac   :  { %8486 = vmatpush1.bf16.msra.mxu0 %v12990_v19  ;;  %8323 = vmatprep.subr.bf16.mxu1 %v12995_v48  ;;  %v13030_v19 = vld [vmem:[%s14006_s5 + $0x88] sm:$0xff]   ;;  %v13031_v48 = vld [vmem:[#allocation7 + $0xac0] ss:$52 sps:$4 sm:$0xff]  }
 0x4ad   :  { %8487 = vmatprep.subr.bf16.mxu0 %v12998_v31  ;;  %v13036_v31 = vld [vmem:[%s14006_s5 + $0xd8] sm:$0xff]  }
 0x4af   :  { %8324 = vmatpush1.bf16.msra.mxu1 %v12993_v36  ;;  %v13037_v36 = vld [vmem:[#allocation7 + $0x7e8] ss:$52 sps:$4 sm:$0xff]  }
 0x4b0   :  { %8488 = vmatpush1.bf16.msra.mxu0 %v12996_v37  ;;  %11093 = vmatprep.subr.bf16.mxu1 %v12999_v38  ;;  %v13038_v37 = vld [vmem:[%s14006_s5 + $0x98] sm:$0xff]   ;;  %v13039_v38 = vld [vmem:[#allocation7 + $0xb90] ss:$52 sps:$4 sm:$0xff]  }
 0x4b1   :  { %11315 = vmatprep.subr.bf16.mxu0 %v13311_v0 }
 0x4b2   :  { %8342 = vmatmul.mubr.bf16.vlgmr.msra.gmra.mrb[28].mxu1 %v13565_v26 }
 0x4b3   :  { %8506 = vmatmul.mubr.bf16.vlgmr.msra.gmra.mrb[16].mxu0 %v13565_v26  ;;  %11094 = vmatpush3.bf16.msra.mxu1 %v13000_v39  ;;  %v13040_v39 = vld [vmem:[%s14006_s5 + $0xe0] sm:$0xff]  }
 0x4b4   :  { %8546 = vmatprep.mubr.bf16.mxu1 %v13513_v54  ;;  %11316 = vmatpush3.bf16.msra.mxu0 %v13001_v40  ;;  %v13010_v54 = vld [vmem:[#allocation7 + $0x14e8] ss:$52 sps:$4 sm:$0xff]   ;;  %v13041_v40 = vld [vmem:[#allocation7 + $0x850] ss:$52 sps:$4 sm:$0xff]  }
 0x4b5   :  { %11095 = vmatprep.subr.bf16.mxu1 %v13002_v41  ;;  %11317 = vmatprep.subr.bf16.mxu0 %v13311_v0  ;;  %v13042_v41 = vld [vmem:[%s14006_s5 + $0xa0] sm:$0xff]  }
 0x4b6   :  { %11331 = vmatprep.mubr.msk.bf16.mxu0 %vm13312_vm1, %v13311_v0 }
 0x4b7   :  { %11096 = vmatpush3.bf16.msra.mxu1 %v13003_v42  ;;  %v13043_v42 = vld [vmem:[#allocation7 + $0xbf8] ss:$52 sps:$4 sm:$0xff]  }
 0x4b8   :  { %11318 = vmatpush3.bf16.msra.mxu0 %v13004_v44  ;;  %11097 = vmatprep.subr.bf16.mxu1 %v13005_v10  ;;  %v13044_v44 = vld [vmem:[%s14006_s5 + $0xe8] sm:$0xff]   ;;  %v3799_v10 = vsub.s32 7, %v13488_v29  ;;  %v13101_v29 = vld [vmem:[%s14006_s5 + $0x78] sm:$0xff]  }
 0x4b9   :  { %11319 = vmatprep.subr.bf16.mxu0 %v13311_v0 }
 0x4bb   :  { %11098 = vmatpush3.bf16.msra.mxu1 %v13006_v45  ;;  %v13045_v45 = vld [vmem:[#allocation7 + $0x8b8] ss:$52 sps:$4 sm:$0xff]  }
 0x4bc   :  { %11320 = vmatpush3.bf16.msra.mxu0 %v13007_v46  ;;  %11099 = vmatprep.subr.bf16.mxu1 %v13008_v30  ;;  %v13046_v46 = vld [vmem:[%s14006_s5 + $0xa8] sm:$0xff]   ;;  %v13047_v30 = vld [vmem:[#allocation7 + $0xc60] ss:$52 sps:$4 sm:$0xff]  }
 0x4bd   :  { %11321 = vmatprep.subr.bf16.mxu0 %v13311_v0 }
 0x4bf   :  { %11100 = vmatpush3.bf16.msra.mxu1 %v13009_v47  ;;  %v3780_v47 = vrot.slane %v13625_v56, %v13526_v61 }
 0x4c0   :  { %11322 = vmatpush3.bf16.msra.mxu0 %v13010_v54  ;;  %11101 = vmatprep.subr.bf16.mxu1 %v13011_v15  ;;  %v13048_v54 = vld [vmem:[%s14006_s5 + $0xf0] sm:$0xff]   ;;  %v3800_v15 = vrot.slane %v13625_v56, %v3799_v10 }
 0x4c1   :  { %11323 = vmatprep.subr.bf16.mxu0 %v13311_v0  ;;  %v13082_v10 = vld [vmem:[%s14006_s5 + $0x1b0] sm:$0xff]  }
 0x4c3   :  { %11102 = vmatpush3.bf16.msra.mxu1 %v13012_v49  ;;  %v13049_v49 = vld [vmem:[#allocation7 + $0x920] ss:$52 sps:$4 sm:$0xff]  }
 0x4c4   :  { %11324 = vmatpush3.bf16.msra.mxu0 %v13013_v50  ;;  %11103 = vmatprep.subr.bf16.mxu1 %v13014_v51  ;;  %v13050_v50 = vld [vmem:[%s14006_s5 + $0xb0] sm:$0xff]   ;;  %v13051_v51 = vld [vmem:[#allocation7 + $0xcc8] ss:$52 sps:$4 sm:$0xff]  }
 0x4c5   :  { %11325 = vmatprep.subr.bf16.mxu0 %v13311_v0 }
 0x4c7   :  { %11104 = vmatpush3.bf16.msra.mxu1 %v13015_v52  ;;  %v11363_v52 = vadd.f32 %v13585_v55, %v3780_v47  ;;  %v13056_v55 = vld [vmem:[%s14006_s5 + $0x1c0] sm:$0xff]   ;;  %v13085_v47 = vld [vmem:[#allocation7 + $0x1008] ss:$52 sps:$4 sm:$0xff]  }
 0x4c8   :  { %11326 = vmatpush3.bf16.msra.mxu0 %v13016_v62  ;;  %11105 = vmatprep.subr.bf16.mxu1 %v13017_v1  ;;  %v13052_v62 = vld [vmem:[%s14006_s5 + $0xf8] sm:$0xff]   ;;  %v11368_v1 = vadd.f32 %v13613_v21, %v3800_v15  ;;  %v13058_v21 = vld [vmem:[%s14006_s5 + $0x180] sm:$0xff]  }
 0x4c9   :  { %11327 = vmatprep.subr.bf16.mxu0 %v13311_v0  ;;  %v13087_v15 = vld [vmem:[%s14006_s5 + $0x40] sm:$0xff]  }
 0x4ca   :  { %v8681_v23 = vmax.f32 %v11368_v1, 0.0 }
 0x4cb   :  { %11106 = vmatpush3.bf16.msra.mxu1 %v13018_v3  ;;  %v13054_v3 = vld [vmem:[%s14006_s5 + $0xb8] sm:$0xff]  }
 0x4cc   :  { %11328 = vmatpush3.bf16.msra.mxu0 %v13019_v4  ;;  %11107 = vmatprep.subr.bf16.mxu1 %v13020_v6  ;;  %v13055_v4 = vld [vmem:[#allocation7 + $0x1070] ss:$52 sps:$4 sm:$0xff]   ;;  %v8676_v6 = vmax.f32 %v11363_v52, 0.0  ;;  %v8694_v12 = vpack.c.bf16 %v8681_v23, %v8681_v23  ;;  %v13093_v23 = vld [vmem:[%s14006_s5 + $0x58] sm:$0xff]  }
 0x4cd   :  { %11329 = vmatprep.subr.bf16.mxu0 %v13311_v0 }
 0x4cf   :  { %11108 = vmatpush3.bf16.msra.mxu1 %v13021_v7  ;;  %v13057_v7 = vld [vmem:[#allocation7 + $0xd30] ss:$52 sps:$4 sm:$0xff]  }
 0x4d0   :  { %11330 = vmatpush3.bf16.msra.mxu0 %v13022_v8  ;;  %11115 = vmatprep.subr.bf16.mxu1 %v13023_v9  ;;  %v8689_v8 = vpack.c.bf16 %v8676_v6, %v8676_v6  ;;  %v13059_v9 = vld [vmem:[#allocation7 + $0x10d8] ss:$52 sps:$4 sm:$0xff]   ;;  %v13128_v6 = vld [vmem:[%s14006_s5 + $0x2d0] sm:$0xff]  }
 0x4d1   :  { %11190 = vmatprep.subr.bf16.mxu0 %v13024_v11  ;;  %v13060_v11 = vld [vmem:[%s14006_s5 + $0x1c8] sm:$0xff]  }
 0x4d2   :  { %8547 = vmatmul.mubr.bf16.vlgmr.msra.gmra.mrb[32].mxu1 %v13515_v58  ;;  %v13032_v58 = vld [vmem:[%s14006_s5 + $0xd0] sm:$0xff]  }
 0x4d3   :  { %11332 = vmatmul.mubr.bf16.vlgmr.msra.gmra.mrb[20].mxu0 %v13565_v26  ;;  %11116 = vmatpush3.bf16.msra.mxu1 %v13025_v16  ;;  %v13035_v26 = vld [vmem:[#allocation7 + $0xb28] ss:$52 sps:$4 sm:$0xff]   ;;  %v13061_v16 = vld [vmem:[#allocation7 + $0xd98] ss:$52 sps:$4 sm:$0xff]  }
 0x4d4   :  { %8586 = vmatprep.mubr.bf16.mxu1 %v13519_v60  ;;  %11191 = vmatpush3.bf16.msra.mxu0 %v13026_v59  ;;  %v13034_v60 = vld [vmem:[%s14006_s5 + $0x90] sm:$0xff]   ;;  %v13062_v59 = vld [vmem:[%s14006_s5 + $0x188] sm:$0xff]  }
 0x4d5   :  { %9611 = vmatprep.mubr.bf16.mxu0 %v8690_v25  ;;  %11117 = vmatprep.subr.bf16.mxu1 %v13027_v24  ;;  %v13063_v24 = vld [vmem:[#allocation7 + $0x1140] ss:$52 sps:$4 sm:$0xff]   ;;  %v13067_v25 = vld [vmem:[#allocation7 + $0x11a8] ss:$52 sps:$4 sm:$0xff]  }
 0x4d6   :  { %11192 = vmatprep.subr.bf16.mxu0 %v13028_v22  ;;  %v13065_v22 = vld [vmem:[#allocation7 + $0xe00] ss:$52 sps:$4 sm:$0xff]  }
 0x4d7   :  { %11118 = vmatpush3.bf16.msra.mxu1 %v13029_v27  ;;  %v13068_v27 = vld [vmem:[%s14006_s5 + $0x1d8] sm:$0xff]  }
 0x4d8   :  { %11193 = vmatpush3.bf16.msra.mxu0 %v13030_v19  ;;  %11119 = vmatprep.subr.bf16.mxu1 %v13031_v48  ;;  %v13069_v19 = vld [vmem:[#allocation7 + $0xe68] ss:$52 sps:$4 sm:$0xff]  }
 0x4d9   :  { %11194 = vmatprep.subr.bf16.mxu0 %v13032_v58  ;;  %v13070_v48 = vld [vmem:[%s14006_s5 + $0x198] sm:$0xff]   ;;  %v13071_v58 = vld [vmem:[#allocation7 + $0x1210] ss:$52 sps:$4 sm:$0xff]  }
 0x4db   :  { %11120 = vmatpush3.bf16.msra.mxu1 %v13033_v28  ;;  %v13072_v28 = vld [vmem:[%s14006_s5 + $0x1e0] sm:$0xff]  }
 0x4dc   :  { %11195 = vmatpush3.bf16.msra.mxu0 %v13034_v60  ;;  %11121 = vmatprep.subr.bf16.mxu1 %v13035_v26  ;;  %v13073_v60 = vld [vmem:[#allocation7 + $0xed0] ss:$52 sps:$4 sm:$0xff]  }
 0x4dd   :  { %11196 = vmatprep.subr.bf16.mxu0 %v13036_v31  ;;  %v13074_v26 = vld [vmem:[%s14006_s5 + $0x1a0] sm:$0xff]   ;;  %v13075_v31 = vld [vmem:[#allocation7 + $0x1278] ss:$52 sps:$4 sm:$0xff]  }
 0x4df   :  { %11122 = vmatpush3.bf16.msra.mxu1 %v13037_v36  ;;  %v13076_v36 = vld [vmem:[%s14006_s5 + $0x1e8] sm:$0xff]  }
 0x4e0   :  { %11197 = vmatpush3.bf16.msra.mxu0 %v13038_v37  ;;  %11123 = vmatprep.subr.bf16.mxu1 %v13039_v38  ;;  %v13077_v37 = vld [vmem:[#allocation7 + $0xf38] ss:$52 sps:$4 sm:$0xff]  }
 0x4e1   :  { %11198 = vmatprep.subr.bf16.mxu0 %v13040_v39  ;;  %v13078_v38 = vld [vmem:[%s14006_s5 + $0x1a8] sm:$0xff]   ;;  %v13079_v39 = vld [vmem:[#allocation7 + $0x12e0] ss:$52 sps:$4 sm:$0xff]  }
 0x4e3   :  { %11124 = vmatpush3.bf16.msra.mxu1 %v13041_v40  ;;  %v3796_v40 = vrot.slane %v13625_v56, %v514_v63  ;;  %v13084_v63 = vld [vmem:[%s14006_s5 + $0x1f8] sm:$0xff]  }
 0x4e4   :  { %11199 = vmatpush3.bf16.msra.mxu0 %v13042_v41  ;;  %11125 = vmatprep.subr.bf16.mxu1 %v13043_v42  ;;  %v13080_v41 = vld [vmem:[%s14006_s5 + $0x1f0] sm:$0xff]   ;;  %v3776_v42 = vrot.slane %v13625_v56, %v13500_v34 }
 0x4e5   :  { %11200 = vmatprep.subr.bf16.mxu0 %v13044_v44  ;;  %v13081_v44 = vld [vmem:[#allocation7 + $0xfa0] ss:$52 sps:$4 sm:$0xff]  }
 0x4e7   :  { %11126 = vmatpush3.bf16.msra.mxu1 %v13045_v45  ;;  %v13083_v45 = vld [vmem:[#allocation7 + $0x1348] ss:$52 sps:$4 sm:$0xff]  }
 0x4e8   :  { %11201 = vmatpush3.bf16.msra.mxu0 %v13046_v46  ;;  %11127 = vmatprep.subr.bf16.mxu1 %v13047_v30  ;;  %v11367_v46 = vadd.f32 %v13609_v17, %v3796_v40  ;;  %v11362_v30 = vadd.f32 %v13587_v57, %v3776_v42  ;;  %v13088_v57 = vld [vmem:[%s14006_s5] sm:$0xff]   ;;  %v13105_v40 = vld [vmem:[%s14006_s5 + $0x148] sm:$0xff]  }
 0x4e9   :  { %11202 = vmatprep.subr.bf16.mxu0 %v13048_v54  ;;  %v13086_v54 = vld [vmem:[%s14006_s5 + $0x1b8] sm:$0xff]   ;;  %v13106_v42 = vld [vmem:[%s14006_s5 + $0x108] sm:$0xff]  }
 0x4ea   :  { %v8680_v17 = vmax.f32 %v11367_v46, 0.0  ;;  %v13110_v46 = vld [vmem:[%s14006_s5 + $0x118] sm:$0xff]  }
 0x4eb   :  { %11128 = vmatpush3.bf16.msra.mxu1 %v13049_v49  ;;  %v13120_v49 = vld [vmem:[%s14006_s5 + $0x2c0] sm:$0xff]  }
 0x4ec   :  { %11203 = vmatpush3.bf16.msra.mxu0 %v13050_v50  ;;  %11129 = vmatprep.subr.bf16.mxu1 %v13051_v51  ;;  %v8675_v50 = vmax.f32 %v11362_v30, 0.0  ;;  %v13089_v51 = vld [vmem:[%s14006_s5 + $0x48] sm:$0xff]   ;;  %v8693_v52 = vpack.c.bf16 %v8680_v17, %v8680_v17  ;;  %v13112_v30 = vld [vmem:[%s14006_s5 + $0x120] sm:$0xff]   ;;  %v13115_v17 = vld [vmem:[%s14006_s5 + $0x170] sm:$0xff]  }
 0x4ed   :  { %11204 = vmatprep.subr.bf16.mxu0 %v13052_v62  ;;  %v13122_v62 = vld [vmem:[%s14006_s5 + $0x280] sm:$0xff]  }
 0x4ee   :  { %v8688_v1 = vpack.c.bf16 %v8675_v50, %v8675_v50 }
 0x4ef   :  { %11130 = vmatpush3.bf16.msra.mxu1 %v13053_v2  ;;  %v13124_v2 = vld [vmem:[%s14006_s5 + $0x2c8] sm:$0xff]  }
 0x4f0   :  { %11205 = vmatpush3.bf16.msra.mxu0 %v13054_v3  ;;  %11137 = vmatprep.subr.bf16.mxu1 %v13055_v4  ;;  %v13090_v3 = vld [vmem:[%s14006_s5 + $0x8] sm:$0xff]   ;;  %v13091_v4 = vld [vmem:[%s14006_s5 + $0x50] sm:$0xff]  }
 0x4f1   :  { %11234 = vmatprep.subr.bf16.mxu0 %v13056_v55  ;;  %v13092_v55 = vld [vmem:[%s14006_s5 + $0x10] sm:$0xff]  }
 0x4f2   :  { %8587 = vmatmul.mubr.bf16.vlgmr.msra.gmra.mrb[36].mxu1 %v13540_v18  ;;  %v13064_v18 = vld [vmem:[%s14006_s5 + $0x1d0] sm:$0xff]  }
 0x4f3   :  { %9612 = vmatmul.mubr.bf16.vlgmr.msra.gmra.mrb[24].mxu0 %v8689_v8  ;;  %11138 = vmatpush3.bf16.msra.mxu1 %v13057_v7  ;;  %v13130_v7 = vld [vmem:[%s14006_s5 + $0x290] sm:$0xff]   ;;  %v13094_v8 = vld [vmem:[%s14006_s5 + $0x18] sm:$0xff]  }
 0x4f4   :  { %8626 = vmatprep.mubr.bf16.mxu1 %v13554_v5  ;;  %11235 = vmatpush3.bf16.msra.mxu0 %v13058_v21  ;;  %v13066_v5 = vld [vmem:[%s14006_s5 + $0x190] sm:$0xff]   ;;  %v13132_v21 = vld [vmem:[%s14006_s5 + $0x2d8] sm:$0xff]  }
 0x4f5   :  { %9691 = vmatprep.mubr.bf16.mxu0 %v8694_v12  ;;  %11139 = vmatprep.subr.bf16.mxu1 %v13059_v9  ;;  %v13095_v9 = vld [vmem:[%s14006_s5 + $0x60] sm:$0xff]  }
 0x4f6   :  { %11236 = vmatprep.subr.bf16.mxu0 %v13060_v11  ;;  %v13134_v11 = vld [vmem:[%s14006_s5 + $0x298] sm:$0xff]   ;;  %v13136_v12 = vld [vmem:[%s14006_s5 + $0x2e0] sm:$0xff]  }
 0x4f7   :  { %11140 = vmatpush3.bf16.msra.mxu1 %v13061_v16  ;;  %v13096_v16 = vld [vmem:[%s14006_s5 + $0x20] sm:$0xff]  }
 0x4f8   :  { %11237 = vmatpush3.bf16.msra.mxu0 %v13062_v59  ;;  %11141 = vmatprep.subr.bf16.mxu1 %v13063_v24  ;;  %v13097_v59 = vld [vmem:[%s14006_s5 + $0x68] sm:$0xff]   ;;  %v13138_v24 = vld [vmem:[%s14006_s5 + $0x2a0] sm:$0xff]  }
 0x4f9   :  { %11238 = vmatprep.subr.bf16.mxu0 %v13064_v18  ;;  %v13140_v18 = vld [vmem:[%s14006_s5 + $0x2e8] sm:$0xff]  }
 0x4fb   :  { %11142 = vmatpush3.bf16.msra.mxu1 %v13065_v22  ;;  %v13098_v22 = vld [vmem:[%s14006_s5 + $0x28] sm:$0xff]  }
 0x4fc   :  { %11239 = vmatpush3.bf16.msra.mxu0 %v13066_v5  ;;  %11143 = vmatprep.subr.bf16.mxu1 %v13067_v25  ;;  %v3772_v5 = vrot.slane %v13625_v56, %v13495_v32  ;;  %v13099_v25 = vld [vmem:[%s14006_s5 + $0x70] sm:$0xff]  }
 0x4fd   :  { %11240 = vmatprep.subr.bf16.mxu0 %v13068_v27  ;;  %v3792_v27 = vrot.slane %v13625_v56, %v510_v13 }
 0x4ff   :  { %11144 = vmatpush3.bf16.msra.mxu1 %v13069_v19  ;;  %v13142_v19 = vld [vmem:[%s14006_s5 + $0x2a8] sm:$0xff]   ;;  %v11366_v13 = vadd.f32 %v13611_v20, %v3792_v27  ;;  %v13103_v20 = vld [vmem:[%s14006_s5 + $0x140] sm:$0xff]  }
 0x500   :  { %11241 = vmatpush3.bf16.msra.mxu0 %v13070_v48  ;;  %11145 = vmatprep.subr.bf16.mxu1 %v13071_v58  ;;  %v13144_v48 = vld [vmem:[%s14006_s5 + $0x2f0] sm:$0xff]  }
 0x501   :  { %11242 = vmatprep.subr.bf16.mxu0 %v13072_v28  ;;  %v13100_v58 = vld [vmem:[%s14006_s5 + $0x30] sm:$0xff]   ;;  %v11361_v28 = vadd.f32 %v13583_v53, %v3772_v5  ;;  %v13102_v53 = vld [vmem:[%s14006_s5 + $0x38] sm:$0xff]  }
 0x503   :  { %11146 = vmatpush3.bf16.msra.mxu1 %v13073_v60  ;;  %v13146_v60 = vld [vmem:[%s14006_s5 + $0x2b0] sm:$0xff]  }
 0x504   :  { %11243 = vmatpush3.bf16.msra.mxu0 %v13074_v26  ;;  %11147 = vmatprep.subr.bf16.mxu1 %v13075_v31  ;;  %v13148_v26 = vld [vmem:[%s14006_s5 + $0x2f8] sm:$0xff]   ;;  %v8674_v31 = vmax.f32 %v11361_v28, 0.0 }
 0x505   :  { %11244 = vmatprep.subr.bf16.mxu0 %v13076_v36  ;;  %v8679_v36 = vmax.f32 %v11366_v13, 0.0 }
 0x507   :  { %11148 = vmatpush3.bf16.msra.mxu1 %v13077_v37  ;;  %v13150_v37 = vld [vmem:[%s14006_s5 + $0x2b8] sm:$0xff]  }
 0x508   :  { %11245 = vmatpush3.bf16.msra.mxu0 %v13078_v38  ;;  %11149 = vmatprep.subr.bf16.mxu1 %v13079_v39  ;;  %v13104_v38 = vld [vmem:[%s14006_s5 + $0x100] sm:$0xff]   ;;  %v8687_v39 = vpack.c.bf16 %v8674_v31, %v8674_v31 }
 0x509   :  { %11246 = vmatprep.subr.bf16.mxu0 %v13080_v41  ;;  %v8692_v41 = vpack.c.bf16 %v8679_v36, %v8679_v36 }
 0x50b   :  { %11150 = vmatpush3.bf16.msra.mxu1 %v13081_v44  ;;  %v13107_v44 = vld [vmem:[%s14006_s5 + $0x150] sm:$0xff]  }
 0x50c   :  { %11247 = vmatpush3.bf16.msra.mxu0 %v13082_v10  ;;  %11151 = vmatprep.subr.bf16.mxu1 %v13083_v45  ;;  %v13108_v10 = vld [vmem:[%s14006_s5 + $0x110] sm:$0xff]   ;;  %v13109_v45 = vld [vmem:[%s14006_s5 + $0x158] sm:$0xff]  }
 0x50d   :  { %11248 = vmatprep.subr.bf16.mxu0 %v13084_v63  ;;  %v13111_v63 = vld [vmem:[%s14006_s5 + $0x160] sm:$0xff]  }
 0x50f   :  { %11152 = vmatpush3.bf16.msra.mxu1 %v13085_v47  ;;  %v13113_v47 = vld [vmem:[%s14006_s5 + $0x168] sm:$0xff]  }
 0x510   :  { %11249 = vmatpush3.bf16.msra.mxu0 %v13086_v54  ;;  %11168 = vmatprep.subr.bf16.mxu1 %v13087_v15  ;;  %v13114_v54 = vld [vmem:[%s14006_s5 + $0x128] sm:$0xff]   ;;  %v3788_v15 = vrot.slane %v13625_v56, %v13548_v33  ;;  %v13118_v56 = vld [vmem:[%s14006_s5 + $0x138] sm:$0xff]  }
 0x511   :  { %11278 = vmatprep.subr.bf16.mxu0 %v13120_v49  ;;  %v13116_v49 = vld [vmem:[%s14006_s5 + $0x130] sm:$0xff]  }
 0x512   :  { %8627 = vmatmul.mubr.bf16.vlgmr.msra.gmra.mrb[40].mxu1 %v13556_v43  ;;  %v13126_v43 = vld [vmem:[%s14006_s5 + $0x288] sm:$0xff]   ;;  %v11365_v50 = vadd.f32 %v13607_v14, %v3788_v15  ;;  %v13121_v14 = vld [vmem:[%s14006_s5 + $0x200] sm:$0xff]  }
 0x513   :  { %9692 = vmatmul.mubr.bf16.vlgmr.msra.gmra.mrb[28].mxu0 %v8693_v52  ;;  %11169 = vmatpush3.bf16.msra.mxu1 %v13088_v57  ;;  %v13117_v57 = vld [vmem:[%s14006_s5 + $0x178] sm:$0xff]   ;;  %v13119_v52 = vld [vmem:[%s14006_s5 + $0x240] sm:$0xff]  }
 0x514   :  { %9571 = vmatprep.mubr.bf16.mxu1 %v8688_v1  ;;  %11170 = vmatprep.subr.bf16.mxu1 %v13089_v51  ;;  %v8678_v51 = vmax.f32 %v11365_v50, 0.0  ;;  %v13123_v1 = vld [vmem:[%s14006_s5 + $0x248] sm:$0xff]  }
 0x515   :  { %11279 = vmatpush3.bf16.msra.mxu0 %v13122_v62 }
 0x516   :  { %11280 = vmatprep.subr.bf16.mxu0 %v13124_v2  ;;  %v8691_v62 = vpack.c.bf16 %v8678_v51, %v8678_v51  ;;  %v13125_v2 = vld [vmem:[%s14006_s5 + $0x208] sm:$0xff]  }
 0x517   :  { %11171 = vmatpush3.bf16.msra.mxu1 %v13090_v3  ;;  %v13127_v3 = vld [vmem:[%s14006_s5 + $0x250] sm:$0xff]  }
 0x518   :  { %11172 = vmatprep.subr.bf16.mxu1 %v13091_v4  ;;  %v13129_v4 = vld [vmem:[%s14006_s5 + $0x210] sm:$0xff]  }
 0x519   :  { %11281 = vmatpush3.bf16.msra.mxu0 %v13126_v43  ;;  %v13131_v43 = vld [vmem:[%s14006_s5 + $0x258] sm:$0xff]  }
 0x51a   :  { %11282 = vmatprep.subr.bf16.mxu0 %v13128_v6  ;;  %v13133_v6 = vld [vmem:[%s14006_s5 + $0x218] sm:$0xff]  }
 0x51b   :  { %11173 = vmatpush3.bf16.msra.mxu1 %v13092_v55  ;;  %v13135_v55 = vld [vmem:[%s14006_s5 + $0x260] sm:$0xff]  }
 0x51c   :  { %11174 = vmatprep.subr.bf16.mxu1 %v13093_v23  ;;  %v13137_v23 = vld [vmem:[%s14006_s5 + $0x220] sm:$0xff]  }
 0x51d   :  { %11283 = vmatpush3.bf16.msra.mxu0 %v13130_v7  ;;  %v13139_v7 = vld [vmem:[%s14006_s5 + $0x268] sm:$0xff]  }
 0x51e   :  { %11284 = vmatprep.subr.bf16.mxu0 %v13132_v21  ;;  %v13141_v21 = vld [vmem:[%s14006_s5 + $0x228] sm:$0xff]  }
 0x51f   :  { %11175 = vmatpush3.bf16.msra.mxu1 %v13094_v8  ;;  %v13143_v8 = vld [vmem:[%s14006_s5 + $0x270] sm:$0xff]  }
 0x520   :  { %11176 = vmatprep.subr.bf16.mxu1 %v13095_v9  ;;  %v13145_v9 = vld [vmem:[%s14006_s5 + $0x230] sm:$0xff]  }
 0x521   :  { %11285 = vmatpush3.bf16.msra.mxu0 %v13134_v11  ;;  %v13147_v11 = vld [vmem:[%s14006_s5 + $0x278] sm:$0xff]  }
 0x522   :  { %11286 = vmatprep.subr.bf16.mxu0 %v13136_v12  ;;  %v13149_v12 = vld [vmem:[%s14006_s5 + $0x238] sm:$0xff]  }
 0x523   :  { %11177 = vmatpush3.bf16.msra.mxu1 %v13096_v16  ;;  %v3766_v16 = vld [vmem:[#allocation8 + $0x8] sm:$0x1f] }
 0x524   :  { %11178 = vmatprep.subr.bf16.mxu1 %v13097_v59  ;;  %v3804_v59 = vrot.slane %v3766_v16, %v13495_v32 }
 0x525   :  { %11287 = vmatpush3.bf16.msra.mxu0 %v13138_v24  ;;  %v3812_v24 = vrot.slane %v3766_v16, %v13526_v61 }
 0x526   :  { %11288 = vmatprep.subr.bf16.mxu0 %v13140_v18  ;;  %v3808_v18 = vrot.slane %v3766_v16, %v13500_v34  ;;  %v13151_v34 = vld [vmem:[%s14006_s5 + $0x300] sm:$0xff]  }
 0x527   :  { %11179 = vmatpush3.bf16.msra.mxu1 %v13098_v22  ;;  %v3816_v22 = vrot.slane %v3766_v16, %v13503_v35 }
 0x528   :  { %11180 = vmatprep.subr.bf16.mxu1 %v13099_v25 }
 0x529   :  { %11289 = vmatpush3.bf16.msra.mxu0 %v13142_v19 }
 0x52a   :  { %11290 = vmatprep.subr.bf16.mxu0 %v13144_v48 }
 0x52b   :  { %11181 = vmatpush3.bf16.msra.mxu1 %v13100_v58 }
 0x52c   :  { %11182 = vmatprep.subr.bf16.mxu1 %v13101_v29 }
 0x52d   :  { %11291 = vmatpush3.bf16.msra.mxu0 %v13146_v60 }
 0x52e   :  { %11292 = vmatprep.subr.bf16.mxu0 %v13148_v26 }
 0x52f   :  { %11183 = vmatpush3.bf16.msra.mxu1 %v13102_v53 }
 0x530   :  { %11212 = vmatprep.subr.bf16.mxu1 %v13103_v20 }
 0x531   :  { %11293 = vmatpush3.bf16.msra.mxu0 %v13150_v37 }
 0x532   :  { %9572 = vmatmul.mubr.bf16.vlgmr.msra.gmra.mrb[44].mxu1 %v8687_v39  ;;  %v13152_v39 = vld [vmem:[%s14006_s5 + $0x308] sm:$0xff]  }
 0x533   :  { %11213 = vmatpush3.bf16.msra.mxu1 %v13104_v38  ;;  %9651 = vmatprep.mubr.bf16.mxu1 %v8692_v41  ;;  %v13154_v41 = vld [vmem:[%s14006_s5 + $0x318] sm:$0xff]  }
 0x534   :  { %11214 = vmatprep.subr.bf16.mxu1 %v13105_v40  ;;  %v13153_v40 = vld [vmem:[%s14006_s5 + $0x310] sm:$0xff]  }
 0x537   :  { %11215 = vmatpush3.bf16.msra.mxu1 %v13106_v42  ;;  %v13155_v42 = vld [vmem:[%s14006_s5 + $0x320] sm:$0xff]  }
 0x538   :  { %11216 = vmatprep.subr.bf16.mxu1 %v13107_v44  ;;  %v13156_v44 = vld [vmem:[%s14006_s5 + $0x328] sm:$0xff]  }
 0x53b   :  { %11217 = vmatpush3.bf16.msra.mxu1 %v13108_v10  ;;  %v13157_v10 = vld [vmem:[%s14006_s5 + $0x330] sm:$0xff]  }
 0x53c   :  { %11218 = vmatprep.subr.bf16.mxu1 %v13109_v45 }
 0x53f   :  { %11219 = vmatpush3.bf16.msra.mxu1 %v13110_v46  ;;  %v3820_v46 = vrot.slane %v3766_v16, %v13548_v33 }
 0x540   :  { %11220 = vmatprep.subr.bf16.mxu1 %v13111_v63 }
 0x543   :  { %11221 = vmatpush3.bf16.msra.mxu1 %v13112_v30 }
 0x544   :  { %11222 = vmatprep.subr.bf16.mxu1 %v13113_v47 }
 0x547   :  { %11223 = vmatpush3.bf16.msra.mxu1 %v13114_v54 }
 0x548   :  { %11224 = vmatprep.subr.bf16.mxu1 %v13115_v17  ;;  %v13158_v17 = vld [vmem:[%s14006_s5 + $0x338] sm:$0xff]   ;;  %s13313_s5 = smov [#allocation11]  }
 0x549   :  { %s9827_s28 = sshll.u32 %s13313_s5, 4  ;;  %s9828_s28 = int_to_ptr.vmem [resolvable:$true] %s9827_s28 }
 0x54a   :  { %s13271_s29 = scalar_lea.vmem %s9828_s28, 128  ;;  %p13276_p13 = scmp.lt.s32.totalorder %s9828_s28, %s9828_s28 }
 0x54b   :  { %11225 = vmatpush3.bf16.msra.mxu1 %v13116_v49  ;;  %p13272_p12 = scmp.ne.s32.totalorder %s9828_s28, %s13271_s29  ;;  %p13277_p0 = scmp.lt.s32.totalorder %s13271_s29, %s13271_s29 }
 0x54c   :  { %11226 = vmatprep.subr.bf16.mxu1 %v13117_v57 }
 0x54d   :  { %p13278_p1 = por %p13277_p0, %p13276_p13 }
 0x54f   :  { %11227 = vmatpush3.bf16.msra.mxu1 %v13118_v56  ;;  %p13279_p2 = pnand %p13278_p1, %p13272_p12 }
 0x550   :  { %11256 = vmatprep.subr.bf16.mxu1 %v13119_v52 }
 0x552   :  { %9652 = vmatmul.mubr.bf16.vlgmr.msra.gmra.mrb[48].mxu1 %v8691_v62 }
 0x553   :  { %11257 = vmatpush3.bf16.msra.mxu1 %v13121_v14 }
 0x554   :  { %11258 = vmatprep.subr.bf16.mxu1 %v13123_v1 }
 0x557   :  { %11259 = vmatpush3.bf16.msra.mxu1 %v13125_v2 }
 0x558   :  { %11260 = vmatprep.subr.bf16.mxu1 %v13127_v3 }
 0x55b   :  { %11261 = vmatpush3.bf16.msra.mxu1 %v13129_v4 }
 0x55c   :  { %11262 = vmatprep.subr.bf16.mxu1 %v13131_v43 }
 0x55f   :  { %11263 = vmatpush3.bf16.msra.mxu1 %v13133_v6 }
 0x560   :  { %11264 = vmatprep.subr.bf16.mxu1 %v13135_v55 }
 0x563   :  { %11265 = vmatpush3.bf16.msra.mxu1 %v13137_v23 }
 0x564   :  { %11266 = vmatprep.subr.bf16.mxu1 %v13139_v7 }
 0x567   :  { %11267 = vmatpush3.bf16.msra.mxu1 %v13141_v21 }
 0x568   :  { %11268 = vmatprep.subr.bf16.mxu1 %v13143_v8 }
 0x56b   :  { %11269 = vmatpush3.bf16.msra.mxu1 %v13145_v9 }
 0x56c   :  { %11270 = vmatprep.subr.bf16.mxu1 %v13147_v11 }
 0x56f   :  { %11271 = vmatpush3.bf16.msra.mxu1 %v13149_v12 }
 0x570   :  { %11335 = vmatprep.subr.bf16.mxu1 %v13311_v0 }
 0x585   :  { %v8343_v5 = vpop.f32.mrb[28].mxu1 }
 0x586   :  { %v11369_v25 = vadd.f32 %v8343_v5, %v3804_v59  ;;  %v8507_v27 = vpop.f32.mrb[16].mxu0  ;;  %v8345_v19 = vpop.f32.mrb[29].mxu1 }
 0x587   :  { %v11371_v48 = vadd.f32 %v8507_v27, %v3812_v24  ;;  %v11370_v58 = vadd.f32 %v8345_v19, %v3808_v18  ;;  %v8509_v28 = vpop.f32.mrb[17].mxu0  ;;  %v8347_v29 = vpop.f32.mrb[30].mxu1 }
 0x588   :  { %v8682_v13 = vmax.f32 %v11369_v25, 0.0  ;;  %v11372_v60 = vadd.f32 %v8509_v28, %v3816_v22  ;;  %v8511_v26 = vpop.f32.mrb[18].mxu0  ;;  %v8348_v53 = vpop.f32.mrb[31].mxu1  ;;  %v10920_v25 = vld [vmem:[#allocation10] ss:$0 sm:$0xff] }
 0x589   :  { %v8684_v31 = vmax.f32 %v11371_v48, 0.0  ;;  %v8683_v32 = vmax.f32 %v11370_v58, 0.0  ;;  %v8512_v20 = vpop.f32.mrb[19].mxu0 }
 0x58a   :  { %v8685_v61 = vmax.f32 %v11372_v60, 0.0  ;;  %v8695_v35 = vpack.c.bf16 %v8682_v13, %v8682_v13 }
 0x58b   :  { %v8696_v36 = vpack.c.bf16 %v8683_v32, %v8683_v32  ;;  %v8697_v38 = vpack.c.bf16 %v8684_v31, %v8684_v31 }
 0x58c   :  { %v8698_v37 = vpack.c.bf16 %v8685_v61, %v8685_v61 }
 0x58d   :  { %9731 = vmatprep.mubr.bf16.mxu1 %v8696_v36 }
 0x58e   :  { %9771 = vmatprep.mubr.bf16.mxu0 %v8698_v37  ;;  %9732 = vmatmul.mubr.bf16.vlgmr.msra.gmra.mrb[52].mxu1 %v8695_v35 }
 0x58f   :  { %9772 = vmatmul.mubr.bf16.vlgmr.msra.gmra.mrb[32].mxu0 %v8697_v38  ;;  %11336 = vmatpush3.bf16.msra.mxu1 %v13151_v34 }
 0x590   :  { %11337 = vmatprep.subr.bf16.mxu1 %v13311_v0  ;;  %11351 = vmatprep.mubr.msk.bf16.mxu1 %vm13312_vm1, %v13311_v0 }
 0x593   :  { %11338 = vmatpush3.bf16.msra.mxu1 %v13152_v39 }
 0x594   :  { %11339 = vmatprep.subr.bf16.mxu1 %v13311_v0 }
 0x597   :  { %11340 = vmatpush3.bf16.msra.mxu1 %v13153_v40 }
 0x598   :  { %11341 = vmatprep.subr.bf16.mxu1 %v13311_v0 }
 0x59b   :  { %11342 = vmatpush3.bf16.msra.mxu1 %v13154_v41 }
 0x59c   :  { %11343 = vmatprep.subr.bf16.mxu1 %v13311_v0 }
 0x59f   :  { %11344 = vmatpush3.bf16.msra.mxu1 %v13155_v42 }
 0x5a0   :  { %11345 = vmatprep.subr.bf16.mxu1 %v13311_v0 }
 0x5a3   :  { %11346 = vmatpush3.bf16.msra.mxu1 %v13156_v44 }
 0x5a4   :  { %11347 = vmatprep.subr.bf16.mxu1 %v13311_v0 }
 0x5a5   :  { %v11109_v45 = vpop.f32.mrb[32].mxu1 }
 0x5a6   :  { %v8668_v63 = vpop.f32.mrb[20].mxu0  ;;  %v11110_v30 = vpop.f32.mrb[33].mxu1 }
 0x5a7   :  { %v11111_v47 = vadd.f32 %v11110_v30, %v11109_v45  ;;  %v11333_v54 = vpop.f32.mrb[21].mxu0  ;;  %v11112_v15 = vpop.f32.mrb[34].mxu1  ;;  %11348 = vmatpush3.bf16.msra.mxu1 %v13157_v10 }
 0x5a8   :  { %v8671_v49 = vpop.f32.mrb[22].mxu0  ;;  %v11113_v50 = vpop.f32.mrb[35].mxu1  ;;  %11349 = vmatprep.subr.bf16.mxu1 %v13311_v0 }
 0x5a9   :  { %v8549_v57 = vadd.f32 %v11111_v47, %v3820_v46  ;;  %v11334_v56 = vpop.f32.mrb[23].mxu0 }
 0x5ab   :  { %11350 = vmatpush3.bf16.msra.mxu1 %v13158_v17 }
 0x5c5   :  { %v11131_v51 = vpop.f32.mrb[36].mxu1 }
 0x5c6   :  { %v11206_v52 = vpop.f32.mrb[24].mxu0  ;;  %v11132_v33 = vpop.f32.mrb[37].mxu1 }
 0x5c7   :  { %v11133_v14 = vadd.f32 %v11132_v33, %v11131_v51  ;;  %v11207_v62 = vpop.f32.mrb[25].mxu0  ;;  %v11134_v1 = vpop.f32.mrb[38].mxu1 }
 0x5c8   :  { %v11208_v2 = vadd.f32 %v11207_v62, %v11206_v52  ;;  %v11209_v3 = vpop.f32.mrb[26].mxu0  ;;  %v11135_v4 = vpop.f32.mrb[39].mxu1 }
 0x5c9   :  { %v8589_v43 = vadd.f32 %v11133_v14, %v8549_v57  ;;  %v11210_v6 = vpop.f32.mrb[27].mxu0 }
 0x5e5   :  { %v11153_v55 = vpop.f32.mrb[40].mxu1 }
 0x5e6   :  { %v11250_v23 = vpop.f32.mrb[28].mxu0  ;;  %v11154_v7 = vpop.f32.mrb[41].mxu1 }
 0x5e7   :  { %v11155_v21 = vadd.f32 %v11154_v7, %v11153_v55  ;;  %v11251_v8 = vpop.f32.mrb[29].mxu0  ;;  %v11156_v0 = vpop.f32.mrb[42].mxu1 }
 0x5e8   :  { %v11252_v9 = vadd.f32 %v11251_v8, %v11250_v23  ;;  %v11253_v11 = vpop.f32.mrb[30].mxu0  ;;  %v11157_v12 = vpop.f32.mrb[43].mxu1 }
 0x5e9   :  { %v8629_v16 = vadd.f32 %v11155_v21, %v8589_v43  ;;  %v11254_v59 = vpop.f32.mrb[31].mxu0 }
 0x5eb   :  { %v8669_v24 = vadd.f32 %v8668_v63, %v8629_v16 }
 0x5ed   :  { %v8686_v18 = vmax.f32 %v8669_v24, 0.0 }
 0x5ef   :  { %v8699_v22 = vpack.c.bf16 %v8686_v18, %v8686_v18 }
 0x5f1   :  { %11352 = vmatmul.mubr.bf16.vlgmr.msra.gmra.mrb[56].mxu1 %v8699_v22 }
 0x605   :  { %v11184_v5 = vpop.f32.mrb[44].mxu1 }
 0x606   :  { %v11185_v27 = vpop.f32.mrb[45].mxu1 }
 0x607   :  { %v11186_v19 = vadd.f32 %v11185_v27, %v11184_v5  ;;  %v11187_v48 = vpop.f32.mrb[46].mxu1 }
 0x608   :  { %v11188_v58 = vpop.f32.mrb[47].mxu1 }
 0x609   :  { %v9574_v28 = vadd.f32 %v11186_v19, %v10920_v25 }
 0x60b   :  { %v9614_v29 = vadd.f32 %v11208_v2, %v9574_v28 }
 0x625   :  { %v11228_v13 = vpop.f32.mrb[48].mxu1 }
 0x626   :  { %v11229_v60 = vpop.f32.mrb[49].mxu1 }
 0x627   :  { %v11230_v26 = vadd.f32 %v11229_v60, %v11228_v13  ;;  %v11231_v53 = vpop.f32.mrb[50].mxu1 }
 0x628   :  { %v11232_v31 = vpop.f32.mrb[51].mxu1 }
 0x629   :  { %v9654_v32 = vadd.f32 %v11230_v26, %v9614_v29 }
 0x62b   :  { %v9694_v20 = vadd.f32 %v11252_v9, %v9654_v32 }
 0x661   :  { %v11272_v61 = vpop.f32.mrb[52].mxu1 }
 0x662   :  { %v11294_v36 = vpop.f32.mrb[32].mxu0  ;;  %v11273_v34 = vpop.f32.mrb[53].mxu1 }
 0x663   :  { %v11274_v35 = vadd.f32 %v11273_v34, %v11272_v61  ;;  %v11295_v37 = vpop.f32.mrb[33].mxu0  ;;  %v11275_v38 = vpop.f32.mrb[54].mxu1 }
 0x664   :  { %v11296_v39 = vadd.f32 %v11295_v37, %v11294_v36  ;;  %v11297_v40 = vpop.f32.mrb[34].mxu0  ;;  %v11276_v41 = vpop.f32.mrb[55].mxu1 }
 0x665   :  { %v9734_v42 = vadd.f32 %v11274_v35, %v9694_v20  ;;  %v11298_v44 = vpop.f32.mrb[35].mxu0 }
 0x667   :  { %v9774_v10 = vadd.f32 %v11296_v39, %v9734_v42 }
 0x6c4   :  { %v9813_v45 = vpop.f32.mrb[56].mxu1 }
 0x6c5   :  { %v9814_v46 = vadd.f32 %v9813_v45, %v9774_v10  ;;  %v11353_v63 = vpop.f32.mrb[57].mxu1 }
 0x6c6   :  { %v9816_v30 = vpop.f32.mrb[58].mxu1 }
 0x6c7   :  { %v11354_v47 = vpop.f32.mrb[59].mxu1  ;;  %9820 = vst.msk [vmem:[#allocation11] sm:$0xff] %vm9819_vm2, %v9814_v46 }
 0x6c8   :  { %13282 = shalt.err (!%p13279_p2)
}
 0x6c9   :  { %s13283_s9 = scalar_lea.hbm %s14008_s7, 128 }
 0x6ca   :  { %p13284_p3 = scmp.ne.s32.totalorder %s14008_s7, %s13283_s9  ;;  %p13287_p4 = scmp.lt.u32.totalorder %s13283_s9, %s14008_s7 }
 0x6cc   :  { %p13289_p5 = pnand %p13287_p4, %p13284_p3 }
 0x6ce   :  { %13292 = shalt.err (!%p13289_p5)
}
 0x6cf   :  { %9830 = dma.vmem_to_hbm [thread:$0]  %s9828_s28, 128, %s14008_s7, [#allocation4]  }
 0x6d0   :  { %13299 = dma.done.wait [#allocation4], 128  }
 0x6d1   :  { %13300 = vsyncadd [#allocation4], 4294967168 }
 0x6d2   :  { %9834 = vsyncpa [#allocation3], 1 }
 0x6d3   :  { %9835 = vsyncpa [#allocation6], 1 }
 0x6d4   :  { %9836 = vsyncpa [#allocation9], 1 }
 0x6d5   :  { %9837 = vsyncpa [#allocation4], 1 }

</bundles_post_ra>
